<compile_context>
chip_gen: v7x
topology: tpu7x:2x2x1
jax: 0.10.0
libtpu: 0.0.40
codegen_flags: <defaults>
</compile_context>

<pallas_src>
import jax
import jax.numpy as jnp
from jax.experimental import pallas as pl
from jax.experimental.pallas import tpu as pltpu


# ----------------------------------------------------------------------------
# Pallas kernel
# ----------------------------------------------------------------------------
def _kgfm_kernel(u_ref, h_ref, r_ref, t_ref,
                 rep_ref, seg_ref, expn_ref, fold_ref,
                 wagg_ref, bagg_ref, whead_ref, bhead_ref,
                 out_ref):
    f32 = jnp.float32
    u = u_ref[...].astype(f32)            # [TB, D]   user embeddings
    h = h_ref[...].astype(f32)            # [TB, D]   item (head) embeddings
    r = r_ref[...].astype(f32)            # [TB, K*D] neighbor relations (bf16 stream)
    t = t_ref[...].astype(f32)            # [TB, K*D] neighbor entities  (bf16 stream)
    D = u.shape[1]

    # ---- FMMessagePassFromKGCN_item (lane-dense, MXU segment reductions) ----
    # u replicated K times along lanes via a constant [D, K*D] 0/1 matrix
    u_rep = jnp.dot(u, rep_ref[...], preferred_element_type=f32)        # [TB, K*D]
    # attention logits <u, r_k>: segment-sum over each D-wide slice
    ur = jnp.dot(u_rep * r, seg_ref[...], preferred_element_type=f32)   # [TB, K]
    ur = ur - jnp.max(ur, axis=-1, keepdims=True)
    e = jnp.exp(ur)
    att = e * pl.reciprocal(jnp.sum(e, axis=-1, keepdims=True), approx=True)
    # expand att back to K*D lanes, weight the neighbor entities
    att_exp = jnp.dot(att, expn_ref[...], preferred_element_type=f32)   # [TB, K*D]
    tw = att_exp * t                                                     # [TB, K*D]
    # square_of_sum - sum_of_square, both sums over K via the fold matrix
    s = jnp.dot(tw, fold_ref[...], preferred_element_type=f32)           # [TB, D]
    ssq = jnp.dot(tw * tw, fold_ref[...], preferred_element_type=f32)    # [TB, D]
    Nh = s * s - ssq                                                      # [TB, D]

    # ---- aggregate (Bi-Interaction), item + user fused in one matmul --------
    # item = leaky(W1(h+Nh)) + leaky(W2(h*Nh)); user = leaky(W1(u+u)) + leaky(W2(u*u))
    # block-diag(W1_t, W2_t, W1_t, W2_t) makes this a single [TB,4D]@[4D,4D].
    agg_in = jnp.concatenate([h + Nh, h * Nh, u + u, u * u], axis=-1)     # [TB, 4D]
    y = jnp.dot(agg_in, wagg_ref[...], preferred_element_type=f32) + bagg_ref[...]
    y = jnp.where(y > 0, y, 0.2 * y)                                      # LeakyReLU(0.2)
    item = y[:, :D] + y[:, D:2 * D]
    user = y[:, 2 * D:3 * D] + y[:, 3 * D:]

    # ---- MLP head: w_last1/2/3 are purely affine (matches PyTorch forward),
    # folded offline into one [4D,1] map; emit a lane-dense [1, TB] row.
    comb = jnp.concatenate([user, item, user + item, user * item], axis=-1)  # [TB, 4D]
    logit = jax.lax.dot_general(
        whead_ref[...], comb, (((1,), (1,)), ((), ())),
        preferred_element_type=f32) + bhead_ref[...]                          # [1, TB]
    out_ref[...] = jax.nn.sigmoid(logit)


# ----------------------------------------------------------------------------
# Tile sizing: lane-padded footprint, generation-aware VMEM budget
# ----------------------------------------------------------------------------
def _choose_tile_b(B, K, D):
    cap = None
    try:
        cap = getattr(pltpu.get_tpu_info(), "vmem_capacity_bytes", None)
    except Exception:
        cap = None
    if cap is None:
        cap = 64 * 1024 * 1024  # conservative (v7x-sized) if query unavailable

    if cap >= 100 * 1024 * 1024:          # v5e / v6e: 128 MiB physical VMEM
        budget, limit, tb_max = 32 << 20, 48 << 20, 2048
    else:                                  # v7x: 64 MiB physical per TC
        budget, limit, tb_max = 16 << 20, 28 << 20, 1024

    lane = 128
    def pad(cols, bytes_per):              # lane-padded bytes per row
        return -(-cols // lane) * lane * bytes_per

    KD = K * D
    per_row = (2 * 2 * pad(KD, 2)          # r, t bf16 streams, double-buffered
               + 2 * 2 * pad(D, 4)         # u, h f32 streams (lane-padded), 2 bufs
               + 6 * pad(KD, 4)            # f32 [K*D]-wide temporaries
               + 4 * pad(4 * D, 4)         # [4D]-wide temporaries
               + 8 * pad(D, 4))            # [D]-wide temporaries

    tb = max(128, min(tb_max, (budget // per_row) // 128 * 128))
    tb = min(tb, -(-B // 128) * 128)       # don't exceed the (rounded-up) batch
    if B > 2 * 128:                        # >=2 grid steps: megacore + pipelining
        tb = min(tb, max(128, (B // 2) // 128 * 128))
    return int(tb), int(limit)


# ----------------------------------------------------------------------------
# Wrapper: batch-tiled pallas_call
# ----------------------------------------------------------------------------
def kgfm_head(user_embs, h_embs, r_embs, t_embs, params):
    B, D = user_embs.shape
    K = r_embs.shape[1]
    KD = K * D

    # lane-dense flat layout for the dominant streams; stream them as bf16
    r_flat = r_embs.reshape(B, KD).astype(jnp.bfloat16)
    t_flat = t_embs.reshape(B, KD).astype(jnp.bfloat16)
    user_embs = user_embs.astype(jnp.float32)
    h_embs = h_embs.astype(jnp.float32)

    tb, vmem_limit = _choose_tile_b(B, K, D)

    # constant 0/1 matrices that move the K-segment reductions onto the MXU
    eye_d = jnp.eye(D, dtype=jnp.float32)
    rep_m = jnp.tile(eye_d, (1, K))                                   # [D,  K*D]
    fold_m = jnp.tile(eye_d, (K, 1))                                  # [K*D, D]
    seg_m = jnp.repeat(jnp.eye(K, dtype=jnp.float32), D, axis=0)      # [K*D, K]
    exp_m = jnp.asarray(seg_m.T)                                      # [K,  K*D]

    def stream(cols):
        return pl.BlockSpec((tb, cols), lambda b: (b, 0))

    def resident(arr):
        # constant index_map -> DMA'd once, stays VMEM-resident across steps
        return pl.BlockSpec(arr.shape, lambda b: (0,) * arr.ndim)

    in_specs = [
        stream(D), stream(D), stream(KD), stream(KD),
        resident(rep_m), resident(seg_m), resident(exp_m), resident(fold_m),
        resident(params["W_agg"]), resident(params["b_agg"]),
        resident(params["W_head_row"]), resident(params["b_head"]),
    ]
    out_spec = pl.BlockSpec((1, tb), lambda b: (0, b))

    out = pl.pallas_call(
        _kgfm_kernel,
        grid=(pl.cdiv(B, tb),),
        in_specs=in_specs,
        out_specs=out_spec,
        out_shape=jax.ShapeDtypeStruct((1, B), jnp.float32),
        compiler_params=pltpu.CompilerParams(
            dimension_semantics=("parallel",),
            vmem_limit_bytes=vmem_limit),
    )(user_embs, h_embs, r_flat, t_flat,
      rep_m, seg_m, exp_m, fold_m,
      params["W_agg"], params["b_agg"], params["W_head_row"], params["b_head"])
    return out[0]


# ----------------------------------------------------------------------------
# JAX glue: parameter init (mirrors KGFM.__init__) and embedding gather
# ----------------------------------------------------------------------------
def _max_norm_lookup(table, idx, max_norm=1.0):
    # Mimics nn.Embedding(max_norm=1): renormalize rows whose L2 norm exceeds 1.
    rows = table[idx]
    norm = jnp.linalg.norm(rows, axis=-1, keepdims=True)
    scale = jnp.where(norm > max_norm, max_norm / (norm + 1e-7), 1.0)
    return rows * scale


def init_params(key, n_users, n_jobs, n_entities, n_relations, dim):
    half = dim // 2
    ks = jax.random.split(key, 10)

    entity_table = 0.1 * jax.random.normal(ks[0], (n_entities, dim), jnp.float32)
    relation_table = 0.1 * jax.random.normal(ks[1], (n_relations, dim), jnp.float32)

    # embedding_transform: Linear(768, half); fill first half of user/job rows
    Wt = 0.02 * jax.random.normal(ks[2], (half, 768), jnp.float32)
    bt = jnp.zeros((half,), jnp.float32)
    data_users = 0.05 * jax.random.normal(ks[3], (n_users, 768), jnp.float32)
    data_jobs = 0.05 * jax.random.normal(ks[4], (n_jobs, 768), jnp.float32)
    tu = data_users @ Wt.T + bt
    tj = data_jobs @ Wt.T + bt
    entity_table = entity_table.at[:n_users, :half].set(tu)
    entity_table = entity_table.at[n_users:n_users + n_jobs, :half].set(tj)

    def linear(k, fan_in, fan_out):
        w = 0.1 * jax.random.normal(k, (fan_out, fan_in), jnp.float32)
        b = jnp.zeros((fan_out,), jnp.float32)
        return w, b

    W1, b1 = linear(ks[5], dim, dim)            # aggregate W1
    W2, b2 = linear(ks[6], dim, dim)            # aggregate W2 (Bi-Interaction)
    Wl1, bl1 = linear(ks[7], 4 * dim, dim)      # w_last1
    Wl2, bl2 = linear(ks[8], dim, dim // 2)     # w_last2
    Wl3, bl3 = linear(ks[9], dim // 2, 1)       # w_last3

    # ---- fused kernel-side parameters (offline precompute) ------------------
    D = dim
    W_agg = jnp.zeros((4 * D, 4 * D), jnp.float32)
    for idx, blk in enumerate([W1.T, W2.T, W1.T, W2.T]):
        W_agg = W_agg.at[idx * D:(idx + 1) * D, idx * D:(idx + 1) * D].set(blk)
    b_agg = jnp.concatenate([b1, b2, b1, b2])[None, :]                 # [1, 4D]

    # w_last1 -> w_last2 -> w_last3 are affine with no activation in between
    # (as in the PyTorch forward), so fold them into one [4D,1] map.
    wl3_col = Wl3.T                                                    # [D//2, 1]
    W_fold = Wl1.T @ Wl2.T @ wl3_col                                   # [4D, 1]
    b_fold = (bl1[None, :] @ Wl2.T @ wl3_col
              + bl2[None, :] @ wl3_col + bl3[None, :])                 # [1, 1]

    params = {
        "entity_table": entity_table,
        "relation_table": relation_table,
        # raw (transposed) weights, kept for the pure-JAX reference
        "W1_t": W1.T, "b1": b1[None, :],
        "W2_t": W2.T, "b2": b2[None, :],
        "Wl1_t": Wl1.T, "bl1": bl1[None, :],
        "Wl2_t": Wl2.T, "bl2": bl2[None, :],
        "wl3_row": Wl3, "bl3": bl3[None, :],
        # fused kernel-side params
        "W_agg": W_agg, "b_agg": b_agg,
        "W_head_row": W_fold.T, "b_head": b_fold,
    }
    return params


def kgfm_forward(params, adj_entity, adj_relation, u, i):
    # get_neighbors + head/user lookups (max_norm=1 semantics).  The dominant
    # neighbor streams are cast to bf16 at gather time (halves gather
    # writeback + kernel read traffic in the HBM-bound regime).
    e_ids = adj_entity[i]                                                 # [B, K]
    r_ids = adj_relation[i]                                               # [B, K]
    t_embs = _max_norm_lookup(params["entity_table"], e_ids).astype(jnp.bfloat16)
    r_embs = _max_norm_lookup(params["relation_table"], r_ids).astype(jnp.bfloat16)
    h_embs = _max_norm_lookup(params["entity_table"], i)                  # [B, D]
    user_embs = _max_norm_lookup(params["entity_table"], u)               # [B, D]
    return kgfm_head(user_embs, h_embs, r_embs, t_embs, params)


# Pure-JAX reference (mirrors the PyTorch forward) for a sanity check.
def _kgfm_reference(user_embs, h_embs, r_embs, t_embs, params):
    ur = jnp.sum(user_embs[:, None, :] * r_embs, axis=2)
    att = jax.nn.softmax(ur, axis=-1)[:, :, None]
    tw = att * t_embs
    Nh = jnp.sum(tw, axis=1) ** 2 - jnp.sum(tw ** 2, axis=1)

    def leaky(x):
        return jnp.where(x > 0, x, 0.2 * x)

    def agg(a, b):
        return (leaky((a + b) @ params["W1_t"] + params["b1"])
                + leaky((a * b) @ params["W2_t"] + params["b2"]))

    item = agg(h_embs, Nh)
    user = agg(user_embs, user_embs)
    comb = jnp.concatenate([user, item, user + item, user * item], axis=-1)
    l1 = comb @ params["Wl1_t"] + params["bl1"]
    l2 = l1 @ params["Wl2_t"] + params["bl2"]
    l3 = l2 @ params["wl3_row"].T + params["bl3"]
    return jax.nn.sigmoid(l3)[:, 0]


# ----------------------------------------------------------------------------
if __name__ == "__main__":
    n_users, n_jobs = 4, 4
    n_entities, n_relations = 16, 4
    dim = 32            # even, as required by the module
    n_neighbors = 8
    batch = 2

    key = jax.random.PRNGKey(0)
    k_params, k_adj_e, k_adj_r, k_u, k_i = jax.random.split(key, 5)

    params = init_params(k_params, n_users, n_jobs, n_entities, n_relations, dim)

    adj_entity = jax.random.randint(k_adj_e, (n_entities, n_neighbors), 0, n_entities)
    adj_relation = jax.random.randint(k_adj_r, (n_entities, n_neighbors), 0, n_relations)

    u = jax.random.randint(k_u, (batch,), 0, n_users)
    i = jax.random.randint(k_i, (batch,), n_users, n_users + n_jobs)

    scores = kgfm_forward(params, adj_entity, adj_relation, u, i)
    jax.block_until_ready(scores)
    assert scores.shape == (batch,)

    # sanity check against the pure-JAX reference, feeding it the same
    # bf16-rounded neighbor streams the kernel consumes (loose tol covers the
    # approx softmax reciprocal and the folded-head reassociation).
    t_embs = _max_norm_lookup(params["entity_table"], adj_entity[i]
                              ).astype(jnp.bfloat16).astype(jnp.float32)
    r_embs = _max_norm_lookup(params["relation_table"], adj_relation[i]
                              ).astype(jnp.bfloat16).astype(jnp.float32)
    h_embs = _max_norm_lookup(params["entity_table"], i)
    user_embs = _max_norm_lookup(params["entity_table"], u)
    ref = _kgfm_reference(user_embs, h_embs, r_embs, t_embs, params)
    assert jnp.max(jnp.abs(scores - ref)) < 5e-3, (scores, ref)

    # TODO(synk): BCEWithLogitsLoss branch (labels is not None) is a training-time
    # loss and is intentionally not implemented in the kernel; dropout only
    # appears in the unused KGAT message-passing paths (identity at inference).
    print("KERNEL_OK")
</pallas_src>

<mosaic_0001>
module attributes {stable_mosaic.version = 11 : i64} {
  func.func @_kgfm_kernel(%arg0: i32, %arg1: memref<128x32xf32, #tpu.memory_space<vmem>>, %arg2: memref<128x32xf32, #tpu.memory_space<vmem>>, %arg3: memref<128x256xbf16, #tpu.memory_space<vmem>>, %arg4: memref<128x256xbf16, #tpu.memory_space<vmem>>, %arg5: memref<32x256xf32, #tpu.memory_space<vmem>>, %arg6: memref<256x8xf32, #tpu.memory_space<vmem>>, %arg7: memref<8x256xf32, #tpu.memory_space<vmem>>, %arg8: memref<256x32xf32, #tpu.memory_space<vmem>>, %arg9: memref<128x128xf32, #tpu.memory_space<vmem>>, %arg10: memref<1x128xf32, #tpu.memory_space<vmem>>, %arg11: memref<1x128xf32, #tpu.memory_space<vmem>>, %arg12: memref<1x1xf32, #tpu.memory_space<vmem>>, %arg13: memref<1x128xf32, #tpu.memory_space<vmem>>) attributes {dimension_semantics = [#tpu.dimension_semantics<parallel>], iteration_bounds = array<i64: 1>, scalar_prefetch = 0 : i64, scratch_operands = 0 : i64, tpu.core_type = #tpu.core_type<tc>, window_params = [{transform_indices = @transform_0, window_bounds = array<i64: 128, 32>}, {transform_indices = @transform_1, window_bounds = array<i64: 128, 32>}, {transform_indices = @transform_2, window_bounds = array<i64: 128, 256>}, {transform_indices = @transform_3, window_bounds = array<i64: 128, 256>}, {pipeline_mode = #tpu.pipeline_mode<synchronous>, transform_indices = @transform_4, window_bounds = array<i64: 32, 256>}, {pipeline_mode = #tpu.pipeline_mode<synchronous>, transform_indices = @transform_5, window_bounds = array<i64: 256, 8>}, {pipeline_mode = #tpu.pipeline_mode<synchronous>, transform_indices = @transform_6, window_bounds = array<i64: 8, 256>}, {pipeline_mode = #tpu.pipeline_mode<synchronous>, transform_indices = @transform_7, window_bounds = array<i64: 256, 32>}, {pipeline_mode = #tpu.pipeline_mode<synchronous>, transform_indices = @transform_8, window_bounds = array<i64: 128, 128>}, {pipeline_mode = #tpu.pipeline_mode<synchronous>, transform_indices = @transform_9, window_bounds = array<i64: 1, 128>}, {pipeline_mode = #tpu.pipeline_mode<synchronous>, transform_indices = @transform_10, window_bounds = array<i64: 1, 128>}, {pipeline_mode = #tpu.pipeline_mode<synchronous>, transform_indices = @transform_11, window_bounds = array<i64: 1, 1>}, {transform_indices = @transform_12, window_bounds = array<i64: 1, 128>}]} {
    %c0 = arith.constant 0 : index
    %c0_0 = arith.constant 0 : index
    %0 = vector.load %arg1[%c0, %c0_0] : memref<128x32xf32, #tpu.memory_space<vmem>>, vector<128x32xf32>
    %c0_1 = arith.constant 0 : index
    %c0_2 = arith.constant 0 : index
    %1 = vector.load %arg2[%c0_1, %c0_2] : memref<128x32xf32, #tpu.memory_space<vmem>>, vector<128x32xf32>
    %c0_3 = arith.constant 0 : index
    %c0_4 = arith.constant 0 : index
    %2 = vector.load %arg3[%c0_3, %c0_4] : memref<128x256xbf16, #tpu.memory_space<vmem>>, vector<128x256xbf16>
    %3 = arith.extf %2 : vector<128x256xbf16> to vector<128x256xf32>
    %c0_5 = arith.constant 0 : index
    %c0_6 = arith.constant 0 : index
    %4 = vector.load %arg4[%c0_5, %c0_6] : memref<128x256xbf16, #tpu.memory_space<vmem>>, vector<128x256xbf16>
    %5 = arith.extf %4 : vector<128x256xbf16> to vector<128x256xf32>
    %c0_7 = arith.constant 0 : index
    %c0_8 = arith.constant 0 : index
    %6 = vector.load %arg5[%c0_7, %c0_8] : memref<32x256xf32, #tpu.memory_space<vmem>>, vector<32x256xf32>
    %cst = arith.constant dense<0.000000e+00> : vector<128x256xf32>
    %7 = tpu.matmul %0, %6, %cst {dimension_numbers = #tpu.dot_dimension_numbers<[1], [0], [0], [1], [0, 0, 1, 1], [], []>} : vector<128x32xf32>, vector<32x256xf32>, vector<128x256xf32> -> vector<128x256xf32>
    %8 = arith.mulf %7, %3 : vector<128x256xf32>
    %c0_9 = arith.constant 0 : index
    %c0_10 = arith.constant 0 : index
    %9 = vector.load %arg6[%c0_9, %c0_10] : memref<256x8xf32, #tpu.memory_space<vmem>>, vector<256x8xf32>
    %cst_11 = arith.constant dense<0.000000e+00> : vector<128x8xf32>
    %10 = tpu.matmul %8, %9, %cst_11 {dimension_numbers = #tpu.dot_dimension_numbers<[1], [0], [0], [1], [0, 0, 1, 1], [], []>} : vector<128x256xf32>, vector<256x8xf32>, vector<128x8xf32> -> vector<128x8xf32>
    %cst_12 = arith.constant dense<0xFF800000> : vector<128xf32>
    %11 = vector.multi_reduction <maximumf>, %10, %cst_12 [1] : vector<128x8xf32> to vector<128xf32>
    %12 = vector.shape_cast %11 : vector<128xf32> to vector<128x1xf32>
    %13 = vector.broadcast %12 : vector<128x1xf32> to vector<128x8xf32>
    %14 = arith.subf %10, %13 : vector<128x8xf32>
    %15 = math.exp %14 : vector<128x8xf32>
    %cst_13 = arith.constant dense<0.000000e+00> : vector<128xf32>
    %16 = vector.multi_reduction <add>, %15, %cst_13 [1] : vector<128x8xf32> to vector<128xf32>
    %17 = vector.shape_cast %16 : vector<128xf32> to vector<128x1xf32>
    %18 = tpu.reciprocal %17 {approx = true} : vector<128x1xf32> -> vector<128x1xf32>
    %19 = vector.broadcast %18 : vector<128x1xf32> to vector<128x8xf32>
    %20 = arith.mulf %15, %19 : vector<128x8xf32>
    %c0_14 = arith.constant 0 : index
    %c0_15 = arith.constant 0 : index
    %21 = vector.load %arg7[%c0_14, %c0_15] : memref<8x256xf32, #tpu.memory_space<vmem>>, vector<8x256xf32>
    %cst_16 = arith.constant dense<0.000000e+00> : vector<128x256xf32>
    %22 = tpu.matmul %20, %21, %cst_16 {dimension_numbers = #tpu.dot_dimension_numbers<[1], [0], [0], [1], [0, 0, 1, 1], [], []>} : vector<128x8xf32>, vector<8x256xf32>, vector<128x256xf32> -> vector<128x256xf32>
    %23 = arith.mulf %22, %5 : vector<128x256xf32>
    %c0_17 = arith.constant 0 : index
    %c0_18 = arith.constant 0 : index
    %24 = vector.load %arg8[%c0_17, %c0_18] : memref<256x32xf32, #tpu.memory_space<vmem>>, vector<256x32xf32>
    %cst_19 = arith.constant dense<0.000000e+00> : vector<128x32xf32>
    %25 = tpu.matmul %23, %24, %cst_19 {dimension_numbers = #tpu.dot_dimension_numbers<[1], [0], [0], [1], [0, 0, 1, 1], [], []>} : vector<128x256xf32>, vector<256x32xf32>, vector<128x32xf32> -> vector<128x32xf32>
    %26 = arith.mulf %23, %23 : vector<128x256xf32>
    %c0_20 = arith.constant 0 : index
    %c0_21 = arith.constant 0 : index
    %27 = vector.load %arg8[%c0_20, %c0_21] : memref<256x32xf32, #tpu.memory_space<vmem>>, vector<256x32xf32>
    %cst_22 = arith.constant dense<0.000000e+00> : vector<128x32xf32>
    %28 = tpu.matmul %26, %27, %cst_22 {dimension_numbers = #tpu.dot_dimension_numbers<[1], [0], [0], [1], [0, 0, 1, 1], [], []>} : vector<128x256xf32>, vector<256x32xf32>, vector<128x32xf32> -> vector<128x32xf32>
    %29 = arith.mulf %25, %25 : vector<128x32xf32>
    %30 = arith.subf %29, %28 : vector<128x32xf32>
    %31 = arith.addf %1, %30 : vector<128x32xf32>
    %32 = arith.mulf %1, %30 : vector<128x32xf32>
    %33 = arith.addf %0, %0 : vector<128x32xf32>
    %34 = arith.mulf %0, %0 : vector<128x32xf32>
    %35 = tpu.concatenate %31, %32, %33, %34 in 1 : vector<128x32xf32>, vector<128x32xf32>, vector<128x32xf32>, vector<128x32xf32> -> vector<128x128xf32>
    %c0_23 = arith.constant 0 : index
    %c0_24 = arith.constant 0 : index
    %36 = vector.load %arg9[%c0_23, %c0_24] : memref<128x128xf32, #tpu.memory_space<vmem>>, vector<128x128xf32>
    %cst_25 = arith.constant dense<0.000000e+00> : vector<128x128xf32>
    %37 = tpu.matmul %35, %36, %cst_25 {dimension_numbers = #tpu.dot_dimension_numbers<[1], [0], [0], [1], [0, 0, 1, 1], [], []>} : vector<128x128xf32>, vector<128x128xf32>, vector<128x128xf32> -> vector<128x128xf32>
    %c0_26 = arith.constant 0 : index
    %c0_27 = arith.constant 0 : index
    %38 = vector.load %arg10[%c0_26, %c0_27] : memref<1x128xf32, #tpu.memory_space<vmem>>, vector<1x128xf32>
    %39 = vector.broadcast %38 : vector<1x128xf32> to vector<128x128xf32>
    %40 = arith.addf %37, %39 : vector<128x128xf32>
    %cst_28 = arith.constant 0.000000e+00 : f32
    %41 = vector.broadcast %cst_28 : f32 to vector<128x128xf32>
    %42 = arith.cmpf ogt, %40, %41 : vector<128x128xf32>
    %cst_29 = arith.constant 2.000000e-01 : f32
    %43 = vector.broadcast %cst_29 : f32 to vector<128x128xf32>
    %44 = arith.mulf %43, %40 : vector<128x128xf32>
    %45 = arith.select %42, %40, %44 : vector<128x128xi1>, vector<128x128xf32>
    %46 = vector.extract_strided_slice %45 {offsets = [0, 0], sizes = [128, 32], strides = [1, 1]} : vector<128x128xf32> to vector<128x32xf32>
    %47 = vector.extract_strided_slice %45 {offsets = [0, 32], sizes = [128, 32], strides = [1, 1]} : vector<128x128xf32> to vector<128x32xf32>
    %48 = arith.addf %46, %47 : vector<128x32xf32>
    %49 = vector.extract_strided_slice %45 {offsets = [0, 64], sizes = [128, 32], strides = [1, 1]} : vector<128x128xf32> to vector<128x32xf32>
    %50 = vector.extract_strided_slice %45 {offsets = [0, 96], sizes = [128, 32], strides = [1, 1]} : vector<128x128xf32> to vector<128x32xf32>
    %51 = arith.addf %49, %50 : vector<128x32xf32>
    %52 = arith.addf %51, %48 : vector<128x32xf32>
    %53 = arith.mulf %51, %48 : vector<128x32xf32>
    %54 = tpu.concatenate %51, %48, %52, %53 in 1 : vector<128x32xf32>, vector<128x32xf32>, vector<128x32xf32>, vector<128x32xf32> -> vector<128x128xf32>
    %c0_30 = arith.constant 0 : index
    %c0_31 = arith.constant 0 : index
    %55 = vector.load %arg11[%c0_30, %c0_31] : memref<1x128xf32, #tpu.memory_space<vmem>>, vector<1x128xf32>
    %cst_32 = arith.constant dense<0.000000e+00> : vector<1x128xf32>
    %56 = tpu.matmul %55, %54, %cst_32 {dimension_numbers = #tpu.dot_dimension_numbers<[1], [1], [0], [0], [0, 0, 1, 0], [], []>} : vector<1x128xf32>, vector<128x128xf32>, vector<1x128xf32> -> vector<1x128xf32>
    %c0_33 = arith.constant 0 : index
    %c0_34 = arith.constant 0 : index
    %57 = vector.load %arg12[%c0_33, %c0_34] : memref<1x1xf32, #tpu.memory_space<vmem>>, vector<1x1xf32>
    %58 = vector.broadcast %57 : vector<1x1xf32> to vector<1x128xf32>
    %59 = arith.addf %56, %58 : vector<1x128xf32>
    %60 = arith.negf %59 : vector<1x128xf32>
    %61 = math.exp %60 : vector<1x128xf32>
    %cst_35 = arith.constant 1.000000e+00 : f32
    %62 = vector.broadcast %cst_35 : f32 to vector<1x128xf32>
    %63 = arith.addf %62, %61 : vector<1x128xf32>
    %64 = arith.divf %62, %63 : vector<1x128xf32>
    %c0_36 = arith.constant 0 : index
    %c0_37 = arith.constant 0 : index
    %65 = vector.load %arg13[%c0_36, %c0_37] : memref<1x128xf32, #tpu.memory_space<vmem>>, vector<1x128xf32>
    tpu.vector_store %arg13[%c0_36, %c0_37], %64 {strides = array<i32>} : memref<1x128xf32, #tpu.memory_space<vmem>>, vector<1x128xf32>,
    return
  }
  func.func @transform_0(%arg0: i32) -> (i32, i32) {
    %c0_i32 = arith.constant 0 : i32
    %c0_i32_0 = arith.constant 0 : i32
    return %arg0, %c0_i32 : i32, i32
  }
  func.func @transform_1(%arg0: i32) -> (i32, i32) {
    %c0_i32 = arith.constant 0 : i32
    %c0_i32_0 = arith.constant 0 : i32
    return %arg0, %c0_i32 : i32, i32
  }
  func.func @transform_2(%arg0: i32) -> (i32, i32) {
    %c0_i32 = arith.constant 0 : i32
    %c0_i32_0 = arith.constant 0 : i32
    return %arg0, %c0_i32 : i32, i32
  }
  func.func @transform_3(%arg0: i32) -> (i32, i32) {
    %c0_i32 = arith.constant 0 : i32
    %c0_i32_0 = arith.constant 0 : i32
    return %arg0, %c0_i32 : i32, i32
  }
  func.func @transform_4(%arg0: i32) -> (i32, i32) {
    %c0_i32 = arith.constant 0 : i32
    %c0_i32_0 = arith.constant 0 : i32
    %c0_i32_1 = arith.constant 0 : i32
    return %c0_i32, %c0_i32_0 : i32, i32
  }
  func.func @transform_5(%arg0: i32) -> (i32, i32) {
    %c0_i32 = arith.constant 0 : i32
    %c0_i32_0 = arith.constant 0 : i32
    %c0_i32_1 = arith.constant 0 : i32
    return %c0_i32, %c0_i32_0 : i32, i32
  }
  func.func @transform_6(%arg0: i32) -> (i32, i32) {
    %c0_i32 = arith.constant 0 : i32
    %c0_i32_0 = arith.constant 0 : i32
    %c0_i32_1 = arith.constant 0 : i32
    return %c0_i32, %c0_i32_0 : i32, i32
  }
  func.func @transform_7(%arg0: i32) -> (i32, i32) {
    %c0_i32 = arith.constant 0 : i32
    %c0_i32_0 = arith.constant 0 : i32
    %c0_i32_1 = arith.constant 0 : i32
    return %c0_i32, %c0_i32_0 : i32, i32
  }
  func.func @transform_8(%arg0: i32) -> (i32, i32) {
    %c0_i32 = arith.constant 0 : i32
    %c0_i32_0 = arith.constant 0 : i32
    %c0_i32_1 = arith.constant 0 : i32
    return %c0_i32, %c0_i32_0 : i32, i32
  }
  func.func @transform_9(%arg0: i32) -> (i32, i32) {
    %c0_i32 = arith.constant 0 : i32
    %c0_i32_0 = arith.constant 0 : i32
    %c0_i32_1 = arith.constant 0 : i32
    return %c0_i32, %c0_i32_0 : i32, i32
  }
  func.func @transform_10(%arg0: i32) -> (i32, i32) {
    %c0_i32 = arith.constant 0 : i32
    %c0_i32_0 = arith.constant 0 : i32
    %c0_i32_1 = arith.constant 0 : i32
    return %c0_i32, %c0_i32_0 : i32, i32
  }
  func.func @transform_11(%arg0: i32) -> (i32, i32) {
    %c0_i32 = arith.constant 0 : i32
    %c0_i32_0 = arith.constant 0 : i32
    %c0_i32_1 = arith.constant 0 : i32
    return %c0_i32, %c0_i32_0 : i32, i32
  }
  func.func @transform_12(%arg0: i32) -> (i32, i32) {
    %c0_i32 = arith.constant 0 : i32
    %c0_i32_0 = arith.constant 0 : i32
    return %c0_i32, %arg0 : i32, i32
  }
}

</mosaic_0001>

<bundles_post_ra>
// kernel: tpu_custom_call.1
= control target key start
LH: loop header
LB: loop body
LE: loop exit
PB: predicated region body
PF: predicated region fallthrough
CT: control target
= control target key end

     0   :  { %s6039_s0 = inlined_call_operand.vmem [shape: f32[2,32], index: 0, kind: input, shape index: {}]   ;;  %s6040_s1 = inlined_call_operand.vmem [shape: f32[2,32], index: 1, kind: input, shape index: {}]   ;;  %s6041_s2 = inlined_call_operand.vmem [shape: bf16[2,256], index: 2, kind: input, shape index: {}]   ;;  %s6042_s3 = inlined_call_operand.vmem [shape: bf16[2,256], index: 3, kind: input, shape index: {}]   ;;  %s6043_s4 = inlined_call_operand.vmem [shape: f32[32,256], index: 4, kind: input, shape index: {}]   ;;  %s6044_s5 = inlined_call_operand.vmem [shape: f32[256,8], index: 5, kind: input, shape index: {}]   ;;  %s6045_s6 = inlined_call_operand.vmem [shape: f32[8,256], index: 6, kind: input, shape index: {}]   ;;  %s6046_s7 = inlined_call_operand.vmem [shape: f32[256,32], index: 7, kind: input, shape index: {}]   ;;  %s6047_s8 = inlined_call_operand.vmem [shape: f32[128,128], index: 8, kind: input, shape index: {}]   ;;  %s6048_s9 = inlined_call_operand.vmem [shape: f32[1,128], index: 9, kind: input, shape index: {}]   ;;  %s6049_s10 = inlined_call_operand.vmem [shape: f32[1,128], index: 10, kind: input, shape index: {}]   ;;  %s6050_s11 = inlined_call_operand.<no memory space> [shape: f32[1,1], index: 11, kind: input, shape index: {}]   ;;  %s6051_s12 = inlined_call_operand.hbm [shape: f32[1,2], index: 12, kind: output, shape index: {}]  }
   0x1   :  { %v17_v0 = vstv %s6050_s11 }
   0x2   :  { %18 = vst [vmem:[#allocation2] sm:$0x1] %v17_v0 }
   0x3   :  { %v333_v1 = vld [vmem:[%s6043_s4 + $0x8] sm:$0xff]  ;;  %v335_v2 = vld [vmem:[%s6043_s4 + $0x18] sm:$0xff]  ;;  %v332_v3 = vld [vmem:[%s6043_s4] sm:$0xff]  ;;  %v6052_v8 = vmov 0.0   ;;  %vm340_vm0 = vcmask 261120  }
   0x4   :  { %v3707_v4 = vpack.c.bf16 %v335_v2, %v333_v1  ;;  %v334_v5 = vld [vmem:[%s6043_s4 + $0x10] sm:$0xff]  ;;  %v337_v6 = vld [vmem:[%s6043_s4 + $0x28] sm:$0xff]  ;;  %v339_v7 = vld [vmem:[%s6043_s4 + $0x38] sm:$0xff]  ;;  %453 = vmatprep.mubr.f32.mxu0 %v6052_v8 }
   0x5   :  { %v3709_v9 = vpack.c.bf16 %v334_v5, %v332_v3  ;;  %v3711_v10 = vpack.c.bf16 %v339_v7, %v337_v6  ;;  %v336_v11 = vld [vmem:[%s6043_s4 + $0x20] sm:$0xff]  ;;  %v338_v12 = vld [vmem:[%s6043_s4 + $0x30] sm:$0xff]  ;;  %v983_v16 = vld [vmem:[%s6044_s5 + $0x88] sm:$0xff] }
   0x6   :  { %3708 = vmatprep.subr.bf16.mxu0 %v3707_v4  ;;  %v3713_v13 = vpack.c.bf16 %v338_v12, %v336_v11  ;;  %v44_v14 = vld [vmem:[%s6039_s0] sm:$0xff]  ;;  %v967_v18 = vld [vmem:[%s6044_s5 + $0x8] sm:$0xff]  ;;  %v984_v19 = vld [vmem:[%s6044_s5 + $0x90] sm:$0xff] }
   0x7   :  { %3710 = vmatpush1.bf16.msra.mxu0 %v3709_v9  ;;  %v982_v15 = vld [vmem:[%s6044_s5 + $0x80] sm:$0xff]  ;;  %v985_v20 = vld [vmem:[%s6044_s5 + $0x98] sm:$0xff]  ;;  %v968_v23 = vld [vmem:[%s6044_s5 + $0x10] sm:$0xff] }
   0x8   :  { %3712 = vmatprep.subr.bf16.mxu0 %v3711_v10  ;;  %v966_v17 = vld [vmem:[%s6044_s5] sm:$0xff]  ;;  %v3715_v21 = vpack.c.bf16 %v983_v16, %v982_v15  ;;  %v969_v24 = vld [vmem:[%s6044_s5 + $0x18] sm:$0xff]  ;;  %v45_v25 = vld [vmem:[%s6039_s0 + $0x8] sm:$0xff]  ;;  %v3719_v26 = vpack.c.bf16 %v985_v20, %v984_v19 }
   0x9   :  { %v3717_v22 = vpack.c.bf16 %v967_v18, %v966_v17  ;;  %v986_v27 = vld [vmem:[%s6044_s5 + $0xa0] sm:$0xff]  ;;  %v987_v28 = vld [vmem:[%s6044_s5 + $0xa8] sm:$0xff]  ;;  %v3721_v29 = vpack.c.bf16 %v969_v24, %v968_v23  ;;  %v46_v33 = vld [vmem:[%s6039_s0 + $0x10] sm:$0xff] }
   0xa   :  { %3716 = vmatprep.subr.bf16.mxu1 %v3715_v21  ;;  %v3723_v30 = vpack.c.bf16 %v987_v28, %v986_v27  ;;  %v970_v31 = vld [vmem:[%s6044_s5 + $0x20] sm:$0xff]  ;;  %v971_v32 = vld [vmem:[%s6044_s5 + $0x28] sm:$0xff]  ;;  %v988_v34 = vld [vmem:[%s6044_s5 + $0xb0] sm:$0xff] }
   0xb   :  { %3714 = vmatpush1.bf16.msra.mxu0 %v3713_v13  ;;  %3718 = vmatpush3.bf16.msra.mxu1 %v3717_v22  ;;  %v989_v35 = vld [vmem:[%s6044_s5 + $0xb8] sm:$0xff]  ;;  %v3725_v36 = vpack.c.bf16 %v971_v32, %v970_v31 }
   0xc   :  { %3720 = vmatprep.subr.bf16.mxu1 %v3719_v26 }
   0xe   :  { %3293 = vmatmul.mubr.msk.f32.vlgmr.msra.gmra.mrb[0].mxu0 %vm340_vm0, %v44_v14 }
   0xf   :  { %459 = vmatprep.mubr.f32.mxu0 %v6052_v8  ;;  %3722 = vmatpush3.bf16.msra.mxu1 %v3721_v29 }
  0x12   :  { %3294 = vmatmul.mubr.msk.f32.gmra.mrb[2].mxu0 %vm340_vm0, %v45_v25 }
  0x13   :  { %465 = vmatprep.mubr.f32.mxu0 %v6052_v8 }
  0x14   :  { %19 = vsyncpa [#allocation4], 0  ;;  %3724 = vmatprep.subr.bf16.mxu1 %v3723_v30  ;;  %v3727_v37 = vpack.c.bf16 %v989_v35, %v988_v34  ;;  %v972_v38 = vld [vmem:[%s6044_s5 + $0x30] sm:$0xff]  ;;  %v973_v39 = vld [vmem:[%s6044_s5 + $0x38] sm:$0xff]  ;;  %v4186_v17 = vmov 1983009808   ;;  %v619_v19 = vlaneseq }
  0x15   :  { %v47_v40 = vld [vmem:[%s6039_s0 + $0x18] sm:$0xff]  ;;  %v990_v41 = vld [vmem:[%s6044_s5 + $0xc0] sm:$0xff]  ;;  %v991_v42 = vld [vmem:[%s6044_s5 + $0xc8] sm:$0xff]  ;;  %3726 = vmatpush3.bf16.msra.mxu1 %v3725_v36  ;;  %v3729_v43 = vpack.c.bf16 %v973_v39, %v972_v38  ;;  %v617_v18 = vunpack.c.l.s4 %v4186_v17  ;;  %vm1143_vm1 = vcmask 64512   ;;  %s4187_s24 = smov 64   ;;  %s4188_s25 = smov 96  }
  0x16   :  { %3295 = vmatmul.mubr.msk.f32.gmra.mrb[4].mxu0 %vm340_vm0, %v46_v33  ;;  %3728 = vmatprep.subr.bf16.mxu1 %v3727_v37  ;;  %v3731_v44 = vpack.c.bf16 %v991_v42, %v990_v41  ;;  %v974_v45 = vld [vmem:[%s6044_s5 + $0x40] sm:$0xff]  ;;  %v975_v46 = vld [vmem:[%s6044_s5 + $0x48] sm:$0xff]  ;;  %v992_v48 = vld [vmem:[%s6044_s5 + $0xd0] sm:$0xff]  ;;  %v4475_v27 = vshrl.u32 %v619_v19, 7  ;;  %vm2605_vm2 = vcmask 523264   ;;  %vm2622_vm3 = vcmask 785408  }
  0x17   :  { %471 = vmatprep.mubr.f32.mxu0 %v6052_v8  ;;  %v48_v47 = vld [vmem:[%s6039_s0 + $0x20] sm:$0xff]  ;;  %v993_v49 = vld [vmem:[%s6044_s5 + $0xd8] sm:$0xff]  ;;  %v3733_v50 = vpack.c.bf16 %v975_v46, %v974_v45  ;;  %v976_v52 = vld [vmem:[%s6044_s5 + $0x50] sm:$0xff]  ;;  %v618_v26 = vunpack.c.0.s8 %v617_v18 }
  0x18   :  { %v3735_v51 = vpack.c.bf16 %v993_v49, %v992_v48  ;;  %v977_v53 = vld [vmem:[%s6044_s5 + $0x58] sm:$0xff]  ;;  %v49_v54 = vld [vmem:[%s6039_s0 + $0x28] sm:$0xff]  ;;  %v994_v55 = vld [vmem:[%s6044_s5 + $0xe0] sm:$0xff] }
  0x19   :  { %3730 = vmatpush3.bf16.msra.mxu1 %v3729_v43  ;;  %v995_v56 = vld [vmem:[%s6044_s5 + $0xe8] sm:$0xff]  ;;  %v3737_v57 = vpack.c.bf16 %v977_v53, %v976_v52  ;;  %v978_v59 = vld [vmem:[%s6044_s5 + $0x60] sm:$0xff]  ;;  %v50_v61 = vld [vmem:[%s6039_s0 + $0x30] sm:$0xff]  ;;  %v4490_v34 = vsub.s32 %v618_v26, %v4475_v27 }
  0x1a   :  { %3296 = vmatmul.mubr.msk.f32.gmra.mrb[6].mxu0 %vm340_vm0, %v47_v40  ;;  %3732 = vmatprep.subr.bf16.mxu1 %v3731_v44  ;;  %v3739_v58 = vpack.c.bf16 %v995_v56, %v994_v55  ;;  %v979_v60 = vld [vmem:[%s6044_s5 + $0x68] sm:$0xff]  ;;  %v51_v63 = vld [vmem:[%s6039_s0 + $0x38] sm:$0xff]  ;;  %v52_v0 = vld [vmem:[%s6039_s0 + $0x40] sm:$0xff] }
  0x1b   :  { %477 = vmatprep.mubr.f32.mxu0 %v6052_v8  ;;  %v3741_v62 = vpack.c.bf16 %v979_v60, %v978_v59  ;;  %v53_v1 = vld [vmem:[%s6039_s0 + $0x48] sm:$0xff]  ;;  %v54_v2 = vld [vmem:[%s6039_s0 + $0x50] sm:$0xff]  ;;  %v55_v3 = vld [vmem:[%s6039_s0 + $0x58] sm:$0xff] }
  0x1c   :  { %v56_v4 = vld [vmem:[%s6039_s0 + $0x60] sm:$0xff]  ;;  %v57_v5 = vld [vmem:[%s6039_s0 + $0x68] sm:$0xff]  ;;  %v58_v6 = vld [vmem:[%s6039_s0 + $0x70] sm:$0xff] }
  0x1d   :  { %3734 = vmatpush3.bf16.msra.mxu1 %v3733_v50  ;;  %v59_v7 = vld [vmem:[%s6039_s0 + $0x78] sm:$0xff]  ;;  %v996_v9 = vld [vmem:[%s6044_s5 + $0xf0] sm:$0xff]  ;;  %v76_v15 = vld [vmem:[%s6041_s2] sm:$0x3] }
  0x1e   :  { %3297 = vmatmul.mubr.msk.f32.gmra.mrb[8].mxu0 %vm340_vm0, %v48_v47  ;;  %3736 = vmatprep.subr.bf16.mxu1 %v3735_v51  ;;  %v997_v10 = vld [vmem:[%s6044_s5 + $0xf8] sm:$0xff]  ;;  %v980_v12 = vld [vmem:[%s6044_s5 + $0x70] sm:$0xff]  ;;  %v77_v16 = vld [vmem:[%s6041_s2 + $0x2] sm:$0x3]  ;;  %v140_v22 = vunpack.c.l.bf16 %v76_v15 }
  0x1f   :  { %483 = vmatprep.mubr.f32.mxu0 %v6052_v8  ;;  %v3743_v11 = vpack.c.bf16 %v997_v10, %v996_v9  ;;  %v981_v13 = vld [vmem:[%s6044_s5 + $0x78] sm:$0xff]  ;;  %v78_v20 = vld [vmem:[%s6041_s2 + $0x4] sm:$0x3]  ;;  %v79_v21 = vld [vmem:[%s6041_s2 + $0x6] sm:$0x3]  ;;  %v141_v23 = vunpack.c.l.bf16 %v77_v16 }
  0x20   :  { %v3745_v14 = vpack.c.bf16 %v981_v13, %v980_v12  ;;  %v142_v24 = vunpack.c.l.bf16 %v78_v20  ;;  %v143_v25 = vunpack.c.l.bf16 %v79_v21  ;;  %v80_v28 = vld [vmem:[%s6041_s2 + $0x8] sm:$0x3]  ;;  %v81_v29 = vld [vmem:[%s6041_s2 + $0xa] sm:$0x3]  ;;  %v82_v30 = vld [vmem:[%s6041_s2 + $0xc] sm:$0x3] }
  0x21   :  { %3738 = vmatpush3.bf16.msra.mxu1 %v3737_v57  ;;  %v83_v31 = vld [vmem:[%s6041_s2 + $0xe] sm:$0x3]  ;;  %v614_v32 = vcombine.low %v140_v22, %v141_v23  ;;  %v144_v35 = vunpack.c.l.bf16 %v80_v28  ;;  %v145_v36 = vunpack.c.l.bf16 %v81_v29  ;;  %v146_v37 = vunpack.c.l.bf16 %v82_v30  ;;  %v84_v39 = vld [vmem:[%s6041_s2 + $0x10] sm:$0x3]  ;;  %v85_v40 = vld [vmem:[%s6041_s2 + $0x12] sm:$0x3] }
  0x22   :  { %3298 = vmatmul.mubr.msk.f32.gmra.mrb[10].mxu0 %vm340_vm0, %v49_v54  ;;  %3740 = vmatprep.subr.bf16.mxu1 %v3739_v58  ;;  %v615_v33 = vcombine.low %v142_v24, %v143_v25  ;;  %v147_v38 = vunpack.c.l.bf16 %v83_v31  ;;  %v86_v41 = vld [vmem:[%s6041_s2 + $0x14] sm:$0x3]  ;;  %v87_v42 = vld [vmem:[%s6041_s2 + $0x16] sm:$0x3]  ;;  %v148_v47 = vunpack.c.l.bf16 %v84_v39  ;;  %v149_v48 = vunpack.c.l.bf16 %v85_v40  ;;  %v88_v51 = vld [vmem:[%s6041_s2 + $0x18] sm:$0x3] }
  0x23   :  { %489 = vmatprep.mubr.f32.mxu0 %v6052_v8  ;;  %v622_v43 = vrot.slane %v614_v32, %v4490_v34  ;;  %v632_v45 = vcombine.low %v144_v35, %v145_v36  ;;  %v150_v49 = vunpack.c.l.bf16 %v86_v41  ;;  %v151_v50 = vunpack.c.l.bf16 %v87_v42  ;;  %v89_v52 = vld [vmem:[%s6041_s2 + $0x1a] sm:$0x3]  ;;  %v90_v53 = vld [vmem:[%s6041_s2 + $0x1c] sm:$0x3]  ;;  %v91_v54 = vld [vmem:[%s6041_s2 + $0x1e] sm:$0x3] }
  0x24   :  { %v629_v44 = vrot.slane %v615_v33, %v4490_v34  ;;  %v633_v46 = vcombine.low %v146_v37, %v147_v38  ;;  %v92_v55 = vld [vmem:[%s6041_s2 + $0x20] sm:$0x3]  ;;  %v93_v58 = vld [vmem:[%s6041_s2 + $0x22] sm:$0x3]  ;;  %v94_v59 = vld [vmem:[%s6041_s2 + $0x24] sm:$0x3] }
  0x25   :  { %3742 = vmatpush3.bf16.msra.mxu1 %v3741_v62  ;;  %v95_v60 = vld [vmem:[%s6041_s2 + $0x26] sm:$0x3]  ;;  %v97_v12 = vld [vmem:[%s6041_s2 + $0x2a] sm:$0x3]  ;;  %v98_v16 = vld [vmem:[%s6041_s2 + $0x2c] sm:$0x3] }
  0x26   :  { %3299 = vmatmul.mubr.msk.f32.gmra.mrb[12].mxu0 %vm340_vm0, %v50_v61  ;;  %3744 = vmatprep.subr.bf16.mxu1 %v3743_v11  ;;  %v630_v56 = vcombine.low %v622_v43, %v629_v44  ;;  %v631_v57 = vcombine.high %v622_v43, %v629_v44  ;;  %v640_v61 = vrot.slane %v632_v45, %v4490_v34  ;;  %v159_v9 = vunpack.c.l.bf16 %v95_v60  ;;  %v96_v11 = vld [vmem:[%s6041_s2 + $0x28] sm:$0x3]  ;;  %v99_v17 = vld [vmem:[%s6041_s2 + $0x2e] sm:$0x3]  ;;  %v100_v33 = vld [vmem:[%s6041_s2 + $0x30] sm:$0x3] }
  0x27   :  { %495 = vmatprep.mubr.f32.mxu0 %v6052_v8  ;;  %v647_v62 = vrot.slane %v633_v46, %v4490_v34  ;;  %v160_v28 = vunpack.c.l.bf16 %v96_v11  ;;  %v161_v29 = vunpack.c.l.bf16 %v97_v12  ;;  %v162_v30 = vunpack.c.l.bf16 %v98_v16  ;;  %v101_v39 = vld [vmem:[%s6041_s2 + $0x32] sm:$0x3]  ;;  %v102_v40 = vld [vmem:[%s6041_s2 + $0x34] sm:$0x3]  ;;  %v103_v41 = vld [vmem:[%s6041_s2 + $0x36] sm:$0x3] }
  0x28   :  { %v163_v31 = vunpack.c.l.bf16 %v99_v17 }
  0x29   :  { %3746 = vmatpush3.bf16.msra.mxu1 %v3745_v14  ;;  %v649_v14 = vcombine.high %v640_v61, %v647_v62  ;;  %v648_v23 = vcombine.low %v640_v61, %v647_v62  ;;  %v107_v61 = vld [vmem:[%s6041_s2 + $0x3e] sm:$0x3]  ;;  %v108_v62 = vld [vmem:[%s6041_s2 + $0x40] sm:$0x3] }
  0x2a   :  { %3300 = vmatmul.mubr.msk.f32.gmra.mrb[14].mxu0 %vm340_vm0, %v51_v63  ;;  %v650_v63 = vcombine.low %v148_v47, %v149_v48  ;;  %v704_v47 = vcombine.low %v160_v28, %v161_v29  ;;  %v705_v48 = vcombine.low %v162_v30, %v163_v31  ;;  %v172_v16 = vunpack.c.l.bf16 %v108_v62  ;;  %v114_v28 = vld [vmem:[%s6041_s2 + $0x4c] sm:$0x3]  ;;  %v115_v29 = vld [vmem:[%s6041_s2 + $0x4e] sm:$0x3] }
  0x2b   :  { %501 = vmatprep.mubr.f32.mxu0 %v6052_v8 }
  0x2c   :  { %v658_v15 = vrot.slane %v650_v63, %v4490_v34  ;;  %v109_v63 = vld [vmem:[%s6041_s2 + $0x42] sm:$0x3] }
  0x2e   :  { %3301 = vmatmul.mubr.msk.f32.gmra.mrb[16].mxu0 %vm340_vm0, %v52_v0  ;;  %v651_v0 = vcombine.low %v150_v49, %v151_v50  ;;  %v164_v50 = vunpack.c.l.bf16 %v100_v33 }
  0x2f   :  { %507 = vmatprep.mubr.f32.mxu0 %v6052_v8 }
  0x30   :  { %v665_v19 = vrot.slane %v651_v0, %v4490_v34 }
  0x32   :  { %3302 = vmatmul.mubr.msk.f32.gmra.mrb[18].mxu0 %vm340_vm0, %v53_v1  ;;  %v152_v1 = vunpack.c.l.bf16 %v88_v51  ;;  %v667_v36 = vcombine.high %v658_v15, %v665_v19  ;;  %v666_v43 = vcombine.low %v658_v15, %v665_v19  ;;  %v165_v51 = vunpack.c.l.bf16 %v101_v39 }
  0x33   :  { %513 = vmatprep.mubr.f32.mxu0 %v6052_v8  ;;  %v171_v15 = vunpack.c.l.bf16 %v107_v61 }
  0x36   :  { %3303 = vmatmul.mubr.msk.f32.gmra.mrb[20].mxu0 %vm340_vm0, %v54_v2  ;;  %v153_v2 = vunpack.c.l.bf16 %v89_v52  ;;  %v166_v52 = vunpack.c.l.bf16 %v102_v40 }
  0x37   :  { %519 = vmatprep.mubr.f32.mxu0 %v6052_v8 }
  0x38   :  { %v668_v20 = vcombine.low %v152_v1, %v153_v2 }
  0x3a   :  { %3304 = vmatmul.mubr.msk.f32.gmra.mrb[22].mxu0 %vm340_vm0, %v55_v3  ;;  %v154_v3 = vunpack.c.l.bf16 %v90_v53  ;;  %v676_v37 = vrot.slane %v668_v20, %v4490_v34  ;;  %v167_v53 = vunpack.c.l.bf16 %v103_v41 }
  0x3b   :  { %525 = vmatprep.mubr.f32.mxu0 %v6052_v8 }
  0x3e   :  { %3305 = vmatmul.mubr.msk.f32.gmra.mrb[24].mxu0 %vm340_vm0, %v56_v4  ;;  %v155_v4 = vunpack.c.l.bf16 %v91_v54 }
  0x3f   :  { %531 = vmatprep.mubr.f32.mxu0 %v6052_v8 }
  0x40   :  { %v669_v21 = vcombine.low %v154_v3, %v155_v4  ;;  %v712_v3 = vrot.slane %v704_v47, %v4490_v34  ;;  %v719_v4 = vrot.slane %v705_v48, %v4490_v34 }
  0x42   :  { %3306 = vmatmul.mubr.msk.f32.gmra.mrb[26].mxu0 %vm340_vm0, %v57_v5  ;;  %v156_v5 = vunpack.c.l.bf16 %v92_v55  ;;  %v683_v38 = vrot.slane %v669_v21, %v4490_v34 }
  0x43   :  { %537 = vmatprep.mubr.f32.mxu0 %v6052_v8 }
  0x44   :  { %v685_v55 = vcombine.high %v676_v37, %v683_v38  ;;  %v684_v60 = vcombine.low %v676_v37, %v683_v38 }
  0x46   :  { %3307 = vmatmul.mubr.msk.f32.gmra.mrb[28].mxu0 %vm340_vm0, %v58_v6  ;;  %v157_v6 = vunpack.c.l.bf16 %v93_v58  ;;  %v106_v58 = vld [vmem:[%s6041_s2 + $0x3c] sm:$0x3] }
  0x47   :  { %543 = vmatprep.mubr.f32.mxu0 %v6052_v8 }
  0x48   :  { %v686_v24 = vcombine.low %v156_v5, %v157_v6  ;;  %v110_v5 = vld [vmem:[%s6041_s2 + $0x44] sm:$0x3]  ;;  %v111_v6 = vld [vmem:[%s6041_s2 + $0x46] sm:$0x3] }
  0x49   :  { %v174_v19 = vunpack.c.l.bf16 %v110_v5  ;;  %v175_v20 = vunpack.c.l.bf16 %v111_v6  ;;  %v122_v5 = vld [vmem:[%s6041_s2 + $0x5c] sm:$0x3] }
  0x4a   :  { %3308 = vmatmul.mubr.msk.f32.gmra.mrb[30].mxu0 %vm340_vm0, %v59_v7  ;;  %v158_v7 = vunpack.c.l.bf16 %v94_v59  ;;  %v694_v45 = vrot.slane %v686_v24, %v4490_v34 }
  0x4b   :  { %1434 = vmatprep.mubr.f32.mxu0 %v6052_v8  ;;  %v759_v38 = vcombine.low %v174_v19, %v175_v20 }
  0x4c   :  { %v687_v25 = vcombine.low %v158_v7, %v159_v9  ;;  %v722_v9 = vcombine.low %v164_v50, %v165_v51  ;;  %v117_v50 = vld [vmem:[%s6041_s2 + $0x52] sm:$0x3]  ;;  %v118_v51 = vld [vmem:[%s6041_s2 + $0x54] sm:$0x3] }
  0x4d   :  { %v181_v62 = vunpack.c.l.bf16 %v117_v50 }
  0x4e   :  { %v701_v46 = vrot.slane %v687_v25, %v4490_v34  ;;  %v721_v25 = vcombine.high %v712_v3, %v719_v4 }
  0x50   :  { %v702_v1 = vcombine.low %v694_v45, %v701_v46  ;;  %v703_v2 = vcombine.high %v694_v45, %v701_v46  ;;  %v116_v45 = vld [vmem:[%s6041_s2 + $0x50] sm:$0x3] }
  0x51   :  { %v180_v61 = vunpack.c.l.bf16 %v116_v45 }
  0x53   :  { %v794_v20 = vcombine.low %v180_v61, %v181_v62  ;;  %v133_v61 = vld [vmem:[%s6041_s2 + $0x72] sm:$0x3]  ;;  %v134_v62 = vld [vmem:[%s6041_s2 + $0x74] sm:$0x3] }
  0xe1   :  { %v455_v10 = vpop.f32.mrb[0].mxu0 }
  0xe2   :  { %v457_v13 = vpop.f32.mrb[1].mxu0  ;;  %v934_v22 = vmul.f32 %v630_v56, %v455_v10  ;;  %v104_v56 = vld [vmem:[%s6041_s2 + $0x38] sm:$0x3]  ;;  %v723_v10 = vcombine.low %v166_v52, %v167_v53  ;;  %v119_v52 = vld [vmem:[%s6041_s2 + $0x56] sm:$0x3] }
  0xe3   :  { %v935_v18 = vmul.f32 %v631_v57, %v457_v13  ;;  %v105_v57 = vld [vmem:[%s6041_s2 + $0x3a] sm:$0x3]  ;;  %v168_v11 = vunpack.c.l.bf16 %v104_v56 }
  0xe4   :  { %v169_v12 = vunpack.c.l.bf16 %v105_v57  ;;  %v737_v31 = vrot.slane %v723_v10, %v4490_v34  ;;  %v773_v57 = vrot.slane %v759_v38, %v4490_v34  ;;  %v124_v10 = vld [vmem:[%s6041_s2 + $0x60] sm:$0x3] }
  0xe5   :  { %v461_v26 = vpop.f32.mrb[2].mxu0  ;;  %1062 = vmatprep.mubr.f32.mxu1 %v935_v18  ;;  %v173_v18 = vunpack.c.l.bf16 %v109_v63  ;;  %v182_v63 = vunpack.c.l.bf16 %v118_v51 }
  0xe6   :  { %v463_v32 = vpop.f32.mrb[3].mxu0  ;;  %1063 = vmatmul.mubr.f32.vlgmr.msra.gmra.mrb[0].mxu1 %v934_v22  ;;  %v936_v42 = vmul.f32 %v648_v23, %v461_v26  ;;  %v112_v22 = vld [vmem:[%s6041_s2 + $0x48] sm:$0x3]  ;;  %v113_v23 = vld [vmem:[%s6041_s2 + $0x4a] sm:$0x3]  ;;  %v730_v26 = vrot.slane %v722_v9, %v4490_v34 }
  0xe7   :  { %v937_v35 = vmul.f32 %v649_v14, %v463_v32  ;;  %v170_v14 = vunpack.c.l.bf16 %v106_v58  ;;  %v740_v32 = vcombine.low %v168_v11, %v169_v12  ;;  %v758_v37 = vcombine.low %v172_v16, %v173_v18  ;;  %v123_v9 = vld [vmem:[%s6041_s2 + $0x5e] sm:$0x3]  ;;  %v125_v11 = vld [vmem:[%s6041_s2 + $0x62] sm:$0x3]  ;;  %v127_v18 = vld [vmem:[%s6041_s2 + $0x66] sm:$0x3] }
  0xe8   :  { %v176_v40 = vunpack.c.l.bf16 %v112_v22  ;;  %v177_v41 = vunpack.c.l.bf16 %v113_v23  ;;  %v739_v47 = vcombine.high %v730_v26, %v737_v31 }
  0xe9   :  { %v467_v44 = vpop.f32.mrb[4].mxu0  ;;  %1067 = vmatprep.mubr.f32.mxu1 %v937_v35  ;;  %v741_v33 = vcombine.low %v170_v14, %v171_v15  ;;  %v748_v48 = vrot.slane %v740_v32, %v4490_v34  ;;  %v766_v56 = vrot.slane %v758_v37, %v4490_v34  ;;  %v191_v32 = vunpack.c.l.bf16 %v127_v18  ;;  %v137_v18 = vld [vmem:[%s6041_s2 + $0x7a] sm:$0x3] }
  0xea   :  { %v469_v49 = vpop.f32.mrb[5].mxu0  ;;  %1068 = vmatmul.mubr.f32.gmra.mrb[2].mxu1 %v936_v42  ;;  %v938_v59 = vmul.f32 %v666_v43, %v467_v44  ;;  %v178_v42 = vunpack.c.l.bf16 %v114_v28  ;;  %v179_v43 = vunpack.c.l.bf16 %v115_v29  ;;  %v776_v58 = vcombine.low %v176_v40, %v177_v41  ;;  %v130_v40 = vld [vmem:[%s6041_s2 + $0x6c] sm:$0x3]  ;;  %v131_v41 = vld [vmem:[%s6041_s2 + $0x6e] sm:$0x3] }
  0xeb   :  { %v939_v54 = vmul.f32 %v667_v36, %v469_v49  ;;  %v720_v36 = vcombine.low %v712_v3, %v719_v4  ;;  %v755_v49 = vrot.slane %v741_v33, %v4490_v34  ;;  %v120_v3 = vld [vmem:[%s6041_s2 + $0x58] sm:$0x3]  ;;  %v121_v4 = vld [vmem:[%s6041_s2 + $0x5a] sm:$0x3]  ;;  %v775_v14 = vcombine.high %v766_v56, %v773_v57 }
  0xec   :  { %v784_v15 = vrot.slane %v776_v58, %v4490_v34  ;;  %v184_v22 = vunpack.c.l.bf16 %v120_v3  ;;  %v185_v23 = vunpack.c.l.bf16 %v121_v4  ;;  %v188_v28 = vunpack.c.l.bf16 %v124_v10 }
  0xed   :  { %v473_v0 = vpop.f32.mrb[6].mxu0  ;;  %1072 = vmatprep.mubr.f32.mxu1 %v939_v54  ;;  %v738_v54 = vcombine.low %v730_v26, %v737_v31  ;;  %v187_v26 = vunpack.c.l.bf16 %v123_v9  ;;  %v197_v10 = vunpack.c.l.bf16 %v133_v61 }
  0xee   :  { %v475_v7 = vpop.f32.mrb[7].mxu0  ;;  %1073 = vmatmul.mubr.f32.gmra.mrb[4].mxu1 %v938_v59  ;;  %v940_v17 = vmul.f32 %v684_v60, %v473_v0  ;;  %v777_v59 = vcombine.low %v178_v42, %v179_v43  ;;  %v183_v0 = vunpack.c.l.bf16 %v119_v52 }
  0xef   :  { %v941_v13 = vmul.f32 %v685_v55, %v475_v7  ;;  %v756_v7 = vcombine.low %v748_v48, %v755_v49 }
  0xf0   :  { %v791_v16 = vrot.slane %v777_v59, %v4490_v34 }
  0xf1   :  { %v479_v21 = vpop.f32.mrb[8].mxu0  ;;  %1077 = vmatprep.mubr.f32.mxu1 %v941_v13  ;;  %v774_v13 = vcombine.low %v766_v56, %v773_v57  ;;  %v132_v56 = vld [vmem:[%s6041_s2 + $0x70] sm:$0x3] }
  0xf2   :  { %v481_v24 = vpop.f32.mrb[9].mxu0  ;;  %1078 = vmatmul.mubr.f32.gmra.mrb[6].mxu1 %v940_v17  ;;  %v942_v35 = vmul.f32 %v702_v1, %v479_v21  ;;  %v126_v17 = vld [vmem:[%s6041_s2 + $0x64] sm:$0x3]  ;;  %v795_v21 = vcombine.low %v182_v63, %v183_v0  ;;  %v793_v38 = vcombine.high %v784_v15, %v791_v16  ;;  %v135_v63 = vld [vmem:[%s6041_s2 + $0x76] sm:$0x3]  ;;  %v196_v9 = vunpack.c.l.bf16 %v132_v56 }
  0xf3   :  { %v943_v30 = vmul.f32 %v703_v2, %v481_v24  ;;  %v757_v2 = vcombine.high %v748_v48, %v755_v49  ;;  %v190_v31 = vunpack.c.l.bf16 %v126_v17 }
  0xf4   :  { %v809_v43 = vrot.slane %v795_v21, %v4490_v34 }
  0xf5   :  { %v485_v39 = vpop.f32.mrb[10].mxu0  ;;  %1082 = vmatprep.mubr.f32.mxu1 %v943_v30  ;;  %v189_v30 = vunpack.c.l.bf16 %v125_v11  ;;  %v831_v49 = vcombine.low %v190_v31, %v191_v32  ;;  %v198_v11 = vunpack.c.l.bf16 %v134_v62  ;;  %v201_v31 = vunpack.c.l.bf16 %v137_v18 }
  0xf6   :  { %v487_v44 = vpop.f32.mrb[11].mxu0  ;;  %1083 = vmatmul.mubr.f32.gmra.mrb[8].mxu1 %v942_v35  ;;  %v944_v53 = vmul.f32 %v720_v36, %v485_v39  ;;  %v128_v35 = vld [vmem:[%s6041_s2 + $0x68] sm:$0x3]  ;;  %v129_v36 = vld [vmem:[%s6041_s2 + $0x6a] sm:$0x3]  ;;  %v802_v39 = vrot.slane %v794_v20, %v4490_v34 }
  0xf7   :  { %v945_v46 = vmul.f32 %v721_v25, %v487_v44  ;;  %v186_v25 = vunpack.c.l.bf16 %v122_v5  ;;  %v812_v44 = vcombine.low %v184_v22, %v185_v23  ;;  %v830_v48 = vcombine.low %v188_v28, %v189_v30  ;;  %v139_v20 = vld [vmem:[%s6041_s2 + $0x7e] sm:$0x3] }
  0xf8   :  { %v192_v51 = vunpack.c.l.bf16 %v128_v35  ;;  %v193_v52 = vunpack.c.l.bf16 %v129_v36  ;;  %v811_v58 = vcombine.high %v802_v39, %v809_v43  ;;  %v845_v4 = vrot.slane %v831_v49, %v4490_v34 }
  0xf9   :  { %v491_v55 = vpop.f32.mrb[12].mxu0  ;;  %1087 = vmatprep.mubr.f32.mxu1 %v945_v46  ;;  %v813_v45 = vcombine.low %v186_v25, %v187_v26  ;;  %v820_v59 = vrot.slane %v812_v44, %v4490_v34  ;;  %v838_v3 = vrot.slane %v830_v48, %v4490_v34  ;;  %v866_v26 = vcombine.low %v196_v9, %v197_v10 }
  0xfa   :  { %v493_v60 = vpop.f32.mrb[13].mxu0  ;;  %1088 = vmatmul.mubr.f32.gmra.mrb[10].mxu1 %v944_v53  ;;  %v946_v6 = vmul.f32 %v738_v54, %v491_v55  ;;  %v194_v53 = vunpack.c.l.bf16 %v130_v40  ;;  %v195_v54 = vunpack.c.l.bf16 %v131_v41  ;;  %v848_v5 = vcombine.low %v192_v51, %v193_v52 }
  0xfb   :  { %v947_v1 = vmul.f32 %v739_v47, %v493_v60  ;;  %v792_v47 = vcombine.low %v784_v15, %v791_v16  ;;  %v827_v60 = vrot.slane %v813_v45, %v4490_v34  ;;  %v136_v15 = vld [vmem:[%s6041_s2 + $0x78] sm:$0x3]  ;;  %v847_v22 = vcombine.high %v838_v3, %v845_v4 }
  0xfc   :  { %v856_v23 = vrot.slane %v848_v5, %v4490_v34  ;;  %v846_v36 = vcombine.low %v838_v3, %v845_v4  ;;  %v874_v40 = vrot.slane %v866_v26, %v4490_v34 }
  0xfd   :  { %v497_v12 = vpop.f32.mrb[14].mxu0  ;;  %1092 = vmatprep.mubr.f32.mxu1 %v947_v1  ;;  %v810_v1 = vcombine.low %v802_v39, %v809_v43  ;;  %v828_v17 = vcombine.low %v820_v59, %v827_v60 }
  0xfe   :  { %v499_v19 = vpop.f32.mrb[15].mxu0  ;;  %1093 = vmatmul.mubr.f32.gmra.mrb[12].mxu1 %v946_v6  ;;  %v948_v29 = vmul.f32 %v756_v7, %v497_v12  ;;  %v849_v6 = vcombine.low %v194_v53, %v195_v54  ;;  %v199_v12 = vunpack.c.l.bf16 %v135_v63 }
  0xff   :  { %v949_v24 = vmul.f32 %v757_v2, %v499_v19  ;;  %v138_v19 = vld [vmem:[%s6041_s2 + $0x7c] sm:$0x3] }
 0x100   :  { %v863_v25 = vrot.slane %v849_v6, %v4490_v34  ;;  %v867_v28 = vcombine.low %v198_v11, %v199_v12  ;;  %v202_v32 = vunpack.c.l.bf16 %v138_v19 }
 0x101   :  { %v503_v33 = vpop.f32.mrb[16].mxu0  ;;  %1097 = vmatprep.mubr.f32.mxu1 %v949_v24 }
 0x102   :  { %v505_v37 = vpop.f32.mrb[17].mxu0  ;;  %1098 = vmatmul.mubr.f32.gmra.mrb[14].mxu1 %v948_v29  ;;  %v950_v46 = vmul.f32 %v774_v13, %v503_v33  ;;  %v200_v29 = vunpack.c.l.bf16 %v136_v15  ;;  %v203_v33 = vunpack.c.l.bf16 %v139_v20  ;;  %v865_v39 = vcombine.high %v856_v23, %v863_v25 }
 0x103   :  { %v951_v42 = vmul.f32 %v775_v14, %v505_v37  ;;  %v829_v14 = vcombine.high %v820_v59, %v827_v60 }
 0x104   :  { %v884_v43 = vcombine.low %v200_v29, %v201_v31  ;;  %v885_v44 = vcombine.low %v202_v32, %v203_v33 }
 0x105   :  { %v509_v50 = vpop.f32.mrb[18].mxu0  ;;  %1102 = vmatprep.mubr.f32.mxu1 %v951_v42  ;;  %v881_v42 = vrot.slane %v867_v28, %v4490_v34 }
 0x106   :  { %v511_v55 = vpop.f32.mrb[19].mxu0  ;;  %1103 = vmatmul.mubr.f32.gmra.mrb[16].mxu1 %v950_v46  ;;  %v952_v0 = vmul.f32 %v792_v47, %v509_v50  ;;  %v864_v46 = vcombine.low %v856_v23, %v863_v25  ;;  %v892_v51 = vrot.slane %v884_v43, %v4490_v34  ;;  %v899_v52 = vrot.slane %v885_v44, %v4490_v34 }
 0x107   :  { %v953_v57 = vmul.f32 %v793_v38, %v511_v55  ;;  %v883_v50 = vcombine.high %v874_v40, %v881_v42  ;;  %v882_v54 = vcombine.low %v874_v40, %v881_v42 }
 0x108   :  { %v900_v60 = vcombine.low %v892_v51, %v899_v52 }
 0x109   :  { %v515_v2 = vpop.f32.mrb[20].mxu0  ;;  %1107 = vmatprep.mubr.f32.mxu1 %v953_v57 }
 0x10a   :  { %v517_v7 = vpop.f32.mrb[21].mxu0  ;;  %1108 = vmatmul.mubr.f32.gmra.mrb[18].mxu1 %v952_v0  ;;  %v954_v16 = vmul.f32 %v810_v1, %v515_v2 }
 0x10b   :  { %v955_v13 = vmul.f32 %v811_v58, %v517_v7  ;;  %v901_v58 = vcombine.high %v892_v51, %v899_v52 }
 0x10d   :  { %v521_v21 = vpop.f32.mrb[22].mxu0  ;;  %1112 = vmatprep.mubr.f32.mxu1 %v955_v13 }
 0x10e   :  { %v523_v24 = vpop.f32.mrb[23].mxu0  ;;  %1113 = vmatmul.mubr.f32.gmra.mrb[20].mxu1 %v954_v16  ;;  %v956_v35 = vmul.f32 %v828_v17, %v521_v21 }
 0x10f   :  { %v957_v30 = vmul.f32 %v829_v14, %v523_v24 }
 0x111   :  { %v527_v37 = vpop.f32.mrb[24].mxu0  ;;  %1117 = vmatprep.mubr.f32.mxu1 %v957_v30 }
 0x112   :  { %v529_v38 = vpop.f32.mrb[25].mxu0  ;;  %1118 = vmatmul.mubr.f32.gmra.mrb[22].mxu1 %v956_v35  ;;  %v958_v45 = vmul.f32 %v846_v36, %v527_v37 }
 0x113   :  { %v959_v41 = vmul.f32 %v847_v22, %v529_v38 }
 0x115   :  { %v533_v47 = vpop.f32.mrb[26].mxu0  ;;  %1122 = vmatprep.mubr.f32.mxu1 %v959_v41 }
 0x116   :  { %v535_v48 = vpop.f32.mrb[27].mxu0  ;;  %1123 = vmatmul.mubr.f32.gmra.mrb[24].mxu1 %v958_v45  ;;  %v960_v53 = vmul.f32 %v864_v46, %v533_v47 }
 0x117   :  { %v961_v49 = vmul.f32 %v865_v39, %v535_v48 }
 0x119   :  { %v539_v55 = vpop.f32.mrb[28].mxu0  ;;  %1127 = vmatprep.mubr.f32.mxu1 %v961_v49 }
 0x11a   :  { %v541_v56 = vpop.f32.mrb[29].mxu0  ;;  %1128 = vmatmul.mubr.f32.gmra.mrb[26].mxu1 %v960_v53  ;;  %v962_v59 = vmul.f32 %v882_v54, %v539_v55 }
 0x11b   :  { %v963_v57 = vmul.f32 %v883_v50, %v541_v56 }
 0x11d   :  { %v545_v61 = vpop.f32.mrb[30].mxu0  ;;  %1132 = vmatprep.mubr.f32.mxu1 %v963_v57 }
 0x11e   :  { %v547_v62 = vpop.f32.mrb[31].mxu0  ;;  %1133 = vmatmul.mubr.f32.gmra.mrb[28].mxu1 %v962_v59  ;;  %v964_v0 = vmul.f32 %v900_v60, %v545_v61 }
 0x11f   :  { %v965_v63 = vmul.f32 %v901_v58, %v547_v62 }
 0x121   :  { %1137 = vmatprep.mubr.f32.mxu1 %v965_v63 }
 0x122   :  { %1138 = vmatmul.mubr.f32.gmra.mrb[30].mxu1 %v964_v0 }
 0x1b9   :  { %v3359_v1 = vpop.f32.mrb[0].mxu1 }
 0x1ba   :  { %v3360_v2 = vpop.f32.mrb[1].mxu1 }
 0x1bb   :  { %v4692_v3 = vadd.f32 %v3360_v2, %v3359_v1 }
 0x1bd   :  { %v3362_v4 = vpop.f32.mrb[2].mxu1  ;;  %v1144_v5 = vsel %vm1143_vm1, %v4692_v3, -inf }
 0x1be   :  { %1145 = vmax.xlane.f32.xlu0 %v1144_v5  ;;  %v3363_v6 = vpop.f32.mrb[3].mxu1  ;;  %v1321_v5 = vld [vmem:[%s6045_s6 + $0x8] sm:$0xff] }
 0x1bf   :  { %v4696_v7 = vadd.f32 %v3363_v6, %v3362_v4  ;;  %v1320_v6 = vld [vmem:[%s6045_s6] sm:$0xff]  ;;  %1370 = vmatprep.subr.mxu0 %v1321_v5  ;;  %s4189_s6 = smov 32  }
 0x1c0   :  { %1371 = vmatpush1.msra.mxu0 %v1320_v6 }
 0x1c1   :  { %v3365_v9 = vpop.f32.mrb[4].mxu1  ;;  %v1147_v10 = vsel %vm1143_vm1, %v4696_v7, -inf }
 0x1c2   :  { %1148 = vmax.xlane.f32.xlu0 %v1147_v10  ;;  %v3366_v11 = vpop.f32.mrb[5].mxu1 }
 0x1c3   :  { %v4700_v12 = vadd.f32 %v3366_v11, %v3365_v9 }
 0x1c5   :  { %v3368_v13 = vpop.f32.mrb[6].mxu1  ;;  %v1150_v14 = vsel %vm1143_vm1, %v4700_v12, -inf }
 0x1c6   :  { %1151 = vmax.xlane.f32.xlu1 %v1150_v14  ;;  %v3369_v15 = vpop.f32.mrb[7].mxu1 }
 0x1c7   :  { %v4704_v16 = vadd.f32 %v3369_v15, %v3368_v13 }
 0x1c9   :  { %v3371_v17 = vpop.f32.mrb[8].mxu1  ;;  %v1153_v18 = vsel %vm1143_vm1, %v4704_v16, -inf }
 0x1ca   :  { %1154 = vmax.xlane.f32.xlu1 %v1153_v18  ;;  %v3372_v19 = vpop.f32.mrb[9].mxu1 }
 0x1cb   :  { %v4708_v20 = vadd.f32 %v3372_v19, %v3371_v17 }
 0x1cd   :  { %v3374_v21 = vpop.f32.mrb[10].mxu1  ;;  %v1156_v22 = vsel %vm1143_vm1, %v4708_v20, -inf }
 0x1ce   :  { %1157 = vmax.xlane.f32.xlu0 %v1156_v22  ;;  %v3375_v23 = vpop.f32.mrb[11].mxu1 }
 0x1cf   :  { %v4712_v24 = vadd.f32 %v3375_v23, %v3374_v21 }
 0x1d1   :  { %v3377_v25 = vpop.f32.mrb[12].mxu1  ;;  %v1159_v26 = vsel %vm1143_vm1, %v4712_v24, -inf }
 0x1d2   :  { %1160 = vmax.xlane.f32.xlu1 %v1159_v26  ;;  %v3378_v28 = vpop.f32.mrb[13].mxu1 }
 0x1d3   :  { %v4716_v29 = vadd.f32 %v3378_v28, %v3377_v25 }
 0x1d5   :  { %v3380_v30 = vpop.f32.mrb[14].mxu1  ;;  %v1162_v31 = vsel %vm1143_vm1, %v4716_v29, -inf }
 0x1d6   :  { %1163 = vmax.xlane.f32.xlu0 %v1162_v31  ;;  %v3381_v32 = vpop.f32.mrb[15].mxu1 }
 0x1d7   :  { %v4720_v33 = vadd.f32 %v3381_v32, %v3380_v30 }
 0x1d9   :  { %v3383_v35 = vpop.f32.mrb[16].mxu1  ;;  %v1165_v36 = vsel %vm1143_vm1, %v4720_v33, -inf }
 0x1da   :  { %1166 = vmax.xlane.f32.xlu1 %v1165_v36  ;;  %v3384_v37 = vpop.f32.mrb[17].mxu1 }
 0x1db   :  { %v4724_v38 = vadd.f32 %v3384_v37, %v3383_v35 }
 0x1dd   :  { %v3386_v39 = vpop.f32.mrb[18].mxu1  ;;  %v1168_v40 = vsel %vm1143_vm1, %v4724_v38, -inf }
 0x1de   :  { %1169 = vmax.xlane.f32.xlu0 %v1168_v40  ;;  %v3387_v41 = vpop.f32.mrb[19].mxu1 }
 0x1df   :  { %v4728_v42 = vadd.f32 %v3387_v41, %v3386_v39 }
 0x1e1   :  { %v3389_v43 = vpop.f32.mrb[20].mxu1  ;;  %v1171_v44 = vsel %vm1143_vm1, %v4728_v42, -inf }
 0x1e2   :  { %1172 = vmax.xlane.f32.xlu1 %v1171_v44  ;;  %v3390_v45 = vpop.f32.mrb[21].mxu1 }
 0x1e3   :  { %v4732_v46 = vadd.f32 %v3390_v45, %v3389_v43 }
 0x1e5   :  { %v3392_v47 = vpop.f32.mrb[22].mxu1  ;;  %v1174_v48 = vsel %vm1143_vm1, %v4732_v46, -inf }
 0x1e6   :  { %1175 = vmax.xlane.f32.xlu0 %v1174_v48  ;;  %v3393_v49 = vpop.f32.mrb[23].mxu1 }
 0x1e7   :  { %v4736_v50 = vadd.f32 %v3393_v49, %v3392_v47 }
 0x1e9   :  { %v3395_v51 = vpop.f32.mrb[24].mxu1  ;;  %v1177_v52 = vsel %vm1143_vm1, %v4736_v50, -inf }
 0x1ea   :  { %1178 = vmax.xlane.f32.xlu1 %v1177_v52  ;;  %v3396_v53 = vpop.f32.mrb[25].mxu1 }
 0x1eb   :  { %v4740_v54 = vadd.f32 %v3396_v53, %v3395_v51 }
 0x1ed   :  { %v3398_v55 = vpop.f32.mrb[26].mxu1  ;;  %v1180_v56 = vsel %vm1143_vm1, %v4740_v54, -inf }
 0x1ee   :  { %1181 = vmax.xlane.f32.xlu0 %v1180_v56  ;;  %v3399_v57 = vpop.f32.mrb[27].mxu1 }
 0x1ef   :  { %v4744_v58 = vadd.f32 %v3399_v57, %v3398_v55 }
 0x1f1   :  { %v3401_v59 = vpop.f32.mrb[28].mxu1  ;;  %v1183_v60 = vsel %vm1143_vm1, %v4744_v58, -inf }
 0x1f2   :  { %1184 = vmax.xlane.f32.xlu1 %v1183_v60  ;;  %v3402_v61 = vpop.f32.mrb[29].mxu1 }
 0x1f3   :  { %v4748_v62 = vadd.f32 %v3402_v61, %v3401_v59 }
 0x1f5   :  { %v3404_v63 = vpop.f32.mrb[30].mxu1  ;;  %v1186_v0 = vsel %vm1143_vm1, %v4748_v62, -inf }
 0x1f6   :  { %1187 = vmax.xlane.f32.xlu0 %v1186_v0  ;;  %v3405_v1 = vpop.f32.mrb[31].mxu1 }
 0x1f7   :  { %v4752_v2 = vadd.f32 %v3405_v1, %v3404_v63 }
 0x1f9   :  { %v1189_v4 = vsel %vm1143_vm1, %v4752_v2, -inf }
 0x1fa   :  { %1190 = vmax.xlane.f32.xlu1 %v1189_v4 }
 0x24b   :  { %v1146_v9 = vpop.xlane.xlu0 %1145 }
 0x24c   :  { %v1192_v10 = vsub.f32 %v4692_v3, %v1146_v9 }
 0x24e   :  { %v1208_v11 = vmul.f32 1.442695, %v1192_v10 }
 0x24f   :  { %v1149_v13 = vpop.xlane.xlu0 %1148 }
 0x250   :  { %4077 = vpow2.f32 %v1208_v11  ;;  %v1193_v14 = vsub.f32 %v4696_v7, %v1149_v13 }
 0x252   :  { %v1210_v15 = vmul.f32 1.442695, %v1193_v14 }
 0x253   :  { %v1152_v17 = vpop.xlane.xlu1 %1151 }
 0x254   :  { %4079 = vpow2.f32 %v1210_v15  ;;  %v1194_v18 = vsub.f32 %v4700_v12, %v1152_v17 }
 0x256   :  { %v1212_v19 = vmul.f32 1.442695, %v1194_v18 }
 0x257   :  { %v1155_v21 = vpop.xlane.xlu1 %1154 }
 0x258   :  { %4081 = vpow2.f32 %v1212_v19  ;;  %v1195_v22 = vsub.f32 %v4704_v16, %v1155_v21 }
 0x25a   :  { %v4766_v23 = vpop.eup %4077  ;;  %v1214_v25 = vmul.f32 1.442695, %v1195_v22 }
 0x25b   :  { %v1158_v26 = vpop.xlane.xlu0 %1157  ;;  %v1240_v3 = vsel %vm1143_vm1, %v4766_v23, 0.0 }
 0x25c   :  { %4083 = vpow2.f32 %v1214_v25  ;;  %v1196_v7 = vsub.f32 %v4708_v20, %v1158_v26  ;;  %1241 = vadd.xlane.f32.xlu0 %v1240_v3 }
 0x25e   :  { %v4771_v28 = vpop.eup %4079  ;;  %v1216_v30 = vmul.f32 1.442695, %v1196_v7 }
 0x25f   :  { %v1161_v12 = vpop.xlane.xlu1 %1160  ;;  %v1243_v31 = vsel %vm1143_vm1, %v4771_v28, 0.0 }
 0x260   :  { %4085 = vpow2.f32 %v1216_v30  ;;  %v1197_v16 = vsub.f32 %v4712_v24, %v1161_v12  ;;  %1244 = vadd.xlane.f32.xlu1 %v1243_v31 }
 0x262   :  { %v4776_v32 = vpop.eup %4081  ;;  %v1218_v35 = vmul.f32 1.442695, %v1197_v16 }
 0x263   :  { %v1164_v36 = vpop.xlane.xlu0 %1163  ;;  %v1246_v37 = vsel %vm1143_vm1, %v4776_v32, 0.0 }
 0x264   :  { %4087 = vpow2.f32 %v1218_v35  ;;  %v1198_v20 = vsub.f32 %v4716_v29, %v1164_v36  ;;  %1247 = vadd.xlane.f32.xlu0 %v1246_v37  ;;  %v1963_v35 = vld [vmem:[%s6046_s7 + $0x80] sm:$0xff]  ;;  %v1964_v36 = vld [vmem:[%s6046_s7 + $0x88] sm:$0xff] }
 0x265   :  { %v1947_v37 = vld [vmem:[%s6046_s7] sm:$0xff] }
 0x266   :  { %v4781_v39 = vpop.eup %4083  ;;  %v1220_v40 = vmul.f32 1.442695, %v1198_v20  ;;  %v3747_v20 = vpack.c.bf16 %v1964_v36, %v1963_v35  ;;  %v1961_v35 = vld [vmem:[%s6046_s7 + $0x70] sm:$0xff]  ;;  %v1962_v36 = vld [vmem:[%s6046_s7 + $0x78] sm:$0xff] }
 0x267   :  { %v1167_v41 = vpop.xlane.xlu1 %1166  ;;  %v1249_v43 = vsel %vm1143_vm1, %v4781_v39, 0.0 }
 0x268   :  { %4089 = vpow2.f32 %v1220_v40  ;;  %v1199_v24 = vsub.f32 %v4720_v33, %v1167_v41  ;;  %1250 = vadd.xlane.f32.xlu1 %v1249_v43  ;;  %v1948_v40 = vld [vmem:[%s6046_s7 + $0x8] sm:$0xff]  ;;  %v1965_v41 = vld [vmem:[%s6046_s7 + $0x90] sm:$0xff]  ;;  %v1966_v43 = vld [vmem:[%s6046_s7 + $0x98] sm:$0xff]  ;;  %3748 = vmatprep.subr.bf16.mxu1 %v3747_v20 }
 0x269   :  { %3780 = vmatprep.subr.bf16.mxu0 %v3747_v20 }
 0x26a   :  { %v4786_v44 = vpop.eup %4085  ;;  %v1222_v45 = vmul.f32 1.442695, %v1199_v24  ;;  %v4860_v24 = vpack.c.bf16 %v1948_v40, %v1947_v37  ;;  %v4979_v37 = vpack.c.bf16 %v1962_v36, %v1961_v35 }
 0x26b   :  { %v1170_v47 = vpop.xlane.xlu0 %1169  ;;  %v1252_v48 = vsel %vm1143_vm1, %v4786_v44, 0.0 }
 0x26c   :  { %4091 = vpow2.f32 %v1222_v45  ;;  %v1200_v29 = vsub.f32 %v4724_v38, %v1170_v47  ;;  %1253 = vadd.xlane.f32.xlu0 %v1252_v48  ;;  %v4862_v45 = vpack.c.bf16 %v1966_v43, %v1965_v41  ;;  %v1949_v47 = vld [vmem:[%s6046_s7 + $0x10] sm:$0xff]  ;;  %v1950_v48 = vld [vmem:[%s6046_s7 + $0x18] sm:$0xff]  ;;  %3750 = vmatpush3.bf16.msra.mxu1 %v4860_v24 }
 0x26e   :  { %v4791_v49 = vpop.eup %4087  ;;  %v1224_v51 = vmul.f32 1.442695, %v1200_v29  ;;  %v1967_v29 = vld [vmem:[%s6046_s7 + $0xa0] sm:$0xff]  ;;  %3752 = vmatprep.subr.bf16.mxu1 %v4862_v45 }
 0x26f   :  { %v1173_v52 = vpop.xlane.xlu1 %1172  ;;  %v1255_v53 = vsel %vm1143_vm1, %v4791_v49, 0.0 }
 0x270   :  { %4093 = vpow2.f32 %v1224_v51  ;;  %v1201_v33 = vsub.f32 %v4728_v42, %v1173_v52  ;;  %1256 = vadd.xlane.f32.xlu1 %v1255_v53  ;;  %v1968_v51 = vld [vmem:[%s6046_s7 + $0xa8] sm:$0xff]  ;;  %v4877_v52 = vpack.c.bf16 %v1950_v48, %v1949_v47 }
 0x271   :  { %v4880_v53 = vpack.c.bf16 %v1968_v51, %v1967_v29 }
 0x272   :  { %v4796_v55 = vpop.eup %4089  ;;  %v1226_v56 = vmul.f32 1.442695, %v1201_v33  ;;  %v1951_v33 = vld [vmem:[%s6046_s7 + $0x20] sm:$0xff]  ;;  %3754 = vmatpush3.bf16.msra.mxu1 %v4877_v52 }
 0x273   :  { %v1176_v57 = vpop.xlane.xlu0 %1175  ;;  %v1258_v59 = vsel %vm1143_vm1, %v4796_v55, 0.0  ;;  %3756 = vmatprep.subr.bf16.mxu1 %v4880_v53 }
 0x274   :  { %4095 = vpow2.f32 %v1226_v56  ;;  %v1202_v38 = vsub.f32 %v4732_v46, %v1176_v57  ;;  %1259 = vadd.xlane.f32.xlu0 %v1258_v59  ;;  %v1952_v56 = vld [vmem:[%s6046_s7 + $0x28] sm:$0xff]  ;;  %v1969_v57 = vld [vmem:[%s6046_s7 + $0xb0] sm:$0xff]  ;;  %v1970_v59 = vld [vmem:[%s6046_s7 + $0xb8] sm:$0xff] }
 0x276   :  { %v4801_v60 = vpop.eup %4091  ;;  %v1228_v61 = vmul.f32 1.442695, %v1202_v38  ;;  %v4895_v38 = vpack.c.bf16 %v1952_v56, %v1951_v33 }
 0x277   :  { %v1179_v63 = vpop.xlane.xlu1 %1178  ;;  %v1261_v0 = vsel %vm1143_vm1, %v4801_v60, 0.0 }
 0x278   :  { %4097 = vpow2.f32 %v1228_v61  ;;  %v1203_v42 = vsub.f32 %v4736_v50, %v1179_v63  ;;  %1262 = vadd.xlane.f32.xlu1 %v1261_v0  ;;  %v4898_v61 = vpack.c.bf16 %v1970_v59, %v1969_v57  ;;  %v1953_v63 = vld [vmem:[%s6046_s7 + $0x30] sm:$0xff]  ;;  %v1954_v0 = vld [vmem:[%s6046_s7 + $0x38] sm:$0xff]  ;;  %3758 = vmatpush3.bf16.msra.mxu1 %v4895_v38 }
 0x27a   :  { %v4806_v1 = vpop.eup %4093  ;;  %v1230_v4 = vmul.f32 1.442695, %v1203_v42  ;;  %v1971_v42 = vld [vmem:[%s6046_s7 + $0xc0] sm:$0xff]  ;;  %3760 = vmatprep.subr.bf16.mxu1 %v4898_v61 }
 0x27b   :  { %v1182_v5 = vpop.xlane.xlu0 %1181  ;;  %v1264_v6 = vsel %vm1143_vm1, %v4806_v1, 0.0 }
 0x27c   :  { %4099 = vpow2.f32 %v1230_v4  ;;  %v1204_v46 = vsub.f32 %v4740_v54, %v1182_v5  ;;  %1265 = vadd.xlane.f32.xlu0 %v1264_v6  ;;  %v1972_v4 = vld [vmem:[%s6046_s7 + $0xc8] sm:$0xff]  ;;  %v4913_v5 = vpack.c.bf16 %v1954_v0, %v1953_v63 }
 0x27d   :  { %v4916_v6 = vpack.c.bf16 %v1972_v4, %v1971_v42 }
 0x27e   :  { %v4811_v9 = vpop.eup %4095  ;;  %v1232_v10 = vmul.f32 1.442695, %v1204_v46  ;;  %v1955_v46 = vld [vmem:[%s6046_s7 + $0x40] sm:$0xff]  ;;  %3762 = vmatpush3.bf16.msra.mxu1 %v4913_v5 }
 0x27f   :  { %v1185_v11 = vpop.xlane.xlu1 %1184  ;;  %v1267_v13 = vsel %vm1143_vm1, %v4811_v9, 0.0  ;;  %3764 = vmatprep.subr.bf16.mxu1 %v4916_v6 }
 0x280   :  { %4101 = vpow2.f32 %v1232_v10  ;;  %v1205_v50 = vsub.f32 %v4744_v58, %v1185_v11  ;;  %1268 = vadd.xlane.f32.xlu1 %v1267_v13  ;;  %v1956_v10 = vld [vmem:[%s6046_s7 + $0x48] sm:$0xff]  ;;  %v1973_v11 = vld [vmem:[%s6046_s7 + $0xd0] sm:$0xff]  ;;  %v1974_v13 = vld [vmem:[%s6046_s7 + $0xd8] sm:$0xff] }
 0x282   :  { %v4816_v14 = vpop.eup %4097  ;;  %v1234_v15 = vmul.f32 1.442695, %v1205_v50  ;;  %v4931_v50 = vpack.c.bf16 %v1956_v10, %v1955_v46 }
 0x283   :  { %v1188_v17 = vpop.xlane.xlu0 %1187  ;;  %v1270_v18 = vsel %vm1143_vm1, %v4816_v14, 0.0 }
 0x284   :  { %4103 = vpow2.f32 %v1234_v15  ;;  %v1206_v54 = vsub.f32 %v4748_v62, %v1188_v17  ;;  %1271 = vadd.xlane.f32.xlu0 %v1270_v18  ;;  %v4934_v15 = vpack.c.bf16 %v1974_v13, %v1973_v11  ;;  %v1957_v17 = vld [vmem:[%s6046_s7 + $0x50] sm:$0xff]  ;;  %v1958_v18 = vld [vmem:[%s6046_s7 + $0x58] sm:$0xff]  ;;  %3766 = vmatpush3.bf16.msra.mxu1 %v4931_v50 }
 0x286   :  { %v4821_v19 = vpop.eup %4099  ;;  %v1236_v21 = vmul.f32 1.442695, %v1206_v54  ;;  %v1975_v54 = vld [vmem:[%s6046_s7 + $0xe0] sm:$0xff]  ;;  %3768 = vmatprep.subr.bf16.mxu1 %v4934_v15 }
 0x287   :  { %v1191_v22 = vpop.xlane.xlu1 %1190  ;;  %v1273_v25 = vsel %vm1143_vm1, %v4821_v19, 0.0 }
 0x288   :  { %4105 = vpow2.f32 %v1236_v21  ;;  %v1207_v58 = vsub.f32 %v4752_v2, %v1191_v22  ;;  %1274 = vadd.xlane.f32.xlu1 %v1273_v25  ;;  %v1976_v21 = vld [vmem:[%s6046_s7 + $0xe8] sm:$0xff]  ;;  %v4949_v22 = vpack.c.bf16 %v1958_v18, %v1957_v17 }
 0x289   :  { %v4952_v25 = vpack.c.bf16 %v1976_v21, %v1975_v54 }
 0x28a   :  { %v4826_v26 = vpop.eup %4101  ;;  %v1238_v3 = vmul.f32 1.442695, %v1207_v58  ;;  %v1959_v58 = vld [vmem:[%s6046_s7 + $0x60] sm:$0xff]  ;;  %3770 = vmatpush3.bf16.msra.mxu1 %v4949_v22 }
 0x28b   :  { %v1276_v7 = vsel %vm1143_vm1, %v4826_v26, 0.0  ;;  %3772 = vmatprep.subr.bf16.mxu1 %v4952_v25 }
 0x28c   :  { %4107 = vpow2.f32 %v1238_v3  ;;  %1277 = vadd.xlane.f32.xlu0 %v1276_v7  ;;  %v1960_v3 = vld [vmem:[%s6046_s7 + $0x68] sm:$0xff]  ;;  %v1977_v7 = vld [vmem:[%s6046_s7 + $0xf0] sm:$0xff] }
 0x28e   :  { %v4830_v62 = vpop.eup %4103 }
 0x28f   :  { %v1279_v30 = vsel %vm1143_vm1, %v4830_v62, 0.0 }
 0x290   :  { %1280 = vadd.xlane.f32.xlu1 %v1279_v30  ;;  %v1978_v30 = vld [vmem:[%s6046_s7 + $0xf8] sm:$0xff] }
 0x292   :  { %v4834_v12 = vpop.eup %4105 }
 0x293   :  { %v1282_v2 = vsel %vm1143_vm1, %v4834_v12, 0.0 }
 0x294   :  { %1283 = vadd.xlane.f32.xlu0 %v1282_v2  ;;  %v4967_v2 = vpack.c.bf16 %v1960_v3, %v1959_v58  ;;  %v207_v58 = vld [vmem:[%s6042_s3 + $0x6] sm:$0x3]  ;;  %v209_v3 = vld [vmem:[%s6042_s3 + $0xa] sm:$0x3] }
 0x295   :  { %v271_v36 = vunpack.c.l.bf16 %v207_v58 }
 0x296   :  { %v4838_v31 = vpop.eup %4107  ;;  %3774 = vmatpush3.bf16.msra.mxu1 %v4967_v2 }
 0x297   :  { %v1285_v16 = vsel %vm1143_vm1, %v4838_v31, 0.0 }
 0x298   :  { %1286 = vadd.xlane.f32.xlu1 %v1285_v16  ;;  %v4970_v16 = vpack.c.bf16 %v1978_v30, %v1977_v7  ;;  %v210_v7 = vld [vmem:[%s6042_s3 + $0xc] sm:$0x3]  ;;  %v211_v30 = vld [vmem:[%s6042_s3 + $0xe] sm:$0x3] }
 0x29a   :  { %3776 = vmatprep.subr.bf16.mxu1 %v4970_v16 }
 0x29b   :  { %3778 = vmatpush3.bf16.msra.mxu1 %v4979_v37 }
 0x2e9   :  { %v1242_v20 = vpop.xlane.xlu0 %1241 }
 0x2ea   :  { %4109 = vrcp.f32 %v1242_v20  ;;  %v273_v20 = vunpack.c.l.bf16 %v209_v3 }
 0x2ed   :  { %v1245_v40 = vpop.xlane.xlu1 %1244 }
 0x2ee   :  { %4111 = vrcp.f32 %v1245_v40  ;;  %v274_v40 = vunpack.c.l.bf16 %v210_v7 }
 0x2f1   :  { %v1248_v41 = vpop.xlane.xlu0 %1247 }
 0x2f2   :  { %4113 = vrcp.f32 %v1248_v41  ;;  %v275_v41 = vunpack.c.l.bf16 %v211_v30 }
 0x2f4   :  { %v4110_v43 = vpop.eup %4109 }
 0x2f5   :  { %v1304_v47 = vmul.f32 %v4110_v43, %v4766_v23  ;;  %v1251_v48 = vpop.xlane.xlu1 %1250  ;;  %v212_v43 = vld [vmem:[%s6042_s3 + $0x10] sm:$0x3] }
 0x2f6   :  { %4115 = vrcp.f32 %v1251_v48  ;;  %v214_v48 = vld [vmem:[%s6042_s3 + $0x14] sm:$0x3] }
 0x2f7   :  { %3309 = vmatmul.mubr.msk.f32.vlgmr.msra.gmra.mrb[32].mxu0 %vm1143_vm1, %v1304_v47  ;;  %v213_v47 = vld [vmem:[%s6042_s3 + $0x12] sm:$0x3] }
 0x2f8   :  { %v4112_v29 = vpop.eup %4111  ;;  %1440 = vmatprep.mubr.f32.mxu0 %v6052_v8  ;;  %3782 = vmatpush3.bf16.msra.mxu0 %v4860_v24 }
 0x2f9   :  { %v1254_v51 = vpop.xlane.xlu0 %1253  ;;  %v1305_v33 = vmul.f32 %v4112_v29, %v4771_v28  ;;  %3784 = vmatprep.subr.bf16.mxu0 %v4862_v45  ;;  %v215_v29 = vld [vmem:[%s6042_s3 + $0x16] sm:$0x3] }
 0x2fa   :  { %4117 = vrcp.f32 %v1254_v51 }
 0x2fb   :  { %3310 = vmatmul.mubr.msk.f32.gmra.mrb[34].mxu0 %vm1143_vm1, %v1305_v33 }
 0x2fc   :  { %v4114_v56 = vpop.eup %4113  ;;  %1446 = vmatprep.mubr.f32.mxu0 %v6052_v8  ;;  %3786 = vmatpush3.bf16.msra.mxu0 %v4877_v52 }
 0x2fd   :  { %v1257_v23 = vpop.xlane.xlu1 %1256  ;;  %v1306_v57 = vmul.f32 %v4114_v56, %v4776_v32  ;;  %3788 = vmatprep.subr.bf16.mxu0 %v4880_v53 }
 0x2fe   :  { %4119 = vrcp.f32 %v1257_v23  ;;  %v1614_v23 = vcombine.low %v274_v40, %v275_v41  ;;  %v229_v40 = vld [vmem:[%s6042_s3 + $0x32] sm:$0x3] }
 0x2ff   :  { %3311 = vmatmul.mubr.msk.f32.gmra.mrb[36].mxu0 %vm1143_vm1, %v1306_v57  ;;  %v276_v57 = vunpack.c.l.bf16 %v212_v43 }
 0x300   :  { %v4116_v24 = vpop.eup %4115  ;;  %1452 = vmatprep.mubr.f32.mxu0 %v6052_v8  ;;  %3790 = vmatpush3.bf16.msra.mxu0 %v4895_v38 }
 0x301   :  { %v1260_v28 = vpop.xlane.xlu0 %1259  ;;  %v1307_v45 = vmul.f32 %v4116_v24, %v4781_v39  ;;  %3792 = vmatprep.subr.bf16.mxu0 %v4898_v61  ;;  %v277_v24 = vunpack.c.l.bf16 %v213_v47 }
 0x302   :  { %4121 = vrcp.f32 %v1260_v28  ;;  %v278_v28 = vunpack.c.l.bf16 %v214_v48 }
 0x303   :  { %3312 = vmatmul.mubr.msk.f32.gmra.mrb[38].mxu0 %vm1143_vm1, %v1307_v45  ;;  %v279_v45 = vunpack.c.l.bf16 %v215_v29 }
 0x304   :  { %v4118_v52 = vpop.eup %4117  ;;  %1458 = vmatprep.mubr.f32.mxu0 %v6052_v8  ;;  %3794 = vmatpush3.bf16.msra.mxu0 %v4913_v5 }
 0x305   :  { %v1263_v32 = vpop.xlane.xlu1 %1262  ;;  %v1308_v53 = vmul.f32 %v4118_v52, %v4786_v44  ;;  %3796 = vmatprep.subr.bf16.mxu0 %v4916_v6  ;;  %v216_v52 = vld [vmem:[%s6042_s3 + $0x18] sm:$0x3] }
 0x306   :  { %4123 = vrcp.f32 %v1263_v32  ;;  %v217_v32 = vld [vmem:[%s6042_s3 + $0x1a] sm:$0x3] }
 0x307   :  { %3313 = vmatmul.mubr.msk.f32.gmra.mrb[40].mxu0 %vm1143_vm1, %v1308_v53  ;;  %v218_v53 = vld [vmem:[%s6042_s3 + $0x1c] sm:$0x3] }
 0x308   :  { %v4120_v59 = vpop.eup %4119  ;;  %1464 = vmatprep.mubr.f32.mxu0 %v6052_v8  ;;  %3798 = vmatpush3.bf16.msra.mxu0 %v4931_v50 }
 0x309   :  { %v1266_v39 = vpop.xlane.xlu0 %1265  ;;  %v1309_v38 = vmul.f32 %v4120_v59, %v4791_v49  ;;  %3800 = vmatprep.subr.bf16.mxu0 %v4934_v15 }
 0x30a   :  { %4125 = vrcp.f32 %v1266_v39 }
 0x30b   :  { %3314 = vmatmul.mubr.msk.f32.gmra.mrb[42].mxu0 %vm1143_vm1, %v1309_v38  ;;  %v219_v38 = vld [vmem:[%s6042_s3 + $0x1e] sm:$0x3] }
 0x30c   :  { %v4122_v61 = vpop.eup %4121  ;;  %1470 = vmatprep.mubr.f32.mxu0 %v6052_v8  ;;  %3802 = vmatpush3.bf16.msra.mxu0 %v4949_v22 }
 0x30d   :  { %v1269_v44 = vpop.xlane.xlu1 %1268  ;;  %v1310_v63 = vmul.f32 %v4122_v61, %v4796_v55  ;;  %3804 = vmatprep.subr.bf16.mxu0 %v4952_v25  ;;  %v205_v25 = vld [vmem:[%s6042_s3 + $0x2] sm:$0x3]  ;;  %v220_v61 = vld [vmem:[%s6042_s3 + $0x20] sm:$0x3] }
 0x30e   :  { %4127 = vrcp.f32 %v1269_v44  ;;  %v221_v44 = vld [vmem:[%s6042_s3 + $0x22] sm:$0x3] }
 0x30f   :  { %3315 = vmatmul.mubr.msk.f32.gmra.mrb[44].mxu0 %vm1143_vm1, %v1310_v63 }
 0x310   :  { %v4124_v0 = vpop.eup %4123  ;;  %1476 = vmatprep.mubr.f32.mxu0 %v6052_v8  ;;  %3806 = vmatpush3.bf16.msra.mxu0 %v4967_v2 }
 0x311   :  { %v1272_v49 = vpop.xlane.xlu0 %1271  ;;  %v1311_v42 = vmul.f32 %v4124_v0, %v4801_v60  ;;  %3808 = vmatprep.subr.bf16.mxu0 %v4970_v16  ;;  %v269_v16 = vunpack.c.l.bf16 %v205_v25  ;;  %v1628_v0 = vrot.slane %v1614_v23, %v4490_v34 }
 0x312   :  { %4129 = vrcp.f32 %v1272_v49  ;;  %v222_v49 = vld [vmem:[%s6042_s3 + $0x24] sm:$0x3] }
 0x313   :  { %3316 = vmatmul.mubr.msk.f32.gmra.mrb[46].mxu0 %vm1143_vm1, %v1311_v42  ;;  %v223_v42 = vld [vmem:[%s6042_s3 + $0x26] sm:$0x3] }
 0x314   :  { %v4126_v4 = vpop.eup %4125  ;;  %1482 = vmatprep.mubr.f32.mxu0 %v6052_v8  ;;  %3810 = vmatpush3.bf16.msra.mxu0 %v4979_v37 }
 0x315   :  { %v1275_v55 = vpop.xlane.xlu1 %1274  ;;  %v1312_v5 = vmul.f32 %v4126_v4, %v4806_v1  ;;  %v1631_v4 = vcombine.low %v276_v57, %v277_v24 }
 0x316   :  { %4131 = vrcp.f32 %v1275_v55  ;;  %v1632_v55 = vcombine.low %v278_v28, %v279_v45 }
 0x317   :  { %3317 = vmatmul.mubr.msk.f32.gmra.mrb[48].mxu0 %vm1143_vm1, %v1312_v5  ;;  %v280_v5 = vunpack.c.l.bf16 %v216_v52 }
 0x318   :  { %v4128_v6 = vpop.eup %4127  ;;  %1488 = vmatprep.mubr.f32.mxu0 %v6052_v8 }
 0x319   :  { %v1278_v60 = vpop.xlane.xlu0 %1277  ;;  %v1313_v46 = vmul.f32 %v4128_v6, %v4811_v9  ;;  %v281_v6 = vunpack.c.l.bf16 %v217_v32 }
 0x31a   :  { %4133 = vrcp.f32 %v1278_v60  ;;  %v282_v60 = vunpack.c.l.bf16 %v218_v53  ;;  %v293_v53 = vunpack.c.l.bf16 %v229_v40  ;;  %v242_v40 = vld [vmem:[%s6042_s3 + $0x4c] sm:$0x3] }
 0x31b   :  { %3318 = vmatmul.mubr.msk.f32.gmra.mrb[50].mxu0 %vm1143_vm1, %v1313_v46  ;;  %v283_v46 = vunpack.c.l.bf16 %v219_v38  ;;  %v232_v38 = vld [vmem:[%s6042_s3 + $0x38] sm:$0x3] }
 0x31c   :  { %v4130_v10 = vpop.eup %4129  ;;  %1494 = vmatprep.mubr.f32.mxu0 %v6052_v8 }
 0x31d   :  { %v1281_v11 = vpop.xlane.xlu1 %1280  ;;  %v1314_v13 = vmul.f32 %v4130_v10, %v4816_v14  ;;  %v284_v10 = vunpack.c.l.bf16 %v220_v61  ;;  %v233_v61 = vld [vmem:[%s6042_s3 + $0x3a] sm:$0x3] }
 0x31e   :  { %4135 = vrcp.f32 %v1281_v11  ;;  %v285_v11 = vunpack.c.l.bf16 %v221_v44 }
 0x31f   :  { %3319 = vmatmul.mubr.msk.f32.gmra.mrb[52].mxu0 %vm1143_vm1, %v1314_v13 }
 0x320   :  { %v4132_v1 = vpop.eup %4131  ;;  %1500 = vmatprep.mubr.f32.mxu0 %v6052_v8  ;;  %v1667_v25 = vcombine.low %v284_v10, %v285_v11  ;;  %v237_v10 = vld [vmem:[%s6042_s3 + $0x42] sm:$0x3] }
 0x321   :  { %v1284_v50 = vpop.xlane.xlu0 %1283  ;;  %v1315_v15 = vmul.f32 %v4132_v1, %v4821_v19  ;;  %v286_v1 = vunpack.c.l.bf16 %v222_v49  ;;  %v234_v49 = vld [vmem:[%s6042_s3 + $0x3c] sm:$0x3] }
 0x322   :  { %4137 = vrcp.f32 %v1284_v50  ;;  %v287_v50 = vunpack.c.l.bf16 %v223_v42  ;;  %v5132_v29 = vrot.slane %v1667_v25, %v4490_v34  ;;  %v235_v42 = vld [vmem:[%s6042_s3 + $0x3e] sm:$0x3] }
 0x323   :  { %3320 = vmatmul.mubr.msk.f32.gmra.mrb[54].mxu0 %vm1143_vm1, %v1315_v15 }
 0x324   :  { %v4134_v9 = vpop.eup %4133  ;;  %1506 = vmatprep.mubr.f32.mxu0 %v6052_v8 }
 0x325   :  { %v1287_v17 = vpop.xlane.xlu1 %1286  ;;  %v1316_v18 = vmul.f32 %v4134_v9, %v4826_v26  ;;  %v224_v9 = vld [vmem:[%s6042_s3 + $0x28] sm:$0x3] }
 0x326   :  { %4139 = vrcp.f32 %v1287_v17  ;;  %v225_v17 = vld [vmem:[%s6042_s3 + $0x2a] sm:$0x3]  ;;  %v288_v3 = vunpack.c.l.bf16 %v224_v9  ;;  %v239_v9 = vld [vmem:[%s6042_s3 + $0x46] sm:$0x3] }
 0x327   :  { %3321 = vmatmul.mubr.msk.f32.gmra.mrb[56].mxu0 %vm1143_vm1, %v1316_v18  ;;  %v1639_v18 = vrot.slane %v1631_v4, %v4490_v34  ;;  %v289_v7 = vunpack.c.l.bf16 %v225_v17 }
 0x328   :  { %v4136_v14 = vpop.eup %4135  ;;  %1512 = vmatprep.mubr.f32.mxu0 %v6052_v8 }
 0x329   :  { %v1317_v54 = vmul.f32 %v4136_v14, %v4830_v62  ;;  %v204_v62 = vld [vmem:[%s6042_s3] sm:$0x3]  ;;  %v1646_v14 = vrot.slane %v1632_v55, %v4490_v34  ;;  %v1685_v28 = vcombine.low %v288_v3, %v289_v7  ;;  %v303_v3 = vunpack.c.l.bf16 %v239_v9 }
 0x32a   :  { %v268_v2 = vunpack.c.l.bf16 %v204_v62  ;;  %v1650_v62 = vcombine.low %v282_v60, %v283_v46  ;;  %v236_v46 = vld [vmem:[%s6042_s3 + $0x40] sm:$0x3] }
 0x32b   :  { %3322 = vmatmul.mubr.msk.f32.gmra.mrb[58].mxu0 %vm1143_vm1, %v1317_v54  ;;  %v226_v54 = vld [vmem:[%s6042_s3 + $0x2c] sm:$0x3] }
 0x32c   :  { %v4138_v19 = vpop.eup %4137  ;;  %1518 = vmatprep.mubr.f32.mxu0 %v6052_v8  ;;  %v1595_v51 = vcombine.low %v268_v2, %v269_v16  ;;  %v290_v16 = vunpack.c.l.bf16 %v226_v54  ;;  %v1664_v48 = vrot.slane %v1650_v62, %v4490_v34  ;;  %v298_v54 = vunpack.c.l.bf16 %v234_v49  ;;  %v247_v49 = vld [vmem:[%s6042_s3 + $0x56] sm:$0x3] }
 0x32d   :  { %v1318_v21 = vmul.f32 %v4138_v19, %v4834_v12  ;;  %v206_v12 = vld [vmem:[%s6042_s3 + $0x4] sm:$0x3]  ;;  %v227_v19 = vld [vmem:[%s6042_s3 + $0x2e] sm:$0x3]  ;;  %v301_v62 = vunpack.c.l.bf16 %v237_v10 }
 0x32e   :  { %v270_v35 = vunpack.c.l.bf16 %v206_v12  ;;  %v1603_v59 = vrot.slane %v1595_v51, %v4490_v34  ;;  %v230_v51 = vld [vmem:[%s6042_s3 + $0x34] sm:$0x3] }
 0x32f   :  { %3323 = vmatmul.mubr.msk.f32.gmra.mrb[60].mxu0 %vm1143_vm1, %v1318_v21 }
 0x330   :  { %v4140_v22 = vpop.eup %4139  ;;  %1524 = vmatprep.mubr.f32.mxu0 %v6052_v8  ;;  %v1596_v33 = vcombine.low %v270_v35, %v271_v36  ;;  %v291_v35 = vunpack.c.l.bf16 %v227_v19  ;;  %v1647_v36 = vcombine.low %v1639_v18, %v1646_v14 }
 0x331   :  { %v1319_v26 = vmul.f32 %v4140_v22, %v4838_v31  ;;  %v208_v31 = vld [vmem:[%s6042_s3 + $0x8] sm:$0x3] }
 0x332   :  { %v272_v37 = vunpack.c.l.bf16 %v208_v31  ;;  %v1610_v39 = vrot.slane %v1596_v33, %v4490_v34  ;;  %v1668_v31 = vcombine.low %v286_v1, %v287_v50  ;;  %v231_v33 = vld [vmem:[%s6042_s3 + $0x36] sm:$0x3]  ;;  %v1686_v52 = vcombine.low %v290_v16, %v291_v35 }
 0x333   :  { %3324 = vmatmul.mubr.msk.f32.gmra.mrb[62].mxu0 %vm1143_vm1, %v1319_v26  ;;  %v1649_v26 = vcombine.low %v280_v5, %v281_v6 }
 0x334   :  { %v1613_v56 = vcombine.low %v272_v37, %v273_v20  ;;  %v1611_v13 = vcombine.low %v1603_v59, %v1610_v39  ;;  %v1612_v15 = vcombine.high %v1603_v59, %v1610_v39  ;;  %v1648_v37 = vcombine.high %v1639_v18, %v1646_v14  ;;  %v228_v20 = vld [vmem:[%s6042_s3 + $0x30] sm:$0x3] }
 0x335   :  { %v1657_v47 = vrot.slane %v1649_v26, %v4490_v34  ;;  %v5141_v24 = vrot.slane %v1668_v31, %v4490_v34  ;;  %v292_v32 = vunpack.c.l.bf16 %v228_v20  ;;  %v294_v59 = vunpack.c.l.bf16 %v230_v51  ;;  %v241_v20 = vld [vmem:[%s6042_s3 + $0x4a] sm:$0x3] }
 0x336   :  { %v1621_v63 = vrot.slane %v1613_v56, %v4490_v34  ;;  %v295_v39 = vunpack.c.l.bf16 %v231_v33  ;;  %v5167_v1 = vrot.slane %v1686_v52, %v4490_v34  ;;  %v296_v18 = vunpack.c.l.bf16 %v232_v38 }
 0x337   :  { %v1666_v6 = vcombine.high %v1657_v47, %v1664_v48  ;;  %v1683_v60 = vcombine.low %v5132_v29, %v5141_v24  ;;  %v1703_v50 = vcombine.low %v292_v32, %v293_v53  ;;  %v297_v14 = vunpack.c.l.bf16 %v233_v61  ;;  %v244_v53 = vld [vmem:[%s6042_s3 + $0x50] sm:$0x3] }
 0x338   :  { %v1629_v22 = vcombine.low %v1621_v63, %v1628_v0  ;;  %v1630_v2 = vcombine.high %v1621_v63, %v1628_v0  ;;  %v1665_v0 = vcombine.low %v1657_v47, %v1664_v48  ;;  %v1704_v17 = vcombine.low %v294_v59, %v295_v39  ;;  %v245_v59 = vld [vmem:[%s6042_s3 + $0x52] sm:$0x3] }
 0x339   :  { %v300_v26 = vunpack.c.l.bf16 %v236_v46  ;;  %v1721_v48 = vcombine.low %v296_v18, %v297_v14  ;;  %v306_v52 = vunpack.c.l.bf16 %v242_v40  ;;  %v248_v18 = vld [vmem:[%s6042_s3 + $0x58] sm:$0x3] }
 0x33b   :  { %v1739_v51 = vcombine.low %v300_v26, %v301_v62  ;;  %v250_v26 = vld [vmem:[%s6042_s3 + $0x5c] sm:$0x3] }
 0x3ca   :  { %v1436_v21 = vpop.f32.mrb[32].mxu0 }
 0x3cb   :  { %v1915_v12 = vmul.f32 %v1611_v13, %v1436_v21  ;;  %v1438_v58 = vpop.f32.mrb[33].mxu0  ;;  %v5164_v13 = vrot.slane %v1685_v28, %v4490_v34 }
 0x3cc   :  { %v1916_v30 = vmul.f32 %v1612_v15, %v1438_v58  ;;  %v238_v15 = vld [vmem:[%s6042_s3 + $0x44] sm:$0x3] }
 0x3cd   :  { %v2124_v56 = vmul.f32 %v1915_v12, %v1915_v12  ;;  %v302_v31 = vunpack.c.l.bf16 %v238_v15  ;;  %v1701_v16 = vcombine.low %v5164_v13, %v5167_v1  ;;  %v1702_v35 = vcombine.high %v5164_v13, %v5167_v1 }
 0x3ce   :  { %v2125_v41 = vmul.f32 %v1916_v30, %v1916_v30  ;;  %v1442_v43 = vpop.f32.mrb[34].mxu0  ;;  %2043 = vmatprep.mubr.f32.mxu1 %v1916_v30  ;;  %v1684_v30 = vcombine.high %v5132_v29, %v5141_v24  ;;  %v308_v13 = vunpack.c.l.bf16 %v244_v53  ;;  %v309_v1 = vunpack.c.l.bf16 %v245_v59 }
 0x3cf   :  { %v1917_v23 = vmul.f32 %v1629_v22, %v1442_v43  ;;  %v1444_v57 = vpop.f32.mrb[35].mxu0  ;;  %2044 = vmatmul.mubr.f32.vlgmr.msra.gmra.mrb[32].mxu1 %v1915_v12  ;;  %v299_v22 = vunpack.c.l.bf16 %v235_v42  ;;  %v311_v15 = vunpack.c.l.bf16 %v247_v49 }
 0x3d0   :  { %v1918_v45 = vmul.f32 %v1630_v2, %v1444_v57  ;;  %2220 = vmatprep.mubr.f32.mxu0 %v2125_v41  ;;  %v240_v2 = vld [vmem:[%s6042_s3 + $0x48] sm:$0x3]  ;;  %v243_v41 = vld [vmem:[%s6042_s3 + $0x4e] sm:$0x3]  ;;  %v1740_v57 = vcombine.low %v302_v31, %v303_v3  ;;  %v251_v31 = vld [vmem:[%s6042_s3 + $0x5e] sm:$0x3] }
 0x3d1   :  { %2221 = vmatmul.mubr.f32.vlgmr.msra.gmra.mrb[64].mxu0 %v2124_v56  ;;  %v2126_v4 = vmul.f32 %v1917_v23, %v1917_v23  ;;  %v1722_v29 = vcombine.low %v298_v54, %v299_v22  ;;  %v304_v24 = vunpack.c.l.bf16 %v240_v2  ;;  %v307_v32 = vunpack.c.l.bf16 %v243_v41  ;;  %v249_v22 = vld [vmem:[%s6042_s3 + $0x5a] sm:$0x3]  ;;  %v252_v3 = vld [vmem:[%s6042_s3 + $0x60] sm:$0x3] }
 0x3d2   :  { %v2127_v44 = vmul.f32 %v1918_v45, %v1918_v45  ;;  %v1448_v63 = vpop.f32.mrb[36].mxu0  ;;  %2048 = vmatprep.mubr.f32.mxu1 %v1918_v45  ;;  %v305_v45 = vunpack.c.l.bf16 %v241_v20  ;;  %v5213_v46 = vrot.slane %v1740_v57, %v4490_v34  ;;  %v1775_v2 = vcombine.low %v308_v13, %v309_v1 }
 0x3d3   :  { %v1919_v55 = vmul.f32 %v1647_v36, %v1448_v63  ;;  %v1450_v5 = vpop.f32.mrb[37].mxu0  ;;  %2049 = vmatmul.mubr.f32.gmra.mrb[34].mxu1 %v1917_v23  ;;  %v1711_v36 = vrot.slane %v1703_v50, %v4490_v34  ;;  %v1729_v63 = vrot.slane %v1721_v48, %v4490_v34  ;;  %v312_v41 = vunpack.c.l.bf16 %v248_v18 }
 0x3d4   :  { %v1920_v11 = vmul.f32 %v1648_v37, %v1450_v5  ;;  %2225 = vmatprep.mubr.f32.mxu0 %v2127_v44  ;;  %v1718_v37 = vrot.slane %v1704_v17, %v4490_v34  ;;  %v1736_v5 = vrot.slane %v1722_v29, %v4490_v34  ;;  %v1757_v10 = vcombine.low %v304_v24, %v305_v45  ;;  %v256_v45 = vld [vmem:[%s6042_s3 + $0x68] sm:$0x3] }
 0x3d5   :  { %2226 = vmatmul.mubr.f32.gmra.mrb[66].mxu0 %v2126_v4  ;;  %v2128_v25 = vmul.f32 %v1919_v55, %v1919_v55 }
 0x3d6   :  { %v2129_v19 = vmul.f32 %v1920_v11, %v1920_v11  ;;  %v1454_v21 = vpop.f32.mrb[38].mxu0  ;;  %2053 = vmatprep.mubr.f32.mxu1 %v1920_v11  ;;  %v1719_v61 = vcombine.low %v1711_v36, %v1718_v37  ;;  %v1720_v44 = vcombine.high %v1711_v36, %v1718_v37  ;;  %v1758_v11 = vcombine.low %v306_v52, %v307_v32  ;;  %v254_v36 = vld [vmem:[%s6042_s3 + $0x64] sm:$0x3]  ;;  %v255_v37 = vld [vmem:[%s6042_s3 + $0x66] sm:$0x3] }
 0x3d7   :  { %v1921_v12 = vmul.f32 %v1665_v0, %v1454_v21  ;;  %v1456_v58 = vpop.f32.mrb[39].mxu0  ;;  %2054 = vmatmul.mubr.f32.gmra.mrb[36].mxu1 %v1919_v55  ;;  %v246_v0 = vld [vmem:[%s6042_s3 + $0x54] sm:$0x3]  ;;  %v1737_v21 = vcombine.low %v1729_v63, %v1736_v5  ;;  %v318_v24 = vunpack.c.l.bf16 %v254_v36  ;;  %v257_v52 = vld [vmem:[%s6042_s3 + $0x6a] sm:$0x3] }
 0x3d8   :  { %v1922_v7 = vmul.f32 %v1666_v6, %v1456_v58  ;;  %2230 = vmatprep.mubr.f32.mxu0 %v2129_v19  ;;  %v5210_v6 = vrot.slane %v1739_v51, %v4490_v34  ;;  %v310_v50 = vunpack.c.l.bf16 %v246_v0 }
 0x3d9   :  { %2231 = vmatmul.mubr.f32.gmra.mrb[68].mxu0 %v2128_v25  ;;  %v2130_v33 = vmul.f32 %v1921_v12, %v1921_v12  ;;  %v1738_v25 = vcombine.high %v1729_v63, %v1736_v5 }
 0x3da   :  { %v2131_v43 = vmul.f32 %v1922_v7, %v1922_v7  ;;  %v1460_v47 = vpop.f32.mrb[40].mxu0  ;;  %2058 = vmatprep.mubr.f32.mxu1 %v1922_v7  ;;  %v1756_v58 = vcombine.high %v5210_v6, %v5213_v46  ;;  %v5235_v7 = vrot.slane %v1757_v10, %v4490_v34  ;;  %v321_v10 = vunpack.c.l.bf16 %v257_v52 }
 0x3db   :  { %v1923_v56 = vmul.f32 %v1683_v60, %v1460_v47  ;;  %v1462_v23 = vpop.f32.mrb[41].mxu0  ;;  %2059 = vmatmul.mubr.f32.gmra.mrb[38].mxu1 %v1921_v12  ;;  %v1755_v12 = vcombine.low %v5210_v6, %v5213_v46  ;;  %v314_v47 = vunpack.c.l.bf16 %v250_v26  ;;  %v320_v46 = vunpack.c.l.bf16 %v256_v45  ;;  %v263_v26 = vld [vmem:[%s6042_s3 + $0x76] sm:$0x3] }
 0x3dc   :  { %v1924_v28 = vmul.f32 %v1684_v30, %v1462_v23  ;;  %2235 = vmatprep.mubr.f32.mxu0 %v2131_v43  ;;  %v5238_v30 = vrot.slane %v1758_v11, %v4490_v34  ;;  %v313_v43 = vunpack.c.l.bf16 %v249_v22  ;;  %v262_v22 = vld [vmem:[%s6042_s3 + $0x74] sm:$0x3]  ;;  %v327_v36 = vunpack.c.l.bf16 %v263_v26 }
 0x3dd   :  { %2236 = vmatmul.mubr.f32.gmra.mrb[70].mxu0 %v2130_v33  ;;  %v2132_v42 = vmul.f32 %v1923_v56, %v1923_v56  ;;  %v315_v33 = vunpack.c.l.bf16 %v251_v31  ;;  %v1829_v31 = vcombine.low %v320_v46, %v321_v10 }
 0x3de   :  { %v2133_v39 = vmul.f32 %v1924_v28, %v1924_v28  ;;  %v1466_v38 = vpop.f32.mrb[42].mxu0  ;;  %2063 = vmatprep.mubr.f32.mxu1 %v1924_v28  ;;  %v319_v28 = vunpack.c.l.bf16 %v255_v37  ;;  %v1773_v59 = vcombine.low %v5235_v7, %v5238_v30  ;;  %v1774_v5 = vcombine.high %v5235_v7, %v5238_v30 }
 0x3df   :  { %v1925_v4 = vmul.f32 %v1701_v16, %v1466_v38  ;;  %v1468_v55 = vpop.f32.mrb[43].mxu0  ;;  %2064 = vmatmul.mubr.f32.gmra.mrb[40].mxu1 %v1923_v56  ;;  %v1776_v16 = vcombine.low %v310_v50, %v311_v15  ;;  %v316_v56 = vunpack.c.l.bf16 %v252_v3 }
 0x3e0   :  { %v1926_v60 = vmul.f32 %v1702_v35, %v1468_v55  ;;  %2240 = vmatprep.mubr.f32.mxu0 %v2133_v39  ;;  %v253_v35 = vld [vmem:[%s6042_s3 + $0x62] sm:$0x3]  ;;  %v1783_v39 = vrot.slane %v1775_v2, %v4490_v34 }
 0x3e1   :  { %2241 = vmatmul.mubr.f32.gmra.mrb[72].mxu0 %v2132_v42  ;;  %v2134_v14 = vmul.f32 %v1925_v4, %v1925_v4  ;;  %v317_v57 = vunpack.c.l.bf16 %v253_v35  ;;  %v1790_v38 = vrot.slane %v1776_v16, %v4490_v34  ;;  %v1793_v42 = vcombine.low %v312_v41, %v313_v43  ;;  %v264_v43 = vld [vmem:[%s6042_s3 + $0x78] sm:$0x3] }
 0x3e2   :  { %v2135_v9 = vmul.f32 %v1926_v60, %v1926_v60  ;;  %v1472_v17 = vpop.f32.mrb[44].mxu0  ;;  %2068 = vmatprep.mubr.f32.mxu1 %v1926_v60  ;;  %v1812_v60 = vcombine.low %v318_v24, %v319_v28  ;;  %v326_v35 = vunpack.c.l.bf16 %v262_v22 }
 0x3e3   :  { %v1927_v54 = vmul.f32 %v1719_v61, %v1472_v17  ;;  %v1474_v19 = vpop.f32.mrb[45].mxu0  ;;  %2069 = vmatmul.mubr.f32.gmra.mrb[42].mxu1 %v1925_v4  ;;  %v258_v61 = vld [vmem:[%s6042_s3 + $0x6c] sm:$0x3]  ;;  %v1794_v4 = vcombine.low %v314_v47, %v315_v33  ;;  %v1811_v6 = vcombine.low %v316_v56, %v317_v57  ;;  %v1791_v15 = vcombine.low %v1783_v39, %v1790_v38  ;;  %v261_v17 = vld [vmem:[%s6042_s3 + $0x72] sm:$0x3] }
 0x3e4   :  { %v1928_v62 = vmul.f32 %v1720_v44, %v1474_v19  ;;  %2245 = vmatprep.mubr.f32.mxu0 %v2135_v9  ;;  %v259_v44 = vld [vmem:[%s6042_s3 + $0x6e] sm:$0x3]  ;;  %v322_v11 = vunpack.c.l.bf16 %v258_v61  ;;  %v260_v9 = vld [vmem:[%s6042_s3 + $0x70] sm:$0x3]  ;;  %v1801_v19 = vrot.slane %v1793_v42, %v4490_v34  ;;  %v325_v30 = vunpack.c.l.bf16 %v261_v17  ;;  %v265_v47 = vld [vmem:[%s6042_s3 + $0x7a] sm:$0x3] }
 0x3e5   :  { %2246 = vmatmul.mubr.f32.gmra.mrb[74].mxu0 %v2134_v14  ;;  %v2136_v48 = vmul.f32 %v1927_v54, %v1927_v54  ;;  %v323_v13 = vunpack.c.l.bf16 %v259_v44  ;;  %v324_v7 = vunpack.c.l.bf16 %v260_v9  ;;  %v267_v33 = vld [vmem:[%s6042_s3 + $0x7e] sm:$0x3]  ;;  %v1848_v52 = vcombine.low %v326_v35, %v327_v36 }
 0x3e6   :  { %v2137_v20 = vmul.f32 %v1928_v62, %v1928_v62  ;;  %v1478_v40 = vpop.f32.mrb[46].mxu0  ;;  %2073 = vmatprep.mubr.f32.mxu1 %v1928_v62  ;;  %v331_v44 = vunpack.c.l.bf16 %v267_v33 }
 0x3e7   :  { %v1929_v29 = vmul.f32 %v1737_v21, %v1478_v40  ;;  %v1480_v51 = vpop.f32.mrb[47].mxu0  ;;  %2074 = vmatmul.mubr.f32.gmra.mrb[44].mxu1 %v1927_v54  ;;  %v1808_v21 = vrot.slane %v1794_v4, %v4490_v34  ;;  %v1830_v3 = vcombine.low %v322_v11, %v323_v13  ;;  %v1847_v24 = vcombine.low %v324_v7, %v325_v30 }
 0x3e8   :  { %v1930_v23 = vmul.f32 %v1738_v25, %v1480_v51  ;;  %2250 = vmatprep.mubr.f32.mxu0 %v2137_v20  ;;  %v1792_v25 = vcombine.high %v1783_v39, %v1790_v38  ;;  %v266_v51 = vld [vmem:[%s6042_s3 + $0x7c] sm:$0x3] }
 0x3e9   :  { %2251 = vmatmul.mubr.f32.gmra.mrb[76].mxu0 %v2136_v48  ;;  %v2138_v63 = vmul.f32 %v1929_v29, %v1929_v29  ;;  %v1809_v41 = vcombine.low %v1801_v19, %v1808_v21  ;;  %v1844_v57 = vrot.slane %v1830_v3, %v4490_v34  ;;  %v330_v61 = vunpack.c.l.bf16 %v266_v51 }
 0x3ea   :  { %v2139_v32 = vmul.f32 %v1930_v23, %v1930_v23  ;;  %v1484_v53 = vpop.f32.mrb[48].mxu0  ;;  %2078 = vmatprep.mubr.f32.mxu1 %v1930_v23  ;;  %v1837_v23 = vrot.slane %v1829_v31, %v4490_v34 }
 0x3eb   :  { %v1931_v0 = vmul.f32 %v1755_v12, %v1484_v53  ;;  %v1486_v49 = vpop.f32.mrb[49].mxu0  ;;  %2079 = vmatmul.mubr.f32.gmra.mrb[46].mxu1 %v1929_v29  ;;  %v1819_v12 = vrot.slane %v1811_v6, %v4490_v34  ;;  %v1810_v29 = vcombine.high %v1801_v19, %v1808_v21  ;;  %v329_v53 = vunpack.c.l.bf16 %v265_v47 }
 0x3ec   :  { %v1932_v55 = vmul.f32 %v1756_v58, %v1486_v49  ;;  %2255 = vmatprep.mubr.f32.mxu0 %v2139_v32  ;;  %v1826_v58 = vrot.slane %v1812_v60, %v4490_v34  ;;  %v328_v32 = vunpack.c.l.bf16 %v264_v43  ;;  %v1845_v4 = vcombine.low %v1837_v23, %v1844_v57  ;;  %v4146_v43 = vld [vmem:[%s6039_s0 + $0x8] sm:$0xff] }
 0x3ed   :  { %2256 = vmatmul.mubr.f32.gmra.mrb[78].mxu0 %v2138_v63  ;;  %v2140_v18 = vmul.f32 %v1931_v0, %v1931_v0  ;;  %v1866_v11 = vcombine.low %v330_v61, %v331_v44  ;;  %v2366_v47 = vadd.f32 %v4146_v43, %v4146_v43 }
 0x3ee   :  { %v2141_v1 = vmul.f32 %v1932_v55, %v1932_v55  ;;  %v1490_v50 = vpop.f32.mrb[50].mxu0  ;;  %2083 = vmatprep.mubr.f32.mxu1 %v1932_v55  ;;  %v1827_v56 = vcombine.low %v1819_v12, %v1826_v58  ;;  %v1855_v55 = vrot.slane %v1847_v24, %v4490_v34  ;;  %v1865_v10 = vcombine.low %v328_v32, %v329_v53  ;;  %v4149_v53 = vld [vmem:[%s6039_s0 + $0x20] sm:$0xff] }
 0x3ef   :  { %v1933_v14 = vmul.f32 %v1773_v59, %v1490_v50  ;;  %v1492_v54 = vpop.f32.mrb[51].mxu0  ;;  %2084 = vmatmul.mubr.f32.gmra.mrb[48].mxu1 %v1931_v0  ;;  %v1828_v0 = vcombine.high %v1819_v12, %v1826_v58  ;;  %v1880_v19 = vrot.slane %v1866_v11, %v4490_v34  ;;  %v5337_v61 = vmul.f32 %v4149_v53, %v4149_v53 }
 0x3f0   :  { %v1934_v62 = vmul.f32 %v1774_v5, %v1492_v54  ;;  %2260 = vmatprep.mubr.f32.mxu0 %v2141_v1  ;;  %v1862_v5 = vrot.slane %v1848_v52, %v4490_v34  ;;  %v1846_v1 = vcombine.high %v1837_v23, %v1844_v57  ;;  %v1873_v54 = vrot.slane %v1865_v10, %v4490_v34  ;;  %v4148_v57 = vld [vmem:[%s6039_s0 + $0x18] sm:$0xff]  ;;  %v4153_v10 = vld [vmem:[%s6039_s0 + $0x40] sm:$0xff] }
 0x3f1   :  { %2261 = vmatmul.mubr.f32.gmra.mrb[80].mxu0 %v2140_v18  ;;  %v2142_v37 = vmul.f32 %v1933_v14, %v1933_v14  ;;  %v5317_v24 = vadd.f32 %v4148_v57, %v4148_v57  ;;  %v5366_v11 = vadd.f32 %v4153_v10, %v4153_v10 }
 0x3f2   :  { %v2143_v2 = vmul.f32 %v1934_v62, %v1934_v62  ;;  %v1496_v16 = vpop.f32.mrb[52].mxu0  ;;  %2088 = vmatprep.mubr.f32.mxu1 %v1934_v62  ;;  %v1863_v9 = vcombine.low %v1855_v55, %v1862_v5  ;;  %v1864_v22 = vcombine.high %v1855_v55, %v1862_v5  ;;  %v1881_v31 = vcombine.low %v1873_v54, %v1880_v19 }
 0x3f3   :  { %v1935_v20 = vmul.f32 %v1791_v15, %v1496_v16  ;;  %v1498_v40 = vpop.f32.mrb[53].mxu0  ;;  %2089 = vmatmul.mubr.f32.gmra.mrb[50].mxu1 %v1933_v14  ;;  %v1882_v7 = vcombine.high %v1873_v54, %v1880_v19  ;;  %v4156_v54 = vld [vmem:[%s6039_s0 + $0x58] sm:$0xff] }
 0x3f4   :  { %v1936_v48 = vmul.f32 %v1792_v25, %v1498_v40  ;;  %2265 = vmatprep.mubr.f32.mxu0 %v2143_v2  ;;  %v4145_v40 = vld [vmem:[%s6039_s0] sm:$0xff]  ;;  %v5389_v19 = vadd.f32 %v4156_v54, %v4156_v54 }
 0x3f5   :  { %2266 = vmatmul.mubr.f32.gmra.mrb[82].mxu0 %v2142_v37  ;;  %v2144_v59 = vmul.f32 %v1935_v20, %v1935_v20 }
 0x3f6   :  { %v2145_v28 = vmul.f32 %v1936_v48, %v1936_v48  ;;  %v1502_v45 = vpop.f32.mrb[54].mxu0  ;;  %2093 = vmatprep.mubr.f32.mxu1 %v1936_v48  ;;  %v2381_v48 = vmul.f32 %v4145_v40, %v4145_v40 }
 0x3f7   :  { %v1937_v39 = vmul.f32 %v1809_v41, %v1502_v45  ;;  %v1504_v38 = vpop.f32.mrb[55].mxu0  ;;  %2094 = vmatmul.mubr.f32.gmra.mrb[52].mxu1 %v1935_v20  ;;  %v2365_v41 = vadd.f32 %v4145_v40, %v4145_v40  ;;  %v5321_v45 = vmul.f32 %v4148_v57, %v4148_v57  ;;  %v2644_v57 = vld [vmem:[%s6047_s8 + $0x28] sm:$0xff] }
 0x3f8   :  { %v1938_v63 = vmul.f32 %v1810_v29, %v1504_v38  ;;  %2270 = vmatprep.mubr.f32.mxu0 %v2145_v28  ;;  %v2382_v29 = vmul.f32 %v4146_v43, %v4146_v43  ;;  %v2640_v43 = vld [vmem:[%s6047_s8 + $0x8] sm:$0xff] }
 0x3f9   :  { %2271 = vmatmul.mubr.f32.gmra.mrb[84].mxu0 %v2144_v59  ;;  %v2146_v6 = vmul.f32 %v1937_v39, %v1937_v39  ;;  %v3881_v51 = vpack.i.bf16 %v2366_v47, %v2365_v41  ;;  %v5330_v59 = vadd.f32 %v4149_v53, %v4149_v53  ;;  %v2639_v41 = vld [vmem:[%s6047_s8] sm:$0xff] }
 0x3fa   :  { %v2147_v49 = vmul.f32 %v1938_v63, %v1938_v63  ;;  %v1508_v42 = vpop.f32.mrb[56].mxu0  ;;  %2098 = vmatprep.mubr.f32.mxu1 %v1938_v63  ;;  %v3886_v33 = vpack.i.bf16 %v2382_v29, %v2381_v48  ;;  %v3811_v48 = vpack.c.bf16 %v2640_v43, %v2639_v41  ;;  %v2641_v29 = vld [vmem:[%s6047_s8 + $0x10] sm:$0xff] }
 0x3fb   :  { %v1939_v60 = vmul.f32 %v1827_v56, %v1508_v42  ;;  %v1510_v46 = vpop.f32.mrb[57].mxu0  ;;  %2099 = vmatmul.mubr.f32.gmra.mrb[54].mxu1 %v1937_v39  ;;  %3882 = vrot.lane.b32.xlu1 %v3881_v51, %s4187_s24  ;;  %v4147_v56 = vld [vmem:[%s6039_s0 + $0x10] sm:$0xff]  ;;  %v4150_v39 = vld [vmem:[%s6039_s0 + $0x28] sm:$0xff]  ;;  %v2642_v51 = vld [vmem:[%s6047_s8 + $0x18] sm:$0xff] }
 0x3fc   :  { %v1940_v13 = vmul.f32 %v1828_v0, %v1510_v46  ;;  %2275 = vmatprep.mubr.f32.mxu0 %v2147_v49  ;;  %v5312_v23 = vadd.f32 %v4147_v56, %v4147_v56  ;;  %v5319_v28 = vmul.f32 %v4147_v56, %v4147_v56  ;;  %v5335_v38 = vadd.f32 %v4150_v39, %v4150_v39  ;;  %v4151_v49 = vld [vmem:[%s6039_s0 + $0x30] sm:$0xff] }
 0x3fd   :  { %2276 = vmatmul.mubr.f32.gmra.mrb[86].mxu0 %v2146_v6  ;;  %v2148_v17 = vmul.f32 %v1939_v60, %v1939_v60  ;;  %v5339_v44 = vmul.f32 %v4150_v39, %v4150_v39  ;;  %v5348_v42 = vadd.f32 %v4151_v49, %v4151_v49  ;;  %v5355_v5 = vmul.f32 %v4151_v49, %v4151_v49  ;;  %v2645_v39 = vld [vmem:[%s6047_s8 + $0x30] sm:$0xff]  ;;  %v2646_v49 = vld [vmem:[%s6047_s8 + $0x38] sm:$0xff] }
 0x3fe   :  { %v2149_v50 = vmul.f32 %v1940_v13, %v1940_v13  ;;  %v1514_v15 = vpop.f32.mrb[58].mxu0  ;;  %2103 = vmatprep.mubr.f32.mxu1 %v1940_v13  ;;  %v3891_v52 = vpack.i.bf16 %v5317_v24, %v5312_v23  ;;  %v3901_v32 = vpack.i.bf16 %v5321_v45, %v5319_v28  ;;  %v3906_v63 = vpack.i.bf16 %v5335_v38, %v5330_v59  ;;  %v4154_v13 = vld [vmem:[%s6039_s0 + $0x48] sm:$0xff]  ;;  %v67_v28 = vld [vmem:[%s6040_s1 + $0x38] sm:$0xff]  ;;  %v68_v59 = vld [vmem:[%s6040_s1 + $0x40] sm:$0xff] }
 0x3ff   :  { %v1941_v18 = vmul.f32 %v1845_v4, %v1514_v15  ;;  %v1516_v14 = vpop.f32.mrb[59].mxu0  ;;  %2104 = vmatmul.mubr.f32.gmra.mrb[56].mxu1 %v1939_v60  ;;  %3887 = vrot.lane.b32.xlu1 %v3886_v33, %s4188_s25  ;;  %v3916_v0 = vpack.i.bf16 %v5339_v44, %v5337_v61  ;;  %v4152_v4 = vld [vmem:[%s6039_s0 + $0x38] sm:$0xff]  ;;  %v5375_v15 = vmul.f32 %v4154_v13, %v4154_v13  ;;  %v2643_v33 = vld [vmem:[%s6047_s8 + $0x20] sm:$0xff]  ;;  %v65_v23 = vld [vmem:[%s6040_s1 + $0x28] sm:$0xff] }
 0x400   :  { %v1942_v21 = vmul.f32 %v1846_v1, %v1516_v14  ;;  %2280 = vmatprep.mubr.f32.mxu0 %v2149_v50  ;;  %v5353_v55 = vadd.f32 %v4152_v4, %v4152_v4  ;;  %v5357_v6 = vmul.f32 %v4152_v4, %v4152_v4  ;;  %v5371_v1 = vadd.f32 %v4154_v13, %v4154_v13  ;;  %v2648_v13 = vld [vmem:[%s6047_s8 + $0x48] sm:$0xff] }
 0x401   :  { %2281 = vmatmul.mubr.f32.gmra.mrb[88].mxu0 %v2148_v17  ;;  %v2150_v25 = vmul.f32 %v1941_v18, %v1941_v18  ;;  %v5373_v50 = vmul.f32 %v4153_v10, %v4153_v10  ;;  %3812 = vmatprep.subr.bf16.mxu1 %v3811_v48  ;;  %v3815_v56 = vpack.c.bf16 %v2642_v51, %v2641_v29  ;;  %v2647_v10 = vld [vmem:[%s6047_s8 + $0x40] sm:$0xff]  ;;  %v69_v61 = vld [vmem:[%s6040_s1 + $0x48] sm:$0xff] }
 0x402   :  { %v2151_v26 = vmul.f32 %v1942_v21, %v1942_v21  ;;  %v1520_v62 = vpop.f32.mrb[60].mxu0  ;;  %2108 = vmatprep.mubr.f32.mxu1 %v1942_v21  ;;  %v3921_v60 = vpack.i.bf16 %v5353_v55, %v5348_v42  ;;  %v3931_v46 = vpack.i.bf16 %v5357_v6, %v5355_v5  ;;  %3814 = vmatpush3.bf16.msra.mxu1 %v3811_v48  ;;  %v70_v42 = vld [vmem:[%s6040_s1 + $0x50] sm:$0xff]  ;;  %v71_v5 = vld [vmem:[%s6040_s1 + $0x58] sm:$0xff] }
 0x403   :  { %v1943_v12 = vmul.f32 %v1863_v9, %v1520_v62  ;;  %v1522_v58 = vpop.f32.mrb[61].mxu0  ;;  %2109 = vmatmul.mubr.f32.gmra.mrb[58].mxu1 %v1941_v18  ;;  %v3936_v9 = vpack.i.bf16 %v5371_v1, %v5366_v11  ;;  %v3946_v17 = vpack.i.bf16 %v5375_v15, %v5373_v50  ;;  %v4155_v18 = vld [vmem:[%s6039_s0 + $0x50] sm:$0xff]  ;;  %v3819_v53 = vpack.c.bf16 %v2644_v57, %v2643_v33  ;;  %v72_v11 = vld [vmem:[%s6040_s1 + $0x60] sm:$0xff]  ;;  %v73_v50 = vld [vmem:[%s6040_s1 + $0x68] sm:$0xff] }
 0x404   :  { %v1944_v3 = vmul.f32 %v1864_v22, %v1522_v58  ;;  %2285 = vmatprep.mubr.f32.mxu0 %v2151_v26  ;;  %v5384_v14 = vadd.f32 %v4155_v18, %v4155_v18  ;;  %v5391_v21 = vmul.f32 %v4155_v18, %v4155_v18  ;;  %v5393_v22 = vmul.f32 %v4156_v54, %v4156_v54  ;;  %v4158_v58 = vld [vmem:[%s6039_s0 + $0x68] sm:$0xff]  ;;  %v2649_v54 = vld [vmem:[%s6047_s8 + $0x50] sm:$0xff] }
 0x405   :  { %2286 = vmatmul.mubr.f32.gmra.mrb[90].mxu0 %v2150_v25  ;;  %v2152_v34 = vmul.f32 %v1943_v12, %v1943_v12  ;;  %v4157_v25 = vld [vmem:[%s6039_s0 + $0x60] sm:$0xff]  ;;  %3816 = vmatprep.subr.bf16.mxu1 %v3815_v56  ;;  %v3823_v4 = vpack.c.bf16 %v2646_v49, %v2645_v39  ;;  %v3827_v18 = vpack.c.bf16 %v2648_v13, %v2647_v10  ;;  %v2653_v33 = vld [vmem:[%s6047_s8 + $0x70] sm:$0xff] }
 0x406   :  { %v2153_v30 = vmul.f32 %v1944_v3, %v1944_v3  ;;  %v1526_v2 = vpop.f32.mrb[62].mxu0  ;;  %2113 = vmatprep.mubr.f32.mxu1 %v1944_v3  ;;  %v3951_v26 = vpack.i.bf16 %v5389_v19, %v5384_v14  ;;  %v3961_v62 = vpack.i.bf16 %v5393_v22, %v5391_v21  ;;  %v5409_v3 = vmul.f32 %v4157_v25, %v4157_v25  ;;  %v60_v10 = vld [vmem:[%s6040_s1] sm:$0xff]  ;;  %v74_v14 = vld [vmem:[%s6040_s1 + $0x70] sm:$0xff]  ;;  %v75_v21 = vld [vmem:[%s6040_s1 + $0x78] sm:$0xff] }
 0x407   :  { %v1945_v16 = vmul.f32 %v1881_v31, %v1526_v2  ;;  %v1528_v35 = vpop.f32.mrb[63].mxu0  ;;  %2114 = vmatmul.mubr.f32.gmra.mrb[60].mxu1 %v1943_v12  ;;  %v5402_v12 = vadd.f32 %v4157_v25, %v4157_v25  ;;  %v5407_v31 = vadd.f32 %v4158_v58, %v4158_v58  ;;  %v2650_v25 = vld [vmem:[%s6047_s8 + $0x58] sm:$0xff] }
 0x408   :  { %v1946_v36 = vmul.f32 %v1882_v7, %v1528_v35  ;;  %2290 = vmatprep.mubr.f32.mxu0 %v2153_v30  ;;  %v5411_v7 = vmul.f32 %v4158_v58, %v4158_v58  ;;  %v4160_v35 = vld [vmem:[%s6039_s0 + $0x78] sm:$0xff]  ;;  %3818 = vmatpush3.bf16.msra.mxu1 %v3815_v56  ;;  %v3831_v58 = vpack.c.bf16 %v2650_v25, %v2649_v54 }
 0x409   :  { %2291 = vmatmul.mubr.f32.gmra.mrb[92].mxu0 %v2152_v34  ;;  %v2154_v20 = vmul.f32 %v1945_v16, %v1945_v16  ;;  %v3966_v30 = vpack.i.bf16 %v5407_v31, %v5402_v12  ;;  %v4159_v34 = vld [vmem:[%s6039_s0 + $0x70] sm:$0xff]  ;;  %3820 = vmatprep.subr.bf16.mxu1 %v3819_v53  ;;  %v2654_v56 = vld [vmem:[%s6047_s8 + $0x78] sm:$0xff] }
 0x40a   :  { %v2155_v37 = vmul.f32 %v1946_v36, %v1946_v36  ;;  %2118 = vmatprep.mubr.f32.mxu1 %v1946_v36  ;;  %v5425_v36 = vadd.f32 %v4160_v35, %v4160_v35 }
 0x40b   :  { %2119 = vmatmul.mubr.f32.gmra.mrb[62].mxu1 %v1945_v16  ;;  %v5420_v16 = vadd.f32 %v4159_v34, %v4159_v34 }
 0x40c   :  { %2295 = vmatprep.mubr.f32.mxu0 %v2155_v37  ;;  %v5427_v37 = vmul.f32 %v4159_v34, %v4159_v34  ;;  %3822 = vmatpush3.bf16.msra.mxu1 %v3819_v53  ;;  %v2651_v34 = vld [vmem:[%s6047_s8 + $0x60] sm:$0xff]  ;;  %v3839_v53 = vpack.c.bf16 %v2654_v56, %v2653_v33 }
 0x40d   :  { %2296 = vmatmul.mubr.f32.gmra.mrb[94].mxu0 %v2154_v20  ;;  %v5429_v20 = vmul.f32 %v4160_v35, %v4160_v35  ;;  %3824 = vmatprep.subr.bf16.mxu1 %v3823_v4  ;;  %v2652_v35 = vld [vmem:[%s6047_s8 + $0x68] sm:$0xff] }
 0x40e   :  { %v3835_v41 = vpack.c.bf16 %v2652_v35, %v2651_v34 }
 0x40f   :  { %v6055_v12 = vpack.i.bf16 %v5429_v20, %v5427_v37 }
 0x410   :  { %3826 = vmatpush3.bf16.msra.mxu1 %v3823_v4 }
 0x411   :  { %3828 = vmatprep.subr.bf16.mxu1 %v3827_v18 }
 0x414   :  { %3830 = vmatpush3.bf16.msra.mxu1 %v3827_v18 }
 0x415   :  { %3832 = vmatprep.subr.bf16.mxu1 %v3831_v58 }
 0x418   :  { %3834 = vmatpush3.bf16.msra.mxu1 %v3831_v58 }
 0x419   :  { %3836 = vmatprep.subr.bf16.mxu1 %v3835_v41 }
 0x41c   :  { %3838 = vmatpush3.bf16.msra.mxu1 %v3835_v41 }
 0x41d   :  { %3840 = vmatprep.subr.bf16.mxu1 %v3839_v53 }
 0x420   :  { %3842 = vmatpush3.bf16.msra.mxu1 %v3839_v53 }
 0x46d   :  { %v3883_v31 = vpop.permute.xlu1 %3882 }
 0x4a2   :  { %v3439_v43 = vpop.f32.mrb[32].mxu1 }
 0x4a3   :  { %v3440_v48 = vpop.f32.mrb[33].mxu1 }
 0x4a4   :  { %v3441_v29 = vadd.f32 %v3440_v48, %v3439_v43  ;;  %v3519_v51 = vpop.f32.mrb[64].mxu0  ;;  %v61_v48 = vld [vmem:[%s6040_s1 + $0x8] sm:$0xff] }
 0x4a5   :  { %v3520_v57 = vpop.f32.mrb[65].mxu0 }
 0x4a6   :  { %v2301_v39 = vmul.f32 %v3441_v29, %v3441_v29  ;;  %v3521_v49 = vadd.f32 %v3520_v57, %v3519_v51  ;;  %v3442_v4 = vpop.f32.mrb[34].mxu1 }
 0x4a7   :  { %v3443_v13 = vpop.f32.mrb[35].mxu1 }
 0x4a8   :  { %v2317_v18 = vsub.f32 %v2301_v39, %v3521_v49  ;;  %v3444_v54 = vadd.f32 %v3443_v13, %v3442_v4  ;;  %v3522_v25 = vpop.f32.mrb[66].mxu0 }
 0x4a9   :  { %v3523_v58 = vpop.f32.mrb[67].mxu0 }
 0x4aa   :  { %v5486_v34 = vadd.f32 %v2317_v18, %v60_v10  ;;  %v2302_v35 = vmul.f32 %v3444_v54, %v3444_v54  ;;  %v3524_v41 = vadd.f32 %v3523_v58, %v3522_v25  ;;  %v3445_v43 = vpop.f32.mrb[36].mxu1  ;;  %v2349_v57 = vmul.f32 %v2317_v18, %v60_v10  ;;  %v62_v54 = vld [vmem:[%s6040_s1 + $0x10] sm:$0xff] }
 0x4ab   :  { %v3446_v29 = vpop.f32.mrb[37].mxu1 }
 0x4ac   :  { %v2318_v51 = vsub.f32 %v2302_v35, %v3524_v41  ;;  %v3447_v33 = vadd.f32 %v3446_v29, %v3445_v43  ;;  %v3525_v56 = vpop.f32.mrb[68].mxu0 }
 0x4ad   :  { %v3526_v8 = vpop.f32.mrb[69].mxu0 }
 0x4ae   :  { %v5491_v39 = vadd.f32 %v2318_v51, %v61_v48  ;;  %v2350_v49 = vmul.f32 %v2318_v51, %v61_v48  ;;  %v2303_v53 = vmul.f32 %v3447_v33, %v3447_v33  ;;  %v3527_v4 = vadd.f32 %v3526_v8, %v3525_v56  ;;  %v3448_v13 = vpop.f32.mrb[38].mxu1  ;;  %v63_v8 = vld [vmem:[%s6040_s1 + $0x18] sm:$0xff] }
 0x4af   :  { %v3449_v25 = vpop.f32.mrb[39].mxu1 }
 0x4b0   :  { %v2319_v58 = vsub.f32 %v2303_v53, %v3527_v4  ;;  %v3450_v47 = vadd.f32 %v3449_v25, %v3448_v13  ;;  %v3528_v40 = vpop.f32.mrb[70].mxu0  ;;  %v3876_v2 = vpack.i.bf16 %v2350_v49, %v2349_v57 }
 0x4b1   :  { %v3529_v35 = vpop.f32.mrb[71].mxu0 }
 0x4b2   :  { %v5496_v41 = vadd.f32 %v2319_v58, %v62_v54  ;;  %v2304_v10 = vmul.f32 %v3450_v47, %v3450_v47  ;;  %v3530_v18 = vadd.f32 %v3529_v35, %v3528_v40  ;;  %v3451_v43 = vpop.f32.mrb[40].mxu1  ;;  %3877 = vrot.lane.b32.xlu0 %v3876_v2, %s4189_s6  ;;  %v2351_v56 = vmul.f32 %v2319_v58, %v62_v54  ;;  %v64_v2 = vld [vmem:[%s6040_s1 + $0x20] sm:$0xff] }
 0x4b3   :  { %v3452_v48 = vpop.f32.mrb[41].mxu1 }
 0x4b4   :  { %v2320_v29 = vsub.f32 %v2304_v10, %v3530_v18  ;;  %v3453_v51 = vadd.f32 %v3452_v48, %v3451_v43  ;;  %v3531_v33 = vpop.f32.mrb[72].mxu0 }
 0x4b5   :  { %v3532_v53 = vpop.f32.mrb[73].mxu0 }
 0x4b6   :  { %v5502_v57 = vadd.f32 %v2320_v29, %v63_v8  ;;  %v2352_v49 = vmul.f32 %v2320_v29, %v63_v8  ;;  %v2305_v4 = vmul.f32 %v3453_v51, %v3453_v51  ;;  %v3533_v47 = vadd.f32 %v3532_v53, %v3531_v33  ;;  %v3454_v40 = vpop.f32.mrb[42].mxu1  ;;  %3892 = vrot.lane.b32.xlu0 %v3891_v52, %s4187_s24 }
 0x4b7   :  { %v3455_v13 = vpop.f32.mrb[43].mxu1 }
 0x4b8   :  { %v2321_v25 = vsub.f32 %v2305_v4, %v3533_v47  ;;  %v3456_v35 = vadd.f32 %v3455_v13, %v3454_v40  ;;  %v3534_v54 = vpop.f32.mrb[74].mxu0  ;;  %v3896_v58 = vpack.i.bf16 %v2352_v49, %v2351_v56  ;;  %v66_v13 = vld [vmem:[%s6040_s1 + $0x30] sm:$0xff] }
 0x4b9   :  { %v3535_v10 = vpop.f32.mrb[75].mxu0 }
 0x4ba   :  { %v5511_v18 = vadd.f32 %v2321_v25, %v64_v2  ;;  %v2306_v43 = vmul.f32 %v3456_v35, %v3456_v35  ;;  %v3536_v8 = vadd.f32 %v3535_v10, %v3534_v54  ;;  %v3457_v48 = vpop.f32.mrb[44].mxu1  ;;  %3897 = vrot.lane.b32.xlu1 %v3896_v58, %s4189_s6  ;;  %v2353_v33 = vmul.f32 %v2321_v25, %v64_v2 }
 0x4bb   :  { %v3458_v24 = vpop.f32.mrb[45].mxu1 }
 0x4bc   :  { %v2322_v52 = vsub.f32 %v2306_v43, %v3536_v8  ;;  %v3459_v29 = vadd.f32 %v3458_v24, %v3457_v48  ;;  %v3537_v51 = vpop.f32.mrb[76].mxu0 }
 0x4bd   :  { %v3538_v53 = vpop.f32.mrb[77].mxu0 }
 0x4be   :  { %v5517_v4 = vadd.f32 %v2322_v52, %v65_v23  ;;  %v2354_v56 = vmul.f32 %v2322_v52, %v65_v23  ;;  %v2307_v49 = vmul.f32 %v3459_v29, %v3459_v29  ;;  %v3539_v47 = vadd.f32 %v3538_v53, %v3537_v51  ;;  %v3460_v40 = vpop.f32.mrb[46].mxu1  ;;  %3902 = vrot.lane.b32.xlu1 %v3901_v32, %s4188_s25 }
 0x4bf   :  { %v3461_v35 = vpop.f32.mrb[47].mxu1 }
 0x4c0   :  { %v2323_v54 = vsub.f32 %v2307_v49, %v3539_v47  ;;  %v3462_v58 = vadd.f32 %v3461_v35, %v3460_v40  ;;  %v3540_v2 = vpop.f32.mrb[78].mxu0  ;;  %v3911_v25 = vpack.i.bf16 %v2354_v56, %v2353_v33 }
 0x4c1   :  { %v3541_v10 = vpop.f32.mrb[79].mxu0 }
 0x4c2   :  { %v5526_v43 = vadd.f32 %v2323_v54, %v66_v13  ;;  %v2308_v8 = vmul.f32 %v3462_v58, %v3462_v58  ;;  %v3542_v48 = vadd.f32 %v3541_v10, %v3540_v2  ;;  %v3463_v23 = vpop.f32.mrb[48].mxu1  ;;  %3912 = vrot.lane.b32.xlu0 %v3911_v25, %s4189_s6  ;;  %3907 = vrot.lane.b32.xlu1 %v3906_v63, %s4187_s24 }
 0x4c3   :  { %v3464_v45 = vpop.f32.mrb[49].mxu1  ;;  %v2355_v29 = vmul.f32 %v2323_v54, %v66_v13 }
 0x4c4   :  { %v2324_v32 = vsub.f32 %v2308_v8, %v3542_v48  ;;  %v3465_v24 = vadd.f32 %v3464_v45, %v3463_v23  ;;  %v3543_v52 = vpop.f32.mrb[80].mxu0 }
 0x4c5   :  { %v3544_v51 = vpop.f32.mrb[81].mxu0 }
 0x4c6   :  { %v5536_v33 = vadd.f32 %v2324_v32, %v67_v28  ;;  %v2356_v53 = vmul.f32 %v2324_v32, %v67_v28  ;;  %v2309_v56 = vmul.f32 %v3465_v24, %v3465_v24  ;;  %v3545_v49 = vadd.f32 %v3544_v51, %v3543_v52  ;;  %v3466_v47 = vpop.f32.mrb[50].mxu1  ;;  %3917 = vrot.lane.b32.xlu0 %v3916_v0, %s4188_s25 }
 0x4c7   :  { %v3467_v38 = vpop.f32.mrb[51].mxu1 }
 0x4c8   :  { %v2325_v63 = vsub.f32 %v2309_v56, %v3545_v49  ;;  %v3468_v40 = vadd.f32 %v3467_v38, %v3466_v47  ;;  %v3546_v13 = vpop.f32.mrb[82].mxu0  ;;  %v3926_v35 = vpack.i.bf16 %v2356_v53, %v2355_v29 }
 0x4c9   :  { %v3547_v54 = vpop.f32.mrb[83].mxu0 }
 0x4ca   :  { %v5545_v58 = vadd.f32 %v2325_v63, %v68_v59  ;;  %v2310_v2 = vmul.f32 %v3468_v40, %v3468_v40  ;;  %v3548_v25 = vadd.f32 %v3547_v54, %v3546_v13  ;;  %v3469_v10 = vpop.f32.mrb[52].mxu1  ;;  %3927 = vrot.lane.b32.xlu1 %v3926_v35, %s4189_s6  ;;  %3922 = vrot.lane.b32.xlu0 %v3921_v60, %s4187_s24 }
 0x4cb   :  { %v3470_v44 = vpop.f32.mrb[53].mxu1  ;;  %v2357_v23 = vmul.f32 %v2325_v63, %v68_v59 }
 0x4cc   :  { %v2326_v0 = vsub.f32 %v2310_v2, %v3548_v25  ;;  %v3471_v8 = vadd.f32 %v3470_v44, %v3469_v10  ;;  %v3549_v48 = vpop.f32.mrb[84].mxu0 }
 0x4cd   :  { %v3550_v28 = vpop.f32.mrb[85].mxu0 }
 0x4ce   :  { %v5555_v45 = vadd.f32 %v2326_v0, %v69_v61  ;;  %v2358_v32 = vmul.f32 %v2326_v0, %v69_v61  ;;  %v2311_v24 = vmul.f32 %v3471_v8, %v3471_v8  ;;  %v3551_v52 = vadd.f32 %v3550_v28, %v3549_v48  ;;  %v3472_v29 = vpop.f32.mrb[54].mxu1  ;;  %3932 = vrot.lane.b32.xlu1 %v3931_v46, %s4188_s25 }
 0x4cf   :  { %v3473_v55 = vpop.f32.mrb[55].mxu1 }
 0x4d0   :  { %v2327_v60 = vsub.f32 %v2311_v24, %v3551_v52  ;;  %v3474_v51 = vadd.f32 %v3473_v55, %v3472_v29  ;;  %v3552_v53 = vpop.f32.mrb[86].mxu0  ;;  %v3941_v56 = vpack.i.bf16 %v2358_v32, %v2357_v23 }
 0x4d1   :  { %v3553_v49 = vpop.f32.mrb[87].mxu0 }
 0x4d2   :  { %v5564_v47 = vadd.f32 %v2327_v60, %v70_v42  ;;  %v2312_v59 = vmul.f32 %v3474_v51, %v3474_v51  ;;  %v3554_v38 = vadd.f32 %v3553_v49, %v3552_v53  ;;  %v3475_v63 = vpop.f32.mrb[56].mxu1  ;;  %3942 = vrot.lane.b32.xlu0 %v3941_v56, %s4189_s6  ;;  %3937 = vrot.lane.b32.xlu1 %v3936_v9, %s4187_s24 }
 0x4d3   :  { %v3476_v6 = vpop.f32.mrb[57].mxu1  ;;  %v2359_v35 = vmul.f32 %v2327_v60, %v70_v42 }
 0x4d4   :  { %v2328_v46 = vsub.f32 %v2312_v59, %v3554_v38  ;;  %v3477_v40 = vadd.f32 %v3476_v6, %v3475_v63  ;;  %v3555_v13 = vpop.f32.mrb[88].mxu0 }
 0x4d5   :  { %v3556_v54 = vpop.f32.mrb[89].mxu0 }
 0x4d6   :  { %v5574_v2 = vadd.f32 %v2328_v46, %v71_v5  ;;  %v2360_v25 = vmul.f32 %v2328_v46, %v71_v5  ;;  %v2313_v10 = vmul.f32 %v3477_v40, %v3477_v40  ;;  %v3557_v61 = vadd.f32 %v3556_v54, %v3555_v13  ;;  %v3478_v44 = vpop.f32.mrb[58].mxu1  ;;  %3947 = vrot.lane.b32.xlu0 %v3946_v17, %s4188_s25 }
 0x4d7   :  { %v3479_v1 = vpop.f32.mrb[59].mxu1 }
 0x4d8   :  { %v2329_v9 = vsub.f32 %v2313_v10, %v3557_v61  ;;  %v3480_v0 = vadd.f32 %v3479_v1, %v3478_v44  ;;  %v3558_v8 = vpop.f32.mrb[90].mxu0  ;;  %v3956_v48 = vpack.i.bf16 %v2360_v25, %v2359_v35  ;;  %v6053_v25 = vpack.i.bf16 %v5411_v7, %v5409_v3 }
 0x4d9   :  { %v3559_v23 = vpop.f32.mrb[91].mxu0  ;;  %v6054_v61 = vpack.i.bf16 %v5425_v36, %v5420_v16  ;;  %v3885_v44 = vunpack.i.h.bf16 %v3883_v31 }
 0x4da   :  { %v5583_v28 = vadd.f32 %v2329_v9, %v72_v11  ;;  %v2314_v32 = vmul.f32 %v3480_v0, %v3480_v0  ;;  %v3560_v24 = vadd.f32 %v3559_v23, %v3558_v8  ;;  %v3481_v52 = vpop.f32.mrb[60].mxu1  ;;  %3957 = vrot.lane.b32.xlu1 %v3956_v48, %s4189_s6  ;;  %3952 = vrot.lane.b32.xlu0 %v3951_v26, %s4187_s24 }
 0x4db   :  { %v3482_v15 = vpop.f32.mrb[61].mxu1  ;;  %v2361_v55 = vmul.f32 %v2329_v9, %v72_v11  ;;  %v3884_v11 = vunpack.i.l.bf16 %v3883_v31 }
 0x4dc   :  { %v2330_v17 = vsub.f32 %v2314_v32, %v3560_v24  ;;  %v3483_v29 = vadd.f32 %v3482_v15, %v3481_v52  ;;  %v3561_v42 = vpop.f32.mrb[92].mxu0 }
 0x4dd   :  { %v3562_v60 = vpop.f32.mrb[93].mxu0 }
 0x4de   :  { %v5593_v51 = vadd.f32 %v2330_v17, %v73_v50  ;;  %v2362_v53 = vmul.f32 %v2330_v17, %v73_v50  ;;  %v2315_v56 = vmul.f32 %v3483_v29, %v3483_v29  ;;  %v3563_v49 = vadd.f32 %v3562_v60, %v3561_v42  ;;  %3962 = vrot.lane.b32.xlu1 %v3961_v62, %s4188_s25  ;;  %v3484_v59 = vpop.f32.mrb[62].mxu1 }
 0x4df   :  { %v3485_v19 = vpop.f32.mrb[63].mxu1 }
 0x4e0   :  { %v2331_v26 = vsub.f32 %v2315_v56, %v3563_v49  ;;  %v3486_v38 = vadd.f32 %v3485_v19, %v3484_v59  ;;  %v3564_v63 = vpop.f32.mrb[94].mxu0  ;;  %v3971_v5 = vpack.i.bf16 %v2362_v53, %v2361_v55 }
 0x4e1   :  { %v3565_v6 = vpop.f32.mrb[95].mxu0 }
 0x4e2   :  { %v5602_v46 = vadd.f32 %v2331_v26, %v74_v14  ;;  %v2316_v40 = vmul.f32 %v3486_v38, %v3486_v38  ;;  %v3566_v13 = vadd.f32 %v3565_v6, %v3564_v63  ;;  %3972 = vrot.lane.b32.xlu0 %v3971_v5, %s4189_s6  ;;  %3967 = vrot.lane.b32.xlu1 %v3966_v30, %s4187_s24  ;;  %v3888_v30 = vpop.permute.xlu1 %3887 }
 0x4e3   :  { %v2363_v62 = vmul.f32 %v2331_v26, %v74_v14  ;;  %v3890_v3 = vunpack.i.h.bf16 %v3888_v30  ;;  %v3889_v0 = vunpack.i.l.bf16 %v3888_v30 }
 0x4e4   :  { %v2332_v22 = vsub.f32 %v2316_v40, %v3566_v13 }
 0x4e6   :  { %v5612_v35 = vadd.f32 %v2332_v22, %v75_v21  ;;  %v2364_v54 = vmul.f32 %v2332_v22, %v75_v21  ;;  %3977 = vrot.lane.b32.xlu0 %v6053_v25, %s4188_s25 }
 0x4e8   :  { %v3986_v10 = vpack.i.bf16 %v2364_v54, %v2363_v62 }
 0x4ea   :  { %3987 = vrot.lane.b32.xlu1 %v3986_v10, %s4189_s6  ;;  %3982 = vrot.lane.b32.xlu0 %v6054_v61, %s4187_s24 }
 0x4ee   :  { %3992 = vrot.lane.b32.xlu1 %v6055_v12, %s4188_s25 }
 0x524   :  { %v3878_v1 = vpop.permute.xlu0 %3877 }
 0x525   :  { %v3880_v7 = vunpack.i.h.bf16 %v3878_v1  ;;  %v3879_v9 = vunpack.i.l.bf16 %v3878_v1 }
 0x527   :  { %v2590_v16 = vsel %vm340_vm0, %v5491_v39, %v3880_v7  ;;  %v2589_v36 = vsel %vm340_vm0, %v5486_v34, %v3879_v9 }
 0x528   :  { %v2606_v37 = vsel %vm2605_vm2, %v2589_v36, %v3884_v11  ;;  %v2607_v20 = vsel %vm2605_vm2, %v2590_v16, %v3885_v44  ;;  %v3893_v23 = vpop.permute.xlu0 %3892 }
 0x529   :  { %v2623_v8 = vsel %vm2622_vm3, %v2606_v37, %v3889_v0  ;;  %v2624_v48 = vsel %vm2622_vm3, %v2607_v20, %v3890_v3  ;;  %v3895_v50 = vunpack.i.h.bf16 %v3893_v23  ;;  %v3894_v15 = vunpack.i.l.bf16 %v3893_v23 }
 0x52a   :  { %3648 = vmatprep.mubr.f32.mxu1 %v2623_v8 }
 0x52b   :  { %3649 = vmatmul.mubr.f32.vlgmr.msra.gmra.mrb[64].mxu1 %v2624_v48 }
 0x52c   :  { %v3898_v32 = vpop.permute.xlu1 %3897 }
 0x52d   :  { %v3900_v24 = vunpack.i.h.bf16 %v3898_v32  ;;  %v3899_v52 = vunpack.i.l.bf16 %v3898_v32 }
 0x52f   :  { %v2591_v39 = vsel %vm340_vm0, %v5496_v41, %v3899_v52  ;;  %v2592_v34 = vsel %vm340_vm0, %v5502_v57, %v3900_v24 }
 0x530   :  { %v3903_v17 = vpop.permute.xlu1 %3902  ;;  %v2608_v55 = vsel %vm2605_vm2, %v2591_v39, %v3894_v15  ;;  %v2609_v60 = vsel %vm2605_vm2, %v2592_v34, %v3895_v50 }
 0x531   :  { %v3905_v29 = vunpack.i.h.bf16 %v3903_v17  ;;  %v3904_v42 = vunpack.i.l.bf16 %v3903_v17 }
 0x533   :  { %v2625_v53 = vsel %vm2622_vm3, %v2608_v55, %v3904_v42  ;;  %v2626_v56 = vsel %vm2622_vm3, %v2609_v60, %v3905_v29 }
 0x534   :  { %v3913_v49 = vpop.permute.xlu0 %3912  ;;  %3651 = vmatprep.mubr.f32.mxu1 %v2625_v53  ;;  %v3908_v19 = vpop.permute.xlu1 %3907 }
 0x535   :  { %v3915_v59 = vunpack.i.h.bf16 %v3913_v49  ;;  %v3914_v14 = vunpack.i.l.bf16 %v3913_v49  ;;  %3652 = vmatmul.mubr.f32.gmra.mrb[66].mxu1 %v2626_v56  ;;  %v3910_v41 = vunpack.i.h.bf16 %v3908_v19  ;;  %v3909_v26 = vunpack.i.l.bf16 %v3908_v19 }
 0x537   :  { %v2593_v57 = vsel %vm340_vm0, %v5511_v18, %v3914_v14  ;;  %v2594_v38 = vsel %vm340_vm0, %v5517_v4, %v3915_v59 }
 0x538   :  { %v3918_v63 = vpop.permute.xlu0 %3917  ;;  %v2610_v40 = vsel %vm2605_vm2, %v2593_v57, %v3909_v26  ;;  %v2611_v13 = vsel %vm2605_vm2, %v2594_v38, %v3910_v41 }
 0x539   :  { %v3920_v5 = vunpack.i.h.bf16 %v3918_v63  ;;  %v3919_v6 = vunpack.i.l.bf16 %v3918_v63 }
 0x53b   :  { %v2627_v21 = vsel %vm2622_vm3, %v2610_v40, %v3919_v6  ;;  %v2628_v22 = vsel %vm2622_vm3, %v2611_v13, %v3920_v5 }
 0x53c   :  { %v3928_v62 = vpop.permute.xlu1 %3927  ;;  %3654 = vmatprep.mubr.f32.mxu1 %v2627_v21  ;;  %v3923_v10 = vpop.permute.xlu0 %3922 }
 0x53d   :  { %v3930_v54 = vunpack.i.h.bf16 %v3928_v62  ;;  %v3929_v25 = vunpack.i.l.bf16 %v3928_v62  ;;  %3655 = vmatmul.mubr.f32.gmra.mrb[68].mxu1 %v2628_v22  ;;  %v3925_v18 = vunpack.i.h.bf16 %v3923_v10  ;;  %v3924_v61 = vunpack.i.l.bf16 %v3923_v10 }
 0x53f   :  { %v2595_v4 = vsel %vm340_vm0, %v5526_v43, %v3929_v25  ;;  %v2596_v12 = vsel %vm340_vm0, %v5536_v33, %v3930_v54 }
 0x540   :  { %v3933_v31 = vpop.permute.xlu1 %3932  ;;  %v2612_v11 = vsel %vm2605_vm2, %v2595_v4, %v3924_v61  ;;  %v2613_v1 = vsel %vm2605_vm2, %v2596_v12, %v3925_v18 }
 0x541   :  { %v3935_v30 = vunpack.i.h.bf16 %v3933_v31  ;;  %v3934_v44 = vunpack.i.l.bf16 %v3933_v31 }
 0x543   :  { %v2629_v3 = vsel %vm2622_vm3, %v2612_v11, %v3934_v44  ;;  %v2630_v7 = vsel %vm2622_vm3, %v2613_v1, %v3935_v30 }
 0x544   :  { %v3943_v9 = vpop.permute.xlu0 %3942  ;;  %3657 = vmatprep.mubr.f32.mxu1 %v2629_v3  ;;  %v3938_v36 = vpop.permute.xlu1 %3937 }
 0x545   :  { %v3945_v0 = vunpack.i.h.bf16 %v3943_v9  ;;  %v3944_v16 = vunpack.i.l.bf16 %v3943_v9  ;;  %3658 = vmatmul.mubr.f32.gmra.mrb[70].mxu1 %v2630_v7  ;;  %v3940_v43 = vunpack.i.h.bf16 %v3938_v36  ;;  %v3939_v37 = vunpack.i.l.bf16 %v3938_v36 }
 0x547   :  { %v2597_v33 = vsel %vm340_vm0, %v5545_v58, %v3944_v16  ;;  %v2598_v20 = vsel %vm340_vm0, %v5555_v45, %v3945_v0 }
 0x548   :  { %v3948_v8 = vpop.permute.xlu0 %3947  ;;  %v2614_v32 = vsel %vm2605_vm2, %v2597_v33, %v3939_v37  ;;  %v2615_v24 = vsel %vm2605_vm2, %v2598_v20, %v3940_v43 }
 0x549   :  { %v3950_v48 = vunpack.i.h.bf16 %v3948_v8  ;;  %v3949_v23 = vunpack.i.l.bf16 %v3948_v8 }
 0x54b   :  { %v2631_v52 = vsel %vm2622_vm3, %v2614_v32, %v3949_v23  ;;  %v2632_v50 = vsel %vm2622_vm3, %v2615_v24, %v3950_v48 }
 0x54c   :  { %v3958_v15 = vpop.permute.xlu1 %3957  ;;  %3660 = vmatprep.mubr.f32.mxu1 %v2631_v52  ;;  %v3953_v17 = vpop.permute.xlu0 %3952 }
 0x54d   :  { %v3960_v39 = vunpack.i.h.bf16 %v3958_v15  ;;  %v3959_v34 = vunpack.i.l.bf16 %v3958_v15  ;;  %3661 = vmatmul.mubr.f32.gmra.mrb[72].mxu1 %v2632_v50  ;;  %v3955_v58 = vunpack.i.h.bf16 %v3953_v17  ;;  %v3954_v29 = vunpack.i.l.bf16 %v3953_v17 }
 0x54f   :  { %v2599_v45 = vsel %vm340_vm0, %v5564_v47, %v3959_v34  ;;  %v2600_v42 = vsel %vm340_vm0, %v5574_v2, %v3960_v39 }
 0x550   :  { %v3963_v55 = vpop.permute.xlu1 %3962  ;;  %v2616_v56 = vsel %vm2605_vm2, %v2599_v45, %v3954_v29  ;;  %v2617_v49 = vsel %vm2605_vm2, %v2600_v42, %v3955_v58 }
 0x551   :  { %v3965_v60 = vunpack.i.h.bf16 %v3963_v55  ;;  %v3964_v53 = vunpack.i.l.bf16 %v3963_v55 }
 0x553   :  { %v2633_v59 = vsel %vm2622_vm3, %v2616_v56, %v3964_v53  ;;  %v2634_v14 = vsel %vm2622_vm3, %v2617_v49, %v3965_v60 }
 0x554   :  { %v3973_v19 = vpop.permute.xlu0 %3972  ;;  %3663 = vmatprep.mubr.f32.mxu1 %v2633_v59  ;;  %v3968_v57 = vpop.permute.xlu1 %3967 }
 0x555   :  { %v3975_v41 = vunpack.i.h.bf16 %v3973_v19  ;;  %v3974_v26 = vunpack.i.l.bf16 %v3973_v19  ;;  %3664 = vmatmul.mubr.f32.gmra.mrb[74].mxu1 %v2634_v14  ;;  %v3970_v47 = vunpack.i.h.bf16 %v3968_v57  ;;  %v3969_v38 = vunpack.i.l.bf16 %v3968_v57 }
 0x557   :  { %v2601_v2 = vsel %vm340_vm0, %v5583_v28, %v3974_v26  ;;  %v2602_v63 = vsel %vm340_vm0, %v5593_v51, %v3975_v41 }
 0x558   :  { %v3978_v5 = vpop.permute.xlu0 %3977  ;;  %v2618_v13 = vsel %vm2605_vm2, %v2601_v2, %v3969_v38  ;;  %v2619_v21 = vsel %vm2605_vm2, %v2602_v63, %v3970_v47 }
 0x559   :  { %v3980_v6 = vunpack.i.h.bf16 %v3978_v5  ;;  %v3979_v40 = vunpack.i.l.bf16 %v3978_v5 }
 0x55b   :  { %v2635_v22 = vsel %vm2622_vm3, %v2618_v13, %v3979_v40  ;;  %v2636_v62 = vsel %vm2622_vm3, %v2619_v21, %v3980_v6 }
 0x55c   :  { %v3988_v54 = vpop.permute.xlu1 %3987  ;;  %3666 = vmatprep.mubr.f32.mxu1 %v2635_v22  ;;  %v3983_v25 = vpop.permute.xlu0 %3982 }
 0x55d   :  { %v3990_v10 = vunpack.i.h.bf16 %v3988_v54  ;;  %v3989_v18 = vunpack.i.l.bf16 %v3988_v54  ;;  %3667 = vmatmul.mubr.f32.gmra.mrb[76].mxu1 %v2636_v62  ;;  %v3985_v28 = vunpack.i.h.bf16 %v3983_v25  ;;  %v3984_v61 = vunpack.i.l.bf16 %v3983_v25 }
 0x55f   :  { %v2603_v51 = vsel %vm340_vm0, %v5602_v46, %v3989_v18  ;;  %v2604_v4 = vsel %vm340_vm0, %v5612_v35, %v3990_v10  ;;  %v5694_v46 = vld [vmem:[%s6048_s9] ss:$0 sm:$0xff] }
 0x560   :  { %v3993_v12 = vpop.permute.xlu1 %3992  ;;  %v2620_v44 = vsel %vm2605_vm2, %v2603_v51, %v3984_v61  ;;  %v2621_v11 = vsel %vm2605_vm2, %v2604_v4, %v3985_v28 }
 0x561   :  { %v3995_v31 = vunpack.i.h.bf16 %v3993_v12  ;;  %v3994_v30 = vunpack.i.l.bf16 %v3993_v12 }
 0x563   :  { %v2637_v1 = vsel %vm2622_vm3, %v2620_v44, %v3994_v30  ;;  %v2638_v3 = vsel %vm2622_vm3, %v2621_v11, %v3995_v31 }
 0x564   :  { %3669 = vmatprep.mubr.f32.mxu1 %v2637_v1 }
 0x565   :  { %3670 = vmatmul.mubr.f32.gmra.mrb[78].mxu1 %v2638_v3 }
 0x5fe   :  { %v3650_v7 = vpop.f32.mrb[64].mxu1 }
 0x5ff   :  { %v2734_v35 = vadd.f32 %v3650_v7, %v5694_v46  ;;  %v2728_v9 = vpop.f32.mrb[65].mxu1 }
 0x600   :  { %v2729_v0 = vadd.f32 %v5694_v46, %v2728_v9 }
 0x601   :  { %v2824_v16 = vmul.f32 0.2, %v2734_v35  ;;  %vm2808_vm4 = vcmp.gt.f32.partialorder %v2734_v35, 0.0 }
 0x602   :  { %v2823_v36 = vmul.f32 0.2, %v2729_v0  ;;  %vm2807_vm5 = vcmp.gt.f32.partialorder %v2729_v0, 0.0 }
 0x603   :  { %v5698_v43 = vsel %vm2808_vm4, %v2734_v35, %v2824_v16 }
 0x604   :  { %2873 = vrot.lane.b32.xlu1 %v5698_v43, %s4188_s25  ;;  %v5702_v37 = vsel %vm2807_vm5, %v2729_v0, %v2823_v36 }
 0x605   :  { %2871 = vrot.lane.b32.xlu0 %v5702_v37, %s4188_s25 }
 0x608   :  { %v3653_v33 = vpop.f32.mrb[66].mxu1 }
 0x609   :  { %v2744_v20 = vadd.f32 %v3653_v33, %v5694_v46  ;;  %v2738_v8 = vpop.f32.mrb[67].mxu1 }
 0x60a   :  { %v2739_v48 = vadd.f32 %v5694_v46, %v2738_v8 }
 0x60b   :  { %v2826_v23 = vmul.f32 0.2, %v2744_v20  ;;  %vm2810_vm6 = vcmp.gt.f32.partialorder %v2744_v20, 0.0 }
 0x60c   :  { %v2825_v32 = vmul.f32 0.2, %v2739_v48  ;;  %vm2809_vm7 = vcmp.gt.f32.partialorder %v2739_v48, 0.0 }
 0x60d   :  { %v5708_v24 = vsel %vm2810_vm6, %v2744_v20, %v2826_v23 }
 0x60e   :  { %2877 = vrot.lane.b32.xlu1 %v5708_v24, %s4188_s25  ;;  %v5712_v52 = vsel %vm2809_vm7, %v2739_v48, %v2825_v32  ;;  %vm4191_vm7 = vmmov 0  }
 0x60f   :  { %2875 = vrot.lane.b32.xlu0 %v5712_v52, %s4188_s25 }
 0x610   :  { %v3656_v50 = vpop.f32.mrb[68].mxu1 }
 0x611   :  { %v2754_v15 = vadd.f32 %v3656_v50, %v5694_v46  ;;  %v2748_v39 = vpop.f32.mrb[69].mxu1 }
 0x612   :  { %v2749_v34 = vadd.f32 %v5694_v46, %v2748_v39 }
 0x613   :  { %v2828_v17 = vmul.f32 0.2, %v2754_v15  ;;  %vm2812_vm8 = vcmp.gt.f32.partialorder %v2754_v15, 0.0 }
 0x614   :  { %v2827_v58 = vmul.f32 0.2, %v2749_v34  ;;  %vm2811_vm9 = vcmp.gt.f32.partialorder %v2749_v34, 0.0 }
 0x615   :  { %v5718_v29 = vsel %vm2812_vm8, %v2754_v15, %v2828_v17 }
 0x616   :  { %2881 = vrot.lane.b32.xlu1 %v5718_v29, %s4188_s25  ;;  %v5722_v45 = vsel %vm2811_vm9, %v2749_v34, %v2827_v58 }
 0x617   :  { %2879 = vrot.lane.b32.xlu0 %v5722_v45, %s4188_s25 }
 0x618   :  { %v3659_v42 = vpop.f32.mrb[70].mxu1 }
 0x619   :  { %v2764_v55 = vadd.f32 %v3659_v42, %v5694_v46  ;;  %v2758_v60 = vpop.f32.mrb[71].mxu1 }
 0x61a   :  { %v2759_v53 = vadd.f32 %v5694_v46, %v2758_v60 }
 0x61b   :  { %v2830_v56 = vmul.f32 0.2, %v2764_v55  ;;  %vm2814_vm10 = vcmp.gt.f32.partialorder %v2764_v55, 0.0 }
 0x61c   :  { %v2829_v49 = vmul.f32 0.2, %v2759_v53  ;;  %vm2813_vm11 = vcmp.gt.f32.partialorder %v2759_v53, 0.0 }
 0x61d   :  { %v5728_v59 = vsel %vm2814_vm10, %v2764_v55, %v2830_v56 }
 0x61e   :  { %2885 = vrot.lane.b32.xlu1 %v5728_v59, %s4188_s25  ;;  %v5732_v14 = vsel %vm2813_vm11, %v2759_v53, %v2829_v49 }
 0x61f   :  { %2883 = vrot.lane.b32.xlu0 %v5732_v14, %s4188_s25 }
 0x620   :  { %v3662_v19 = vpop.f32.mrb[72].mxu1 }
 0x621   :  { %v2774_v41 = vadd.f32 %v3662_v19, %v5694_v46  ;;  %v2768_v26 = vpop.f32.mrb[73].mxu1 }
 0x622   :  { %v2769_v57 = vadd.f32 %v5694_v46, %v2768_v26 }
 0x623   :  { %v2832_v47 = vmul.f32 0.2, %v2774_v41  ;;  %vm2816_vm12 = vcmp.gt.f32.partialorder %v2774_v41, 0.0 }
 0x624   :  { %v2831_v38 = vmul.f32 0.2, %v2769_v57  ;;  %vm2815_vm13 = vcmp.gt.f32.partialorder %v2769_v57, 0.0 }
 0x625   :  { %v5738_v2 = vsel %vm2816_vm12, %v2774_v41, %v2832_v47 }
 0x626   :  { %2889 = vrot.lane.b32.xlu1 %v5738_v2, %s4188_s25  ;;  %v5742_v63 = vsel %vm2815_vm13, %v2769_v57, %v2831_v38 }
 0x627   :  { %2887 = vrot.lane.b32.xlu0 %v5742_v63, %s4188_s25 }
 0x628   :  { %v3665_v5 = vpop.f32.mrb[74].mxu1 }
 0x629   :  { %v2784_v6 = vadd.f32 %v3665_v5, %v5694_v46  ;;  %v2778_v40 = vpop.f32.mrb[75].mxu1 }
 0x62a   :  { %v2779_v13 = vadd.f32 %v5694_v46, %v2778_v40 }
 0x62b   :  { %v2834_v21 = vmul.f32 0.2, %v2784_v6  ;;  %vm2818_vm14 = vcmp.gt.f32.partialorder %v2784_v6, 0.0 }
 0x62c   :  { %v2833_v22 = vmul.f32 0.2, %v2779_v13  ;;  %vm2817_vm15 = vcmp.gt.f32.partialorder %v2779_v13, 0.0 }
 0x62d   :  { %v2850_v62 = vsel %vm2818_vm14, %v2784_v6, %v2834_v21  ;;  %v4190_v6 = vmov 0.0|0.0  }
 0x62e   :  { %2893 = vrot.lane.b32.xlu1 %v2850_v62, %s4188_s25  ;;  %v2849_v54 = vsel %vm2817_vm15, %v2779_v13, %v2833_v22  ;;  %3843 = vmatprep.subr.bf16.mxu0 %v4190_v6 }
 0x62f   :  { %2891 = vrot.lane.b32.xlu0 %v2849_v54, %s4188_s25 }
 0x630   :  { %v3668_v25 = vpop.f32.mrb[76].mxu1 }
 0x631   :  { %v2794_v10 = vadd.f32 %v3668_v25, %v5694_v46  ;;  %v2788_v18 = vpop.f32.mrb[77].mxu1 }
 0x632   :  { %v2789_v28 = vadd.f32 %v5694_v46, %v2788_v18 }
 0x633   :  { %v2836_v61 = vmul.f32 0.2, %v2794_v10  ;;  %vm2820_vm1 = vcmp.gt.f32.partialorder %v2794_v10, 0.0 }
 0x634   :  { %v2835_v51 = vmul.f32 0.2, %v2789_v28  ;;  %vm2819_vm4 = vcmp.gt.f32.partialorder %v2789_v28, 0.0 }
 0x635   :  { %v2852_v4 = vsel %vm2820_vm1, %v2794_v10, %v2836_v61 }
 0x636   :  { %2897 = vrot.lane.b32.xlu1 %v2852_v4, %s4188_s25  ;;  %v2851_v12 = vsel %vm2819_vm4, %v2789_v28, %v2835_v51 }
 0x637   :  { %2895 = vrot.lane.b32.xlu0 %v2851_v12, %s4188_s25 }
 0x638   :  { %v3671_v31 = vpop.f32.mrb[78].mxu1 }
 0x639   :  { %v2804_v30 = vadd.f32 %v3671_v31, %v5694_v46  ;;  %v2798_v44 = vpop.f32.mrb[79].mxu1 }
 0x63a   :  { %v2799_v11 = vadd.f32 %v5694_v46, %v2798_v44 }
 0x63b   :  { %v2838_v1 = vmul.f32 0.2, %v2804_v30  ;;  %vm2822_vm5 = vcmp.gt.f32.partialorder %v2804_v30, 0.0 }
 0x63c   :  { %v2837_v3 = vmul.f32 0.2, %v2799_v11  ;;  %vm2821_vm6 = vcmp.gt.f32.partialorder %v2799_v11, 0.0 }
 0x63d   :  { %v2854_v7 = vsel %vm2822_vm5, %v2804_v30, %v2838_v1 }
 0x63e   :  { %2901 = vrot.lane.b32.xlu1 %v2854_v7, %s4188_s25  ;;  %v2853_v35 = vsel %vm2821_vm6, %v2799_v11, %v2837_v3 }
 0x63f   :  { %2899 = vrot.lane.b32.xlu0 %v2853_v35, %s4188_s25  ;;  %s4193_s25 = smov [#allocation3]  }
 0x676   :  { %v2874_v9 = vpop.permute.xlu1 %2873 }
 0x677   :  { %v5759_v0 = vadd.f32 %v2874_v9, %v5698_v43  ;;  %v2872_v16 = vpop.permute.xlu0 %2871 }
 0x678   :  { %v5762_v36 = vadd.f32 %v2872_v16, %v5702_v37 }
 0x679   :  { %2953 = vrot.lane.b32.xlu1 %v5759_v0, %s4187_s24 }
 0x67a   :  { %2951 = vrot.lane.b32.xlu0 %v5762_v36, %s4187_s24  ;;  %v3996_v41 = vpack.i.bf16 %v5759_v0, %v5762_v36 }
 0x680   :  { %v2878_v46 = vpop.permute.xlu1 %2877 }
 0x681   :  { %v5769_v33 = vadd.f32 %v2878_v46, %v5708_v24  ;;  %v2876_v20 = vpop.permute.xlu0 %2875 }
 0x682   :  { %v5772_v8 = vadd.f32 %v2876_v20, %v5712_v52 }
 0x683   :  { %2957 = vrot.lane.b32.xlu1 %v5769_v33, %s4187_s24 }
 0x684   :  { %2955 = vrot.lane.b32.xlu0 %v5772_v8, %s4187_s24  ;;  %v4006_v26 = vpack.i.bf16 %v5769_v33, %v5772_v8 }
 0x688   :  { %v2882_v43 = vpop.permute.xlu1 %2881 }
 0x689   :  { %v5779_v37 = vadd.f32 %v2882_v43, %v5718_v29  ;;  %v2880_v48 = vpop.permute.xlu0 %2879 }
 0x68a   :  { %v5782_v23 = vadd.f32 %v2880_v48, %v5722_v45 }
 0x68b   :  { %2961 = vrot.lane.b32.xlu1 %v5779_v37, %s4187_s24 }
 0x68c   :  { %2959 = vrot.lane.b32.xlu0 %v5782_v23, %s4187_s24  ;;  %v4016_v57 = vpack.i.bf16 %v5779_v37, %v5782_v23 }
 0x690   :  { %v2886_v32 = vpop.permute.xlu1 %2885 }
 0x691   :  { %v5789_v24 = vadd.f32 %v2886_v32, %v5728_v59  ;;  %v2884_v52 = vpop.permute.xlu0 %2883 }
 0x692   :  { %v5792_v50 = vadd.f32 %v2884_v52, %v5732_v14 }
 0x693   :  { %2965 = vrot.lane.b32.xlu1 %v5789_v24, %s4187_s24 }
 0x694   :  { %2963 = vrot.lane.b32.xlu0 %v5792_v50, %s4187_s24  ;;  %v4026_v47 = vpack.i.bf16 %v5789_v24, %v5792_v50 }
 0x698   :  { %v2890_v15 = vpop.permute.xlu1 %2889 }
 0x699   :  { %v5799_v39 = vadd.f32 %v2890_v15, %v5738_v2  ;;  %v2888_v34 = vpop.permute.xlu0 %2887 }
 0x69a   :  { %v5802_v17 = vadd.f32 %v2888_v34, %v5742_v63 }
 0x69b   :  { %2969 = vrot.lane.b32.xlu1 %v5799_v39, %s4187_s24 }
 0x69c   :  { %2967 = vrot.lane.b32.xlu0 %v5802_v17, %s4187_s24  ;;  %v4036_v38 = vpack.i.bf16 %v5799_v39, %v5802_v17 }
 0x6a0   :  { %v2894_v58 = vpop.permute.xlu1 %2893 }
 0x6a1   :  { %v5808_v29 = vadd.f32 %v2894_v58, %v2850_v62  ;;  %v2892_v45 = vpop.permute.xlu0 %2891 }
 0x6a2   :  { %v5810_v42 = vadd.f32 %v2892_v45, %v2849_v54 }
 0x6a3   :  { %2973 = vrot.lane.b32.xlu1 %v5808_v29, %s4187_s24 }
 0x6a4   :  { %2971 = vrot.lane.b32.xlu0 %v5810_v42, %s4187_s24  ;;  %v4046_v2 = vpack.i.bf16 %v5808_v29, %v5810_v42 }
 0x6a8   :  { %v2898_v55 = vpop.permute.xlu1 %2897 }
 0x6a9   :  { %v5816_v60 = vadd.f32 %v2898_v55, %v2852_v4  ;;  %v2896_v53 = vpop.permute.xlu0 %2895 }
 0x6aa   :  { %v5818_v56 = vadd.f32 %v2896_v53, %v2851_v12  ;;  %v6056_v53 = vmov 0.0  }
 0x6ab   :  { %2977 = vrot.lane.b32.xlu1 %v5816_v60, %s4187_s24  ;;  %3704 = vmatprep.mubr.msk.f32.mxu0 %vm4191_vm7, %v6056_v53 }
 0x6ac   :  { %2975 = vrot.lane.b32.xlu0 %v5818_v56, %s4187_s24  ;;  %v4056_v63 = vpack.i.bf16 %v5816_v60, %v5818_v56 }
 0x6b0   :  { %v2902_v49 = vpop.permute.xlu1 %2901 }
 0x6b1   :  { %v5824_v59 = vadd.f32 %v2902_v49, %v2854_v7  ;;  %v2900_v14 = vpop.permute.xlu0 %2899 }
 0x6b2   :  { %v5826_v19 = vadd.f32 %v2900_v14, %v2853_v35 }
 0x6b3   :  { %2981 = vrot.lane.b32.xlu1 %v5824_v59, %s4187_s24 }
 0x6b4   :  { %2979 = vrot.lane.b32.xlu0 %v5826_v19, %s4187_s24  ;;  %v4066_v5 = vpack.i.bf16 %v5824_v59, %v5826_v19 }
 0x6b8   :  { %3997 = vrot.lane.b32.xlu0 %v3996_v41, %s4189_s6 }
 0x6bc   :  { %4007 = vrot.lane.b32.xlu0 %v4006_v26, %s4189_s6 }
 0x6c0   :  { %4017 = vrot.lane.b32.xlu0 %v4016_v57, %s4189_s6 }
 0x6c4   :  { %4027 = vrot.lane.b32.xlu0 %v4026_v47, %s4189_s6  ;;  %v3192_v47 = vld [vmem:[#allocation2] sm:$0x1] }
 0x6c8   :  { %4037 = vrot.lane.b32.xlu0 %v4036_v38, %s4189_s6  ;;  %v4192_v38 = vmov 0  }
 0x6c9   :  { %4076 = vset.pattern.permute.xlu0 %v4192_v38 }
 0x6cc   :  { %4047 = vrot.lane.b32.xlu0 %v4046_v2, %s4189_s6 }
 0x6d0   :  { %4057 = vrot.lane.b32.xlu0 %v4056_v63, %s4189_s6 }
 0x6d4   :  { %4067 = vrot.lane.b32.xlu0 %v4066_v5, %s4189_s6 }
 0x6d8   :  { %3195 = vperm.xlu0 %4076, %v3192_v47  }
 0x6eb   :  { %v2954_v40 = vpop.permute.xlu1 %2953 }
 0x6ec   :  { %v3016_v13 = vmul.f32 %v2954_v40, %v5759_v0  ;;  %v2952_v21 = vpop.permute.xlu0 %2951 }
 0x6ed   :  { %v3015_v22 = vmul.f32 %v2952_v21, %v5762_v36 }
 0x6ef   :  { %v4001_v62 = vpack.i.bf16 %v3016_v13, %v3015_v22 }
 0x6f1   :  { %4002 = vrot.lane.b32.xlu1 %v4001_v62, %s4189_s6  ;;  %v3000_v62 = vadd.f32 %v2954_v40, %v5759_v0 }
 0x6f5   :  { %v5860_v54 = vpop.permute.xlu1 %2957 }
 0x6f6   :  { %v3018_v25 = vmul.f32 %v5860_v54, %v5769_v33  ;;  %v5864_v10 = vpop.permute.xlu0 %2955 }
 0x6f7   :  { %v3017_v18 = vmul.f32 %v5864_v10, %v5772_v8 }
 0x6f9   :  { %v4011_v28 = vpack.i.bf16 %v3018_v25, %v3017_v18  ;;  %v2999_v25 = vadd.f32 %v2952_v21, %v5762_v36 }
 0x6fb   :  { %4012 = vrot.lane.b32.xlu1 %v4011_v28, %s4189_s6 }
 0x6fd   :  { %v5869_v61 = vpop.permute.xlu1 %2961 }
 0x6fe   :  { %v3020_v51 = vmul.f32 %v5869_v61, %v5779_v37  ;;  %v5873_v4 = vpop.permute.xlu0 %2959 }
 0x6ff   :  { %v3019_v12 = vmul.f32 %v5873_v4, %v5782_v23 }
 0x701   :  { %v4021_v31 = vpack.i.bf16 %v3020_v51, %v3019_v12 }
 0x703   :  { %4022 = vrot.lane.b32.xlu1 %v4021_v31, %s4189_s6 }
 0x705   :  { %v5878_v30 = vpop.permute.xlu1 %2965 }
 0x706   :  { %v3022_v44 = vmul.f32 %v5878_v30, %v5789_v24  ;;  %v5882_v11 = vpop.permute.xlu0 %2963 }
 0x707   :  { %v3021_v1 = vmul.f32 %v5882_v11, %v5792_v50 }
 0x709   :  { %v4031_v3 = vpack.i.bf16 %v3022_v44, %v3021_v1 }
 0x70b   :  { %4032 = vrot.lane.b32.xlu1 %v4031_v3, %s4189_s6 }
 0x70d   :  { %v5887_v7 = vpop.permute.xlu1 %2969 }
 0x70e   :  { %v3024_v35 = vmul.f32 %v5887_v7, %v5799_v39  ;;  %v5891_v9 = vpop.permute.xlu0 %2967 }
 0x70f   :  { %v3023_v16 = vmul.f32 %v5891_v9, %v5802_v17 }
 0x711   :  { %v4041_v46 = vpack.i.bf16 %v3024_v35, %v3023_v16 }
 0x713   :  { %4042 = vrot.lane.b32.xlu1 %v4041_v46, %s4189_s6 }
 0x715   :  { %v5896_v20 = vpop.permute.xlu1 %2973 }
 0x716   :  { %v3026_v43 = vmul.f32 %v5896_v20, %v5808_v29  ;;  %v5900_v48 = vpop.permute.xlu0 %2971 }
 0x717   :  { %v3025_v32 = vmul.f32 %v5900_v48, %v5810_v42 }
 0x719   :  { %v4051_v52 = vpack.i.bf16 %v3026_v43, %v3025_v32 }
 0x71b   :  { %4052 = vrot.lane.b32.xlu1 %v4051_v52, %s4189_s6 }
 0x71d   :  { %v5905_v15 = vpop.permute.xlu1 %2977 }
 0x71e   :  { %v3028_v34 = vmul.f32 %v5905_v15, %v5816_v60  ;;  %v5909_v58 = vpop.permute.xlu0 %2975 }
 0x71f   :  { %v3027_v45 = vmul.f32 %v5909_v58, %v5818_v56 }
 0x721   :  { %v4061_v55 = vpack.i.bf16 %v3028_v34, %v3027_v45 }
 0x723   :  { %4062 = vrot.lane.b32.xlu1 %v4061_v55, %s4189_s6 }
 0x725   :  { %v5915_v49 = vpop.permute.xlu1 %2981 }
 0x726   :  { %v3030_v14 = vmul.f32 %v5915_v49, %v5824_v59  ;;  %v5919_v41 = vpop.permute.xlu0 %2979 }
 0x727   :  { %v3029_v26 = vmul.f32 %v5919_v41, %v5826_v19 }
 0x729   :  { %v4071_v57 = vpack.i.bf16 %v3030_v14, %v3029_v26 }
 0x72a   :  { %v3998_v2 = vpop.permute.xlu0 %3997 }
 0x72b   :  { %4072 = vrot.lane.b32.xlu1 %v4071_v57, %s4189_s6  ;;  %v4000_v63 = vunpack.i.h.bf16 %v3998_v2  ;;  %v3999_v5 = vunpack.i.l.bf16 %v3998_v2  ;;  %s3285_s6 = sshll.u32 %s4193_s25, 4  ;;  %s3286_s6 = int_to_ptr.vmem [resolvable:$true] %s3285_s6 }
 0x72c   :  { %s4161_s5 = scalar_lea.vmem %s3286_s6, 16  ;;  %p4166_p1 = scmp.lt.s32.totalorder %s3286_s6, %s3286_s6 }
 0x72d   :  { %v3144_v13 = vsel %vm340_vm0, %v2954_v40, %v4000_v63  ;;  %v3143_v22 = vsel %vm340_vm0, %v2952_v21, %v3999_v5  ;;  %v3002_v40 = vadd.f32 %v5860_v54, %v5769_v33  ;;  %v3001_v21 = vadd.f32 %v5864_v10, %v5772_v8  ;;  %p4162_p0 = scmp.ne.s32.totalorder %s3286_s6, %s4161_s5 }
 0x72e   :  { %v4008_v12 = vpop.permute.xlu0 %4007  ;;  %v3159_v31 = vsel %vm2605_vm2, %v3143_v22, %v2999_v25  ;;  %v3160_v44 = vsel %vm2605_vm2, %v3144_v13, %v3000_v62 }
 0x72f   :  { %v4010_v16 = vunpack.i.h.bf16 %v4008_v12  ;;  %v4009_v46 = vunpack.i.l.bf16 %v4008_v12 }
 0x731   :  { %v3146_v0 = vsel %vm340_vm0, %v5860_v54, %v4010_v16  ;;  %v3145_v36 = vsel %vm340_vm0, %v5864_v10, %v4009_v46  ;;  %v3004_v54 = vadd.f32 %v5869_v61, %v5779_v37  ;;  %v3003_v10 = vadd.f32 %v5873_v4, %v5782_v23 }
 0x732   :  { %v4018_v43 = vpop.permute.xlu0 %4017  ;;  %v3161_v45 = vsel %vm2605_vm2, %v3145_v36, %v3001_v21  ;;  %v3162_v55 = vsel %vm2605_vm2, %v3146_v0, %v3002_v40 }
 0x733   :  { %v4020_v53 = vunpack.i.h.bf16 %v4018_v43  ;;  %v4019_v14 = vunpack.i.l.bf16 %v4018_v43 }
 0x735   :  { %v3148_v33 = vsel %vm340_vm0, %v5869_v61, %v4020_v53  ;;  %v3147_v8 = vsel %vm340_vm0, %v5873_v4, %v4019_v14  ;;  %v3006_v61 = vadd.f32 %v5878_v30, %v5789_v24  ;;  %v3005_v4 = vadd.f32 %v5882_v11, %v5792_v50 }
 0x736   :  { %v4028_v38 = vpop.permute.xlu0 %4027  ;;  %v3163_v13 = vsel %vm2605_vm2, %v3147_v8, %v3003_v10  ;;  %v3164_v22 = vsel %vm2605_vm2, %v3148_v33, %v3004_v54 }
 0x737   :  { %v4030_v62 = vunpack.i.h.bf16 %v4028_v38  ;;  %v4029_v25 = vunpack.i.l.bf16 %v4028_v38 }
 0x739   :  { %v3150_v37 = vsel %vm340_vm0, %v5878_v30, %v4030_v62  ;;  %v3149_v23 = vsel %vm340_vm0, %v5882_v11, %v4029_v25  ;;  %v3008_v30 = vadd.f32 %v5887_v7, %v5799_v39  ;;  %v3007_v11 = vadd.f32 %v5891_v9, %v5802_v17 }
 0x73a   :  { %v4038_v12 = vpop.permute.xlu0 %4037 }
 0x73b   :  { %v4040_v16 = vunpack.i.h.bf16 %v4038_v12  ;;  %v4039_v46 = vunpack.i.l.bf16 %v4038_v12 }
 0x73d   :  { %v3152_v24 = vsel %vm340_vm0, %v5887_v7, %v4040_v16  ;;  %v3151_v50 = vsel %vm340_vm0, %v5891_v9, %v4039_v46  ;;  %v3010_v7 = vadd.f32 %v5896_v20, %v5808_v29  ;;  %v3009_v9 = vadd.f32 %v5900_v48, %v5810_v42 }
 0x73e   :  { %v4048_v21 = vpop.permute.xlu0 %4047 }
 0x73f   :  { %v4049_v53 = vunpack.i.l.bf16 %v4048_v21 }
 0x741   :  { %v3153_v17 = vsel %vm340_vm0, %v5900_v48, %v4049_v53  ;;  %v3011_v48 = vadd.f32 %v5909_v58, %v5818_v56 }
 0x742   :  { %v3169_v10 = vsel %vm2605_vm2, %v3153_v17, %v3009_v9 }
 0x763   :  { %v4003_v18 = vpop.permute.xlu1 %4002 }
 0x764   :  { %v4005_v28 = vunpack.i.h.bf16 %v4003_v18  ;;  %v4004_v51 = vunpack.i.l.bf16 %v4003_v18 }
 0x766   :  { %v3175_v1 = vsel %vm2622_vm3, %v3159_v31, %v4004_v51  ;;  %v3176_v3 = vsel %vm2622_vm3, %v3160_v44, %v4005_v28 }
 0x767   :  { %v3844_v35 = vpack.c.bf16 %v3176_v3, %v3175_v1  ;;  %v3165_v3 = vsel %vm2605_vm2, %v3149_v23, %v3005_v4 }
 0x769   :  { %3845 = vmatpush3.bf16.xpose.msra.mxu0 %v3844_v35  ;;  %v3166_v35 = vsel %vm2605_vm2, %v3150_v37, %v3006_v61 }
 0x76a   :  { %3846 = vmatprep.subr.bf16.mxu0 %v4190_v6 }
 0x76d   :  { %v4013_v32 = vpop.permute.xlu1 %4012 }
 0x76e   :  { %v4015_v52 = vunpack.i.h.bf16 %v4013_v32  ;;  %v4014_v34 = vunpack.i.l.bf16 %v4013_v32 }
 0x770   :  { %v3177_v26 = vsel %vm2622_vm3, %v3161_v45, %v4014_v34  ;;  %v3178_v57 = vsel %vm2622_vm3, %v3162_v55, %v4015_v52  ;;  %v3167_v34 = vsel %vm2605_vm2, %v3151_v50, %v3007_v11  ;;  %v3168_v45 = vsel %vm2605_vm2, %v3152_v24, %v3008_v30 }
 0x771   :  { %v3847_v47 = vpack.c.bf16 %v3178_v57, %v3177_v26  ;;  %v4050_v55 = vunpack.i.h.bf16 %v4048_v21 }
 0x773   :  { %3848 = vmatpush3.bf16.xpose.msra.mxu0 %v3847_v47  ;;  %v3154_v39 = vsel %vm340_vm0, %v5896_v20, %v4050_v55  ;;  %v4058_v47 = vpop.permute.xlu0 %4057  ;;  %v3012_v20 = vadd.f32 %v5905_v15, %v5816_v60 }
 0x774   :  { %3849 = vmatprep.subr.bf16.mxu0 %v4190_v6  ;;  %v3170_v38 = vsel %vm2605_vm2, %v3154_v39, %v3010_v7 }
 0x775   :  { %v4023_v2 = vpop.permute.xlu1 %4022 }
 0x776   :  { %v4025_v63 = vunpack.i.h.bf16 %v4023_v2  ;;  %v4024_v5 = vunpack.i.l.bf16 %v4023_v2  ;;  %v4060_v2 = vunpack.i.h.bf16 %v4058_v47 }
 0x777   :  { %v4068_v62 = vpop.permute.xlu0 %4067 }
 0x778   :  { %v3179_v18 = vsel %vm2622_vm3, %v3163_v13, %v4024_v5  ;;  %v3180_v28 = vsel %vm2622_vm3, %v3164_v22, %v4025_v63  ;;  %v4059_v63 = vunpack.i.l.bf16 %v4058_v47  ;;  %v3156_v29 = vsel %vm340_vm0, %v5905_v15, %v4060_v2 }
 0x779   :  { %v3850_v51 = vpack.c.bf16 %v3180_v28, %v3179_v18  ;;  %v3172_v37 = vsel %vm2605_vm2, %v3156_v29, %v3012_v20  ;;  %v4070_v23 = vunpack.i.h.bf16 %v4068_v62  ;;  %v4069_v61 = vunpack.i.l.bf16 %v4068_v62 }
 0x77a   :  { %v3155_v42 = vsel %vm340_vm0, %v5909_v58, %v4059_v63  ;;  %v3014_v15 = vadd.f32 %v5915_v49, %v5824_v59  ;;  %v3013_v58 = vadd.f32 %v5919_v41, %v5826_v19  ;;  %v3191_v59 = vld [vmem:[%s6049_s10] sm:$0x1]  ;;  %v3200_v19 = vsub.s32 0, %v4475_v27  ;;  %s4165_s10 = scalar_lea.vmem %s3286_s6, 32 }
 0x77b   :  { %3851 = vmatpush3.bf16.xpose.msra.mxu0 %v3850_v51  ;;  %v3171_v51 = vsel %vm2605_vm2, %v3155_v42, %v3011_v48  ;;  %v3158_v60 = vsel %vm340_vm0, %v5915_v49, %v4070_v23  ;;  %v3157_v56 = vsel %vm340_vm0, %v5919_v41, %v4069_v61  ;;  %p4167_p2 = scmp.lt.s32.totalorder %s4165_s10, %s4161_s5 }
 0x77c   :  { %3852 = vmatprep.subr.bf16.mxu0 %v4190_v6  ;;  %v3174_v16 = vsel %vm2605_vm2, %v3158_v60, %v3014_v15 }
 0x77d   :  { %v4033_v31 = vpop.permute.xlu1 %4032  ;;  %p4168_p3 = por %p4167_p2, %p4166_p1 }
 0x77e   :  { %v4035_v44 = vunpack.i.h.bf16 %v4033_v31  ;;  %v4034_v1 = vunpack.i.l.bf16 %v4033_v31 }
 0x77f   :  { %p4169_p4 = pnand %p4168_p3, %p4162_p0 }
 0x780   :  { %v3181_v0 = vsel %vm2622_vm3, %v3165_v3, %v4034_v1  ;;  %v3182_v36 = vsel %vm2622_vm3, %v3166_v35, %v4035_v44  ;;  %v3173_v35 = vsel %vm2605_vm2, %v3157_v56, %v3013_v58 }
 0x781   :  { %v3853_v40 = vpack.c.bf16 %v3182_v36, %v3181_v0 }
 0x783   :  { %3854 = vmatpush3.bf16.xpose.msra.mxu0 %v3853_v40 }
 0x784   :  { %3855 = vmatprep.subr.bf16.mxu0 %v4190_v6 }
 0x785   :  { %v4043_v43 = vpop.permute.xlu1 %4042 }
 0x786   :  { %v4045_v32 = vunpack.i.h.bf16 %v4043_v43  ;;  %v4044_v52 = vunpack.i.l.bf16 %v4043_v43 }
 0x788   :  { %v3183_v14 = vsel %vm2622_vm3, %v3167_v34, %v4044_v52  ;;  %v3184_v26 = vsel %vm2622_vm3, %v3168_v45, %v4045_v32 }
 0x789   :  { %v3856_v57 = vpack.c.bf16 %v3184_v26, %v3183_v14 }
 0x78b   :  { %3857 = vmatpush3.bf16.xpose.msra.mxu0 %v3856_v57 }
 0x78c   :  { %3858 = vmatprep.subr.bf16.mxu0 %v4190_v6 }
 0x78d   :  { %v4053_v33 = vpop.permute.xlu1 %4052 }
 0x78e   :  { %v4055_v8 = vunpack.i.h.bf16 %v4053_v33  ;;  %v4054_v54 = vunpack.i.l.bf16 %v4053_v33 }
 0x790   :  { %v3185_v5 = vsel %vm2622_vm3, %v3169_v10, %v4054_v54  ;;  %v3186_v13 = vsel %vm2622_vm3, %v3170_v38, %v4055_v8 }
 0x791   :  { %v3859_v22 = vpack.c.bf16 %v3186_v13, %v3185_v5 }
 0x793   :  { %3860 = vmatpush3.bf16.xpose.msra.mxu0 %v3859_v22 }
 0x794   :  { %3861 = vmatprep.subr.bf16.mxu0 %v4190_v6 }
 0x795   :  { %v4063_v25 = vpop.permute.xlu1 %4062 }
 0x796   :  { %v4065_v18 = vunpack.i.h.bf16 %v4063_v25  ;;  %v4064_v28 = vunpack.i.l.bf16 %v4063_v25 }
 0x798   :  { %v3187_v4 = vsel %vm2622_vm3, %v3171_v51, %v4064_v28  ;;  %v3188_v12 = vsel %vm2622_vm3, %v3172_v37, %v4065_v18 }
 0x799   :  { %v3862_v31 = vpack.c.bf16 %v3188_v12, %v3187_v4 }
 0x79b   :  { %3863 = vmatpush3.bf16.xpose.msra.mxu0 %v3862_v31 }
 0x79c   :  { %3864 = vmatprep.subr.bf16.mxu0 %v4190_v6  ;;  %v3196_v6 = vpop.permute.xlu0 %3195 }
 0x79d   :  { %v4073_v44 = vpop.permute.xlu1 %4072  ;;  %v3201_v49 = vrot.slane %v3196_v6, %v3200_v19 }
 0x79e   :  { %v4075_v1 = vunpack.i.h.bf16 %v4073_v44  ;;  %v4074_v3 = vunpack.i.l.bf16 %v4073_v44 }
 0x7a0   :  { %v3189_v46 = vsel %vm2622_vm3, %v3173_v35, %v4074_v3  ;;  %v3190_v0 = vsel %vm2622_vm3, %v3174_v16, %v4075_v1 }
 0x7a1   :  { %v3865_v36 = vpack.c.bf16 %v3190_v0, %v3189_v46 }
 0x7a3   :  { %3866 = vmatpush3.bf16.xpose.msra.mxu0 %v3865_v36 }
 0x7aa   :  { %3705 = vmatmul.mubr.f32.vlgmr.msra.gmra.mrb[96].mxu0 %v3191_v59 }
 0x87d   :  { %v3268_v41 = vpop.f32.mrb[96].mxu0 }
 0x87e   :  { %v3269_v40 = vadd.f32 %v3268_v41, %v3201_v49  ;;  %v3706_v24 = vpop.f32.mrb[97].mxu0 }
 0x880   :  { %v3326_v50 = vmul.f32 -1.442695, %v3269_v40 }
 0x882   :  { %4141 = vpow2.f32 %v3326_v50 }
 0x88c   :  { %v4142_v30 = vpop.eup %4141 }
 0x88d   :  { %v3275_v11 = vadd.f32 1.0, %v4142_v30 }
 0x88f   :  { %4143 = vrcp.f32 %v3275_v11 }
 0x899   :  { %v4144_v21 = vpop.eup %4143 }
 0x89a   :  { %3278 = vst [vmem:[#allocation3] sm:$0x1] %v4144_v21 }
 0x89b   :  { %4172 = shalt.err (!%p4169_p4)
}
 0x89c   :  { %s4173_s4 = scalar_lea.hbm %s6051_s12, 16 }
 0x89d   :  { %p4174_p5 = scmp.ne.s32.totalorder %s6051_s12, %s4173_s4  ;;  %p4177_p6 = scmp.lt.u32.totalorder %s4173_s4, %s6051_s12 }
 0x89f   :  { %p4179_p7 = pnand %p4177_p6, %p4174_p5 }
 0x8a1   :  { %4182 = shalt.err (!%p4179_p7)
}
 0x8a2   :  { %3288 = dma.vmem_to_hbm [thread:$0]  %s3286_s6, 16, %s6051_s12, [#allocation4]  }
 0x8a3   :  { %4183 = dma.done.wait [#allocation4], 16  }
 0x8a4   :  { %4184 = vsyncadd [#allocation4], 4294967280 }
 0x8a5   :  { %3292 = vsyncpa [#allocation4], 1 }

</bundles_post_ra>
